<compile_context>
chip_gen: v7x
topology: tpu7x:2x2x1
jax: 0.10.0
libtpu: 0.0.40
codegen_flags: <defaults>
</compile_context>

<pallas_src>
import math
import functools

import jax
import jax.numpy as jnp
from jax.experimental import pallas as pl
from jax.experimental.pallas import tpu as pltpu


# ---------------------------------------------------------------------------
# Fused per-FPN-level RetinaNet head kernel
# ---------------------------------------------------------------------------

def _retina_level_kernel(x_ref, *refs, H, W, PAD, num_convs):
    """Full RetinaNet head for one FPN level / one image (grid step = batch).

    refs layout (in order):
      [tw0, tb0]                              if num_convs >= 1   (fused layer 0)
      [cls_twr, cls_tbr, box_twr, box_tbr]    if num_convs >= 2   (layers 1..)
      clsobj_w, clsobj_b, box_w, box_b, w1, b1, w2, b2
      clsobj_out, box_out, hol_out            (outputs)
      xe, cols, boxfeat                       (VMEM scratch)
    """
    HW = H * W
    Cin = x_ref.shape[1]

    idx = 0
    if num_convs >= 1:
        tw0_ref, tb0_ref = refs[idx], refs[idx + 1]
        idx += 2
    if num_convs >= 2:
        cls_twr_ref, cls_tbr_ref, box_twr_ref, box_tbr_ref = refs[idx:idx + 4]
        idx += 4
    (clsobj_w_ref, clsobj_b_ref, box_w_ref, box_b_ref,
     w1_ref, b1_ref, w2_ref, b2_ref) = refs[idx:idx + 8]
    clsobj_out_ref, box_out_ref, hol_out_ref = refs[idx + 8:idx + 11]
    xe_ref, cols_ref, boxfeat_ref = refs[idx + 11:idx + 14]

    mm_dtype = xe_ref.dtype
    x = x_ref[0]                                       # (Cin, HW) f32

    # Boundary masks for the 8 shifted taps, built ONCE at shape (1, HW) and
    # broadcast by jnp.where (keeps vreg pressure ~Cin x lower than (Cin, HW)).
    hw_idx = jax.lax.broadcasted_iota(jnp.int32, (1, HW), 1)
    if (W & (W - 1)) == 0:
        w_idx = jnp.bitwise_and(hw_idx, W - 1)         # hw % W (power of two)
    else:
        w_idx = jax.lax.rem(hw_idx, W)                 # tiny (1, HW) one-time op
    tap_masks = []
    for dy in range(3):
        for dx in range(3):
            conds = []
            if dy == 0:
                conds.append(hw_idx >= W)              # h >= 1
            if dy == 2:
                conds.append(hw_idx < (H - 1) * W)     # h <= H - 2
            if dx == 0:
                conds.append(w_idx >= 1)               # w >= 1
            if dx == 2:
                conds.append(w_idx < W - 1)            # w <= W - 2
            m = None
            for c in conds:
                m = c if m is None else (m & c)
            tap_masks.append(m)

    # Zero only the halo columns; the interior is overwritten by every im2col.
    xe_ref[:, :PAD] = jnp.zeros((Cin, PAD), mm_dtype)
    xe_ref[:, PAD + HW:] = jnp.zeros((Cin, PAD), mm_dtype)

    def im2col(feat):
        """feat (Cin, HW) -> patch matrix (9*Cin, HW) of a 3x3 / pad=1 conv."""
        xe_ref[:, PAD:PAD + HW] = feat.astype(mm_dtype)     # lane-aligned store
        t = 0
        for dy in range(3):
            for dx in range(3):
                off = (dy - 1) * W + (dx - 1)
                tap = xe_ref[:, PAD + off:PAD + off + HW]   # shifted window load
                m = tap_masks[t]
                if m is not None:
                    tap = jnp.where(m, tap, jnp.zeros((), mm_dtype))
                cols_ref[t * Cin:(t + 1) * Cin, :] = tap
                t += 1
        return cols_ref[...]

    def conv(w, b, cols):
        y = jnp.dot(w, cols, preferred_element_type=jnp.float32) + b
        return jnp.maximum(y, 0.0)                     # ReLU, f32

    if num_convs == 0:
        # Both heads read im2col(x) directly; build it once.
        cols = im2col(x)
        clsobj = jnp.dot(clsobj_w_ref[...], cols,
                         preferred_element_type=jnp.float32) + clsobj_b_ref[...]
        clsobj_out_ref[0] = clsobj.astype(clsobj_out_ref.dtype)
        box = jnp.dot(box_w_ref[...], cols,
                      preferred_element_type=jnp.float32) + box_b_ref[...]
        box_out_ref[0] = box.astype(box_out_ref.dtype)
    else:
        # Fused layer 0 of BOTH towers: one im2col(x), one (2*Cin,9*Cin) matmul.
        cols0 = im2col(x)
        f0 = conv(tw0_ref[...], tb0_ref[...], cols0)   # (2*Cin, HW) f32
        cls_feat = f0[:Cin, :]
        boxfeat_ref[...] = f0[Cin:, :]                 # park the box branch in VMEM

        # cls tower (layers 1..) -> fused (cls_logits ++ objectness) head.
        if num_convs >= 2:
            for i in range(num_convs - 1):
                cls_feat = conv(cls_twr_ref[i], cls_tbr_ref[i], im2col(cls_feat))
        cls_cols = im2col(cls_feat)
        # NOTE: clsobj must be consumed before the box tower reuses cols_ref.
        clsobj = jnp.dot(clsobj_w_ref[...], cls_cols,
                         preferred_element_type=jnp.float32) + clsobj_b_ref[...]
        clsobj_out_ref[0] = clsobj.astype(clsobj_out_ref.dtype)

        # bbox tower (layers 1..) -> bbox_pred head.
        box_feat = boxfeat_ref[...]
        if num_convs >= 2:
            for i in range(num_convs - 1):
                box_feat = conv(box_twr_ref[i], box_tbr_ref[i], im2col(box_feat))
        box_cols = im2col(box_feat)
        box = jnp.dot(box_w_ref[...], box_cols,
                      preferred_element_type=jnp.float32) + box_b_ref[...]
        box_out_ref[0] = box.astype(box_out_ref.dtype)

    # Holistic head: global average pool of the ORIGINAL feature + 2-layer MLP
    # (tiny -> kept in f32).
    pooled = jnp.mean(x, axis=1, keepdims=True).reshape(1, Cin)      # (1, Cin)
    h = jnp.dot(pooled, w1_ref[...],
                preferred_element_type=jnp.float32) + b1_ref[...]
    h = jnp.maximum(h, 0.0)
    hol = jnp.dot(h, w2_ref[...],
                  preferred_element_type=jnp.float32) + b2_ref[...]
    hol_out_ref[0] = hol.astype(hol_out_ref.dtype)


def _whole_spec(shape):
    nd = len(shape)
    return pl.BlockSpec(shape, lambda n: (0,) * nd)


def retina_level_forward(packed, x_nchw):
    """One fused pallas_call: the full RetinaNet head for one FPN level."""
    tensors = packed["tensors"]
    num_convs = packed["num_convs"]
    mm_dtype = packed["matmul_dtype"]
    n_co = packed["n_clsobj"]
    n_box = packed["n_box"]
    Hc = packed["n_holistic"]
    N, Cin, H, W = x_nchw.shape
    HW = H * W
    PAD = ((W + 1 + 127) // 128) * 128                # lane-aligned halo >= W+1

    x_flat = x_nchw.reshape(N, Cin, HW)               # free reshape (NCHW order)

    in_specs = ([pl.BlockSpec((1, Cin, HW), lambda n: (n, 0, 0))]
                + [_whole_spec(t.shape) for t in tensors])
    out_specs = (pl.BlockSpec((1, n_co, HW), lambda n: (n, 0, 0)),
                 pl.BlockSpec((1, n_box, HW), lambda n: (n, 0, 0)),
                 pl.BlockSpec((1, 1, Hc), lambda n: (n, 0, 0)))
    out_shape = (jax.ShapeDtypeStruct((N, n_co, HW), jnp.float32),
                 jax.ShapeDtypeStruct((N, n_box, HW), jnp.float32),
                 jax.ShapeDtypeStruct((N, 1, Hc), jnp.float32))
    scratch_shapes = [
        pltpu.VMEM((Cin, HW + 2 * PAD), mm_dtype),    # zero-haloed activation
        pltpu.VMEM((9 * Cin, HW), mm_dtype),          # im2col patch matrix
        pltpu.VMEM((Cin, HW), jnp.float32),           # parked box-tower feature
    ]

    # Explicit scoped-VMEM budget sized from the actual blocks (+2x headroom).
    mm_item = jnp.dtype(mm_dtype).itemsize
    est = 2 * Cin * HW * 4                                        # input (x2 buf)
    est += 2 * sum(int(t.size) * t.dtype.itemsize for t in tensors)  # weights
    est += 2 * (n_co * HW + n_box * HW + Hc) * 4                  # outputs (x2)
    est += (Cin * (HW + 2 * PAD) + 9 * Cin * HW) * mm_item + Cin * HW * 4
    vmem_limit = int(min(max(2 * est, 32 << 20), 128 << 20))

    kernel = functools.partial(_retina_level_kernel,
                               H=H, W=W, PAD=PAD, num_convs=num_convs)
    clsobj, box, hol = pl.pallas_call(
        kernel,
        grid=(N,),
        in_specs=in_specs,
        out_specs=out_specs,
        out_shape=out_shape,
        scratch_shapes=scratch_shapes,
        compiler_params=pltpu.CompilerParams(
            dimension_semantics=("parallel",),        # v7x: batch over 2 TCs
            vmem_limit_bytes=vmem_limit),
    )(x_flat, *tensors)
    return clsobj, box, hol


# ---------------------------------------------------------------------------
# Parameter init (matches RetinaNetHead.__init__) and kernel packing
# ---------------------------------------------------------------------------

def init_params(key, *, in_channels, num_classes, num_anchors, num_convs,
                num_holistic_classes, prior_prob):
    std = 0.01
    bias_value = -math.log((1.0 - prior_prob) / prior_prob)
    keys = iter(jax.random.split(key, 4 * num_convs + 16))

    def conv(cout, bias_fill=0.0):
        # Conv2d 3x3, stored HWIO (3, 3, Cin, Cout); normal(std=0.01) weights.
        w = std * jax.random.normal(next(keys), (3, 3, in_channels, cout),
                                    jnp.float32)
        b = jnp.full((cout,), bias_fill, jnp.float32)
        return w, b

    return {
        "cls_tower": [conv(in_channels) for _ in range(num_convs)],
        "bbox_tower": [conv(in_channels) for _ in range(num_convs)],
        "cls_logits": conv(num_anchors * num_classes, bias_value),
        "bbox_pred": conv(num_anchors * 4),
        "objectness_logits": conv(num_anchors, bias_value),
        "holistic": (  # Linear weights stored (in, out)
            std * jax.random.normal(next(keys), (in_channels, in_channels),
                                    jnp.float32),
            jnp.zeros((in_channels,), jnp.float32),
            std * jax.random.normal(next(keys),
                                    (in_channels, num_holistic_classes),
                                    jnp.float32),
            jnp.zeros((num_holistic_classes,), jnp.float32),
        ),
    }


def pack_params(params, matmul_dtype=jnp.bfloat16):
    """Pack HWIO conv weights into (Cout, 9*Cin) im2col matrices (matmul dtype),
    fuse the layer-0 tower weights and the cls/objectness heads."""
    def conv_mat(w_hwio):
        kh, kw, cin, cout = w_hwio.shape
        return w_hwio.reshape(kh * kw * cin, cout).T.astype(matmul_dtype)

    cls_w = [conv_mat(w) for w, _ in params["cls_tower"]]
    cls_b = [b.reshape(-1, 1) for _, b in params["cls_tower"]]
    box_w = [conv_mat(w) for w, _ in params["bbox_tower"]]
    box_b = [b.reshape(-1, 1) for _, b in params["bbox_tower"]]
    num_convs = len(cls_w)

    tensors = []
    if num_convs >= 1:                                # fused layer 0 (both towers)
        tensors += [jnp.concatenate([cls_w[0], box_w[0]], axis=0),
                    jnp.concatenate([cls_b[0], box_b[0]], axis=0)]
    if num_convs >= 2:                                # remaining tower layers
        tensors += [jnp.stack(cls_w[1:]), jnp.stack(cls_b[1:]),
                    jnp.stack(box_w[1:]), jnp.stack(box_b[1:])]

    wc, bc = params["cls_logits"]
    wo, bo = params["objectness_logits"]
    clsobj_w = jnp.concatenate([conv_mat(wc), conv_mat(wo)], axis=0)
    clsobj_b = jnp.concatenate([bc, bo]).reshape(-1, 1)
    wb, bb = params["bbox_pred"]
    bpred_w = conv_mat(wb)
    bpred_b = bb.reshape(-1, 1)
    w1, b1, w2, b2 = params["holistic"]               # holistic MLP kept f32
    tensors += [clsobj_w, clsobj_b, bpred_w, bpred_b,
                w1, b1.reshape(1, -1), w2, b2.reshape(1, -1)]

    return {
        "tensors": tuple(tensors),
        "num_convs": num_convs,
        "matmul_dtype": matmul_dtype,
        "in_channels": wc.shape[2],
        "n_cls": wc.shape[-1],
        "n_clsobj": clsobj_w.shape[0],
        "n_box": bpred_w.shape[0],
        "n_holistic": w2.shape[1],
    }


# ---------------------------------------------------------------------------
# RetinaNetHead / RetinaNetModule forward (test mode)
# ---------------------------------------------------------------------------

def retinanet_head_forward(packed, features_nchw):
    n_cls = packed["n_cls"]
    logits, bbox_reg, objectness = [], [], []
    holistic_sum = None
    for feat in features_nchw:
        N, _, H, W = feat.shape
        clsobj, box, hol = retina_level_forward(packed, feat)
        logits.append(clsobj[:, :n_cls, :].reshape(N, n_cls, H, W))
        objectness.append(clsobj[:, n_cls:, :].reshape(N, -1, H, W))
        bbox_reg.append(box.reshape(N, -1, H, W))
        h = hol.reshape(N, -1)
        holistic_sum = h if holistic_sum is None else holistic_sum + h
    return logits, bbox_reg, holistic_sum, objectness


def retinanet_module_forward_test(packed, features_nchw):
    box_cls, box_regression, holistic_cls, objectness_cls = \
        retinanet_head_forward(packed, features_nchw)
    # TODO(synk): anchor_generator, box_selector_test (box decode + NMS) and the
    # loss evaluators are host-side postprocessing with no Pallas equivalent.
    results = {
        "box_cls": box_cls,
        "box_regression": box_regression,
        "holistic_cls": holistic_cls,
        "objectness_cls": objectness_cls,
    }
    return results, {}


# ---------------------------------------------------------------------------
# Pure-JAX reference (XLA) of the same forward, for numerical validation
# ---------------------------------------------------------------------------

def _conv3x3_ref(x, w_hwio, b):
    y = jax.lax.conv_general_dilated(
        x, w_hwio, window_strides=(1, 1), padding=((1, 1), (1, 1)),
        dimension_numbers=("NCHW", "HWIO", "NCHW"),
        precision=jax.lax.Precision.HIGHEST)
    return y + b.reshape(1, -1, 1, 1)


def retinanet_head_ref(params, features_nchw):
    logits, bbox_reg, objectness = [], [], []
    holistic_sum = None
    w1, b1, w2, b2 = params["holistic"]
    for x in features_nchw:
        cls_feat = x
        for w, b in params["cls_tower"]:
            cls_feat = jax.nn.relu(_conv3x3_ref(cls_feat, w, b))
        box_feat = x
        for w, b in params["bbox_tower"]:
            box_feat = jax.nn.relu(_conv3x3_ref(box_feat, w, b))
        logits.append(_conv3x3_ref(cls_feat, *params["cls_logits"]))
        objectness.append(_conv3x3_ref(cls_feat, *params["objectness_logits"]))
        bbox_reg.append(_conv3x3_ref(box_feat, *params["bbox_pred"]))
        pooled = x.mean(axis=(2, 3))
        h = jax.nn.relu(pooled @ w1 + b1)
        hol = h @ w2 + b2
        holistic_sum = hol if holistic_sum is None else holistic_sum + hol
    return logits, bbox_reg, holistic_sum, objectness


# ---------------------------------------------------------------------------
# main
# ---------------------------------------------------------------------------

if __name__ == "__main__":
    # Small synthetic config
    in_channels = 32
    num_classes = 3            # cfg.MODEL.RETINANET.NUM_CLASSES - 1
    num_anchors = 4            # len(ASPECT_RATIOS) * SCALES_PER_OCTAVE
    num_convs = 2              # cfg.MODEL.RETINANET.NUM_CONVS
    num_holistic = 4           # cfg.MODEL.RETINANET.NUM_HOLISTIC_CLASSES - 1
    prior_prob = 0.01

    key = jax.random.PRNGKey(0)
    kparam, kf0, kf1 = jax.random.split(key, 3)

    params = init_params(
        kparam, in_channels=in_channels, num_classes=num_classes,
        num_anchors=num_anchors, num_convs=num_convs,
        num_holistic_classes=num_holistic, prior_prob=prior_prob)

    # Two FPN feature levels, NCHW (PyTorch convention)
    features = [
        jax.random.normal(kf0, (2, in_channels, 16, 16), jnp.float32),
        jax.random.normal(kf1, (2, in_channels, 8, 8), jnp.float32),
    ]

    # XLA reference of the same forward pass
    ref_logits, ref_bbox, ref_hol, ref_obj = retinanet_head_ref(params, features)

    def _check(a, b, tol):
        err = float(jnp.max(jnp.abs(a - b)))
        assert err < tol, f"max abs err {err} (tol {tol})"

    # Validate both the f32 matmul path (tight tolerance) and the bf16 matmul
    # path (production config, looser tolerance for bf16 rounding).
    for mm_dtype, tol in ((jnp.float32, 2e-3), (jnp.bfloat16, 1e-2)):
        packed = pack_params(params, matmul_dtype=mm_dtype)
        results, losses = retinanet_module_forward_test(packed, features)
        jax.block_until_ready(results)

        # shape checks
        assert results["box_cls"][0].shape == (2, num_anchors * num_classes, 16, 16)
        assert results["box_regression"][0].shape == (2, num_anchors * 4, 16, 16)
        assert results["objectness_cls"][1].shape == (2, num_anchors, 8, 8)
        assert results["holistic_cls"].shape == (2, num_holistic)
        assert losses == {}

        # numerical checks
        for lvl in range(len(features)):
            _check(results["box_cls"][lvl], ref_logits[lvl], tol)
            _check(results["box_regression"][lvl], ref_bbox[lvl], tol)
            _check(results["objectness_cls"][lvl], ref_obj[lvl], tol)
        _check(results["holistic_cls"], ref_hol, tol)

    print("KERNEL_OK")
</pallas_src>

<mosaic_0001>
module attributes {stable_mosaic.version = 11 : i64} {
  func.func @_retina_level_kernel(%arg0: i32, %arg1: memref<1x32x256xf32, #tpu.memory_space<vmem>>, %arg2: memref<64x288xf32, #tpu.memory_space<vmem>>, %arg3: memref<64x1xf32, #tpu.memory_space<vmem>>, %arg4: memref<1x32x288xf32, #tpu.memory_space<vmem>>, %arg5: memref<1x32x1xf32, #tpu.memory_space<vmem>>, %arg6: memref<1x32x288xf32, #tpu.memory_space<vmem>>, %arg7: memref<1x32x1xf32, #tpu.memory_space<vmem>>, %arg8: memref<16x288xf32, #tpu.memory_space<vmem>>, %arg9: memref<16x1xf32, #tpu.memory_space<vmem>>, %arg10: memref<16x288xf32, #tpu.memory_space<vmem>>, %arg11: memref<16x1xf32, #tpu.memory_space<vmem>>, %arg12: memref<32x32xf32, #tpu.memory_space<vmem>>, %arg13: memref<1x32xf32, #tpu.memory_space<vmem>>, %arg14: memref<32x4xf32, #tpu.memory_space<vmem>>, %arg15: memref<1x4xf32, #tpu.memory_space<vmem>>, %arg16: memref<1x16x256xf32, #tpu.memory_space<vmem>>, %arg17: memref<1x16x256xf32, #tpu.memory_space<vmem>>, %arg18: memref<1x1x4xf32, #tpu.memory_space<vmem>>, %arg19: memref<32x512xf32, #tpu.memory_space<vmem>>, %arg20: memref<288x256xf32, #tpu.memory_space<vmem>>, %arg21: memref<32x256xf32, #tpu.memory_space<vmem>>) attributes {dimension_semantics = [#tpu.dimension_semantics<parallel>], iteration_bounds = array<i64: 2>, scalar_prefetch = 0 : i64, scratch_operands = 3 : i64, tpu.core_type = #tpu.core_type<tc>, window_params = [{transform_indices = @transform_0, window_bounds = array<i64: 1, 32, 256>}, {pipeline_mode = #tpu.pipeline_mode<synchronous>, transform_indices = @transform_1, window_bounds = array<i64: 64, 288>}, {pipeline_mode = #tpu.pipeline_mode<synchronous>, transform_indices = @transform_2, window_bounds = array<i64: 64, 1>}, {pipeline_mode = #tpu.pipeline_mode<synchronous>, transform_indices = @transform_3, window_bounds = array<i64: 1, 32, 288>}, {pipeline_mode = #tpu.pipeline_mode<synchronous>, transform_indices = @transform_4, window_bounds = array<i64: 1, 32, 1>}, {pipeline_mode = #tpu.pipeline_mode<synchronous>, transform_indices = @transform_5, window_bounds = array<i64: 1, 32, 288>}, {pipeline_mode = #tpu.pipeline_mode<synchronous>, transform_indices = @transform_6, window_bounds = array<i64: 1, 32, 1>}, {pipeline_mode = #tpu.pipeline_mode<synchronous>, transform_indices = @transform_7, window_bounds = array<i64: 16, 288>}, {pipeline_mode = #tpu.pipeline_mode<synchronous>, transform_indices = @transform_8, window_bounds = array<i64: 16, 1>}, {pipeline_mode = #tpu.pipeline_mode<synchronous>, transform_indices = @transform_9, window_bounds = array<i64: 16, 288>}, {pipeline_mode = #tpu.pipeline_mode<synchronous>, transform_indices = @transform_10, window_bounds = array<i64: 16, 1>}, {pipeline_mode = #tpu.pipeline_mode<synchronous>, transform_indices = @transform_11, window_bounds = array<i64: 32, 32>}, {pipeline_mode = #tpu.pipeline_mode<synchronous>, transform_indices = @transform_12, window_bounds = array<i64: 1, 32>}, {pipeline_mode = #tpu.pipeline_mode<synchronous>, transform_indices = @transform_13, window_bounds = array<i64: 32, 4>}, {pipeline_mode = #tpu.pipeline_mode<synchronous>, transform_indices = @transform_14, window_bounds = array<i64: 1, 4>}, {transform_indices = @transform_15, window_bounds = array<i64: 1, 16, 256>}, {transform_indices = @transform_16, window_bounds = array<i64: 1, 16, 256>}, {transform_indices = @transform_17, window_bounds = array<i64: 1, 1, 4>}]} {
    %c0 = arith.constant 0 : index
    %c0_0 = arith.constant 0 : index
    %c0_1 = arith.constant 0 : index
    %0 = vector.load %arg1[%c0, %c0_0, %c0_1] : memref<1x32x256xf32, #tpu.memory_space<vmem>>, vector<1x32x256xf32>
    %1 = vector.shape_cast %0 : vector<1x32x256xf32> to vector<32x256xf32>
    %2 = tpu.iota {dimensions = array<i32: 1>} : vector<1x256xi32>
    %c15_i32 = arith.constant 15 : i32
    %3 = vector.broadcast %c15_i32 : i32 to vector<1x256xi32>
    %4 = arith.andi %2, %3 : vector<1x256xi32>
    %c16_i32 = arith.constant 16 : i32
    %5 = vector.broadcast %c16_i32 : i32 to vector<1x256xi32>
    %6 = arith.cmpi sge, %2, %5 : vector<1x256xi32>
    %c1_i32 = arith.constant 1 : i32
    %7 = vector.broadcast %c1_i32 : i32 to vector<1x256xi32>
    %8 = arith.cmpi sge, %4, %7 : vector<1x256xi32>
    %9 = arith.andi %6, %8 : vector<1x256xi1>
    %c16_i32_2 = arith.constant 16 : i32
    %10 = vector.broadcast %c16_i32_2 : i32 to vector<1x256xi32>
    %11 = arith.cmpi sge, %2, %10 : vector<1x256xi32>
    %c16_i32_3 = arith.constant 16 : i32
    %12 = vector.broadcast %c16_i32_3 : i32 to vector<1x256xi32>
    %13 = arith.cmpi sge, %2, %12 : vector<1x256xi32>
    %c15_i32_4 = arith.constant 15 : i32
    %14 = vector.broadcast %c15_i32_4 : i32 to vector<1x256xi32>
    %15 = arith.cmpi slt, %4, %14 : vector<1x256xi32>
    %16 = arith.andi %13, %15 : vector<1x256xi1>
    %c1_i32_5 = arith.constant 1 : i32
    %17 = vector.broadcast %c1_i32_5 : i32 to vector<1x256xi32>
    %18 = arith.cmpi sge, %4, %17 : vector<1x256xi32>
    %c15_i32_6 = arith.constant 15 : i32
    %19 = vector.broadcast %c15_i32_6 : i32 to vector<1x256xi32>
    %20 = arith.cmpi slt, %4, %19 : vector<1x256xi32>
    %c240_i32 = arith.constant 240 : i32
    %21 = vector.broadcast %c240_i32 : i32 to vector<1x256xi32>
    %22 = arith.cmpi slt, %2, %21 : vector<1x256xi32>
    %c1_i32_7 = arith.constant 1 : i32
    %23 = vector.broadcast %c1_i32_7 : i32 to vector<1x256xi32>
    %24 = arith.cmpi sge, %4, %23 : vector<1x256xi32>
    %25 = arith.andi %22, %24 : vector<1x256xi1>
    %c240_i32_8 = arith.constant 240 : i32
    %26 = vector.broadcast %c240_i32_8 : i32 to vector<1x256xi32>
    %27 = arith.cmpi slt, %2, %26 : vector<1x256xi32>
    %c240_i32_9 = arith.constant 240 : i32
    %28 = vector.broadcast %c240_i32_9 : i32 to vector<1x256xi32>
    %29 = arith.cmpi slt, %2, %28 : vector<1x256xi32>
    %c15_i32_10 = arith.constant 15 : i32
    %30 = vector.broadcast %c15_i32_10 : i32 to vector<1x256xi32>
    %31 = arith.cmpi slt, %4, %30 : vector<1x256xi32>
    %32 = arith.andi %29, %31 : vector<1x256xi1>
    %cst = arith.constant 0.000000e+00 : f32
    %33 = vector.broadcast %cst : f32 to vector<32x128xf32>
    %c0_11 = arith.constant 0 : index
    %c0_12 = arith.constant 0 : index
    %34 = vector.load %arg19[%c0_11, %c0_12] : memref<32x512xf32, #tpu.memory_space<vmem>>, vector<32x128xf32>
    tpu.vector_store %arg19[%c0_11, %c0_12], %33 {strides = array<i32>} : memref<32x512xf32, #tpu.memory_space<vmem>>, vector<32x128xf32>,
    %cst_13 = arith.constant 0.000000e+00 : f32
    %35 = vector.broadcast %cst_13 : f32 to vector<32x128xf32>
    %c0_14 = arith.constant 0 : index
    %c384 = arith.constant 384 : index
    %36 = vector.load %arg19[%c0_14, %c384] : memref<32x512xf32, #tpu.memory_space<vmem>>, vector<32x128xf32>
    tpu.vector_store %arg19[%c0_14, %c384], %35 {strides = array<i32>} : memref<32x512xf32, #tpu.memory_space<vmem>>, vector<32x128xf32>,
    %c0_15 = arith.constant 0 : index
    %c128 = arith.constant 128 : index
    %37 = vector.load %arg19[%c0_15, %c128] : memref<32x512xf32, #tpu.memory_space<vmem>>, vector<32x256xf32>
    tpu.vector_store %arg19[%c0_15, %c128], %1 {strides = array<i32>} : memref<32x512xf32, #tpu.memory_space<vmem>>, vector<32x256xf32>,
    %c0_16 = arith.constant 0 : index
    %c111 = arith.constant 111 : index
    %38 = vector.load %arg19[%c0_16, %c111] : memref<32x512xf32, #tpu.memory_space<vmem>>, vector<32x256xf32>
    %cst_17 = arith.constant 0.000000e+00 : f32
    %39 = vector.shape_cast %9 : vector<1x256xi1> to vector<1x256xi1>
    %40 = vector.broadcast %39 : vector<1x256xi1> to vector<32x256xi1>
    %41 = vector.broadcast %cst_17 : f32 to vector<32x256xf32>
    %42 = arith.select %40, %38, %41 : vector<32x256xi1>, vector<32x256xf32>
    %c0_18 = arith.constant 0 : index
    %c0_19 = arith.constant 0 : index
    %43 = vector.load %arg20[%c0_18, %c0_19] : memref<288x256xf32, #tpu.memory_space<vmem>>, vector<32x256xf32>
    tpu.vector_store %arg20[%c0_18, %c0_19], %42 {strides = array<i32>} : memref<288x256xf32, #tpu.memory_space<vmem>>, vector<32x256xf32>,
    %c0_20 = arith.constant 0 : index
    %c112 = arith.constant 112 : index
    %44 = vector.load %arg19[%c0_20, %c112] : memref<32x512xf32, #tpu.memory_space<vmem>>, vector<32x256xf32>
    %cst_21 = arith.constant 0.000000e+00 : f32
    %45 = vector.shape_cast %11 : vector<1x256xi1> to vector<1x256xi1>
    %46 = vector.broadcast %45 : vector<1x256xi1> to vector<32x256xi1>
    %47 = vector.broadcast %cst_21 : f32 to vector<32x256xf32>
    %48 = arith.select %46, %44, %47 : vector<32x256xi1>, vector<32x256xf32>
    %c32 = arith.constant 32 : index
    %c0_22 = arith.constant 0 : index
    %49 = vector.load %arg20[%c32, %c0_22] : memref<288x256xf32, #tpu.memory_space<vmem>>, vector<32x256xf32>
    tpu.vector_store %arg20[%c32, %c0_22], %48 {strides = array<i32>} : memref<288x256xf32, #tpu.memory_space<vmem>>, vector<32x256xf32>,
    %c0_23 = arith.constant 0 : index
    %c113 = arith.constant 113 : index
    %50 = vector.load %arg19[%c0_23, %c113] : memref<32x512xf32, #tpu.memory_space<vmem>>, vector<32x256xf32>
    %cst_24 = arith.constant 0.000000e+00 : f32
    %51 = vector.shape_cast %16 : vector<1x256xi1> to vector<1x256xi1>
    %52 = vector.broadcast %51 : vector<1x256xi1> to vector<32x256xi1>
    %53 = vector.broadcast %cst_24 : f32 to vector<32x256xf32>
    %54 = arith.select %52, %50, %53 : vector<32x256xi1>, vector<32x256xf32>
    %c64 = arith.constant 64 : index
    %c0_25 = arith.constant 0 : index
    %55 = vector.load %arg20[%c64, %c0_25] : memref<288x256xf32, #tpu.memory_space<vmem>>, vector<32x256xf32>
    tpu.vector_store %arg20[%c64, %c0_25], %54 {strides = array<i32>} : memref<288x256xf32, #tpu.memory_space<vmem>>, vector<32x256xf32>,
    %c0_26 = arith.constant 0 : index
    %c127 = arith.constant 127 : index
    %56 = vector.load %arg19[%c0_26, %c127] : memref<32x512xf32, #tpu.memory_space<vmem>>, vector<32x256xf32>
    %cst_27 = arith.constant 0.000000e+00 : f32
    %57 = vector.shape_cast %18 : vector<1x256xi1> to vector<1x256xi1>
    %58 = vector.broadcast %57 : vector<1x256xi1> to vector<32x256xi1>
    %59 = vector.broadcast %cst_27 : f32 to vector<32x256xf32>
    %60 = arith.select %58, %56, %59 : vector<32x256xi1>, vector<32x256xf32>
    %c96 = arith.constant 96 : index
    %c0_28 = arith.constant 0 : index
    %61 = vector.load %arg20[%c96, %c0_28] : memref<288x256xf32, #tpu.memory_space<vmem>>, vector<32x256xf32>
    tpu.vector_store %arg20[%c96, %c0_28], %60 {strides = array<i32>} : memref<288x256xf32, #tpu.memory_space<vmem>>, vector<32x256xf32>,
    %c0_29 = arith.constant 0 : index
    %c128_30 = arith.constant 128 : index
    %62 = vector.load %arg19[%c0_29, %c128_30] : memref<32x512xf32, #tpu.memory_space<vmem>>, vector<32x256xf32>
    %c128_31 = arith.constant 128 : index
    %c0_32 = arith.constant 0 : index
    %63 = vector.load %arg20[%c128_31, %c0_32] : memref<288x256xf32, #tpu.memory_space<vmem>>, vector<32x256xf32>
    tpu.vector_store %arg20[%c128_31, %c0_32], %62 {strides = array<i32>} : memref<288x256xf32, #tpu.memory_space<vmem>>, vector<32x256xf32>,
    %c0_33 = arith.constant 0 : index
    %c129 = arith.constant 129 : index
    %64 = vector.load %arg19[%c0_33, %c129] : memref<32x512xf32, #tpu.memory_space<vmem>>, vector<32x256xf32>
    %cst_34 = arith.constant 0.000000e+00 : f32
    %65 = vector.shape_cast %20 : vector<1x256xi1> to vector<1x256xi1>
    %66 = vector.broadcast %65 : vector<1x256xi1> to vector<32x256xi1>
    %67 = vector.broadcast %cst_34 : f32 to vector<32x256xf32>
    %68 = arith.select %66, %64, %67 : vector<32x256xi1>, vector<32x256xf32>
    %c160 = arith.constant 160 : index
    %c0_35 = arith.constant 0 : index
    %69 = vector.load %arg20[%c160, %c0_35] : memref<288x256xf32, #tpu.memory_space<vmem>>, vector<32x256xf32>
    tpu.vector_store %arg20[%c160, %c0_35], %68 {strides = array<i32>} : memref<288x256xf32, #tpu.memory_space<vmem>>, vector<32x256xf32>,
    %c0_36 = arith.constant 0 : index
    %c143 = arith.constant 143 : index
    %70 = vector.load %arg19[%c0_36, %c143] : memref<32x512xf32, #tpu.memory_space<vmem>>, vector<32x256xf32>
    %cst_37 = arith.constant 0.000000e+00 : f32
    %71 = vector.shape_cast %25 : vector<1x256xi1> to vector<1x256xi1>
    %72 = vector.broadcast %71 : vector<1x256xi1> to vector<32x256xi1>
    %73 = vector.broadcast %cst_37 : f32 to vector<32x256xf32>
    %74 = arith.select %72, %70, %73 : vector<32x256xi1>, vector<32x256xf32>
    %c192 = arith.constant 192 : index
    %c0_38 = arith.constant 0 : index
    %75 = vector.load %arg20[%c192, %c0_38] : memref<288x256xf32, #tpu.memory_space<vmem>>, vector<32x256xf32>
    tpu.vector_store %arg20[%c192, %c0_38], %74 {strides = array<i32>} : memref<288x256xf32, #tpu.memory_space<vmem>>, vector<32x256xf32>,
    %c0_39 = arith.constant 0 : index
    %c144 = arith.constant 144 : index
    %76 = vector.load %arg19[%c0_39, %c144] : memref<32x512xf32, #tpu.memory_space<vmem>>, vector<32x256xf32>
    %cst_40 = arith.constant 0.000000e+00 : f32
    %77 = vector.shape_cast %27 : vector<1x256xi1> to vector<1x256xi1>
    %78 = vector.broadcast %77 : vector<1x256xi1> to vector<32x256xi1>
    %79 = vector.broadcast %cst_40 : f32 to vector<32x256xf32>
    %80 = arith.select %78, %76, %79 : vector<32x256xi1>, vector<32x256xf32>
    %c224 = arith.constant 224 : index
    %c0_41 = arith.constant 0 : index
    %81 = vector.load %arg20[%c224, %c0_41] : memref<288x256xf32, #tpu.memory_space<vmem>>, vector<32x256xf32>
    tpu.vector_store %arg20[%c224, %c0_41], %80 {strides = array<i32>} : memref<288x256xf32, #tpu.memory_space<vmem>>, vector<32x256xf32>,
    %c0_42 = arith.constant 0 : index
    %c145 = arith.constant 145 : index
    %82 = vector.load %arg19[%c0_42, %c145] : memref<32x512xf32, #tpu.memory_space<vmem>>, vector<32x256xf32>
    %cst_43 = arith.constant 0.000000e+00 : f32
    %83 = vector.shape_cast %32 : vector<1x256xi1> to vector<1x256xi1>
    %84 = vector.broadcast %83 : vector<1x256xi1> to vector<32x256xi1>
    %85 = vector.broadcast %cst_43 : f32 to vector<32x256xf32>
    %86 = arith.select %84, %82, %85 : vector<32x256xi1>, vector<32x256xf32>
    %c256 = arith.constant 256 : index
    %c0_44 = arith.constant 0 : index
    %87 = vector.load %arg20[%c256, %c0_44] : memref<288x256xf32, #tpu.memory_space<vmem>>, vector<32x256xf32>
    tpu.vector_store %arg20[%c256, %c0_44], %86 {strides = array<i32>} : memref<288x256xf32, #tpu.memory_space<vmem>>, vector<32x256xf32>,
    %c0_45 = arith.constant 0 : index
    %c0_46 = arith.constant 0 : index
    %88 = vector.load %arg20[%c0_45, %c0_46] : memref<288x256xf32, #tpu.memory_space<vmem>>, vector<288x256xf32>
    %c0_47 = arith.constant 0 : index
    %c0_48 = arith.constant 0 : index
    %89 = vector.load %arg2[%c0_47, %c0_48] : memref<64x288xf32, #tpu.memory_space<vmem>>, vector<64x288xf32>
    %c0_49 = arith.constant 0 : index
    %c0_50 = arith.constant 0 : index
    %90 = vector.load %arg3[%c0_49, %c0_50] : memref<64x1xf32, #tpu.memory_space<vmem>>, vector<64x1xf32>
    %cst_51 = arith.constant dense<0.000000e+00> : vector<64x256xf32>
    %91 = tpu.matmul %89, %88, %cst_51 {dimension_numbers = #tpu.dot_dimension_numbers<[1], [0], [0], [1], [0, 0, 1, 1], [], []>} : vector<64x288xf32>, vector<288x256xf32>, vector<64x256xf32> -> vector<64x256xf32>
    %92 = vector.broadcast %90 : vector<64x1xf32> to vector<64x256xf32>
    %93 = arith.addf %91, %92 : vector<64x256xf32>
    %cst_52 = arith.constant 0.000000e+00 : f32
    %94 = vector.broadcast %cst_52 : f32 to vector<64x256xf32>
    %95 = arith.maximumf %93, %94 : vector<64x256xf32>
    %96 = vector.extract_strided_slice %95 {offsets = [0, 0], sizes = [32, 256], strides = [1, 1]} : vector<64x256xf32> to vector<32x256xf32>
    %97 = vector.extract_strided_slice %95 {offsets = [32, 0], sizes = [32, 256], strides = [1, 1]} : vector<64x256xf32> to vector<32x256xf32>
    %c0_53 = arith.constant 0 : index
    %c0_54 = arith.constant 0 : index
    %98 = vector.load %arg21[%c0_53, %c0_54] : memref<32x256xf32, #tpu.memory_space<vmem>>, vector<32x256xf32>
    tpu.vector_store %arg21[%c0_53, %c0_54], %97 {strides = array<i32>} : memref<32x256xf32, #tpu.memory_space<vmem>>, vector<32x256xf32>,
    %c0_55 = arith.constant 0 : index
    %c0_56 = arith.constant 0 : index
    %c0_57 = arith.constant 0 : index
    %99 = vector.load %arg4[%c0_55, %c0_56, %c0_57] : memref<1x32x288xf32, #tpu.memory_space<vmem>>, vector<1x32x288xf32>
    %100 = vector.shape_cast %99 : vector<1x32x288xf32> to vector<32x288xf32>
    %c0_58 = arith.constant 0 : index
    %c0_59 = arith.constant 0 : index
    %c0_60 = arith.constant 0 : index
    %101 = vector.load %arg5[%c0_58, %c0_59, %c0_60] : memref<1x32x1xf32, #tpu.memory_space<vmem>>, vector<1x32x1xf32>
    %102 = vector.shape_cast %101 : vector<1x32x1xf32> to vector<32x1xf32>
    %c0_61 = arith.constant 0 : index
    %c128_62 = arith.constant 128 : index
    %103 = vector.load %arg19[%c0_61, %c128_62] : memref<32x512xf32, #tpu.memory_space<vmem>>, vector<32x256xf32>
    tpu.vector_store %arg19[%c0_61, %c128_62], %96 {strides = array<i32>} : memref<32x512xf32, #tpu.memory_space<vmem>>, vector<32x256xf32>,
    %c0_63 = arith.constant 0 : index
    %c111_64 = arith.constant 111 : index
    %104 = vector.load %arg19[%c0_63, %c111_64] : memref<32x512xf32, #tpu.memory_space<vmem>>, vector<32x256xf32>
    %cst_65 = arith.constant 0.000000e+00 : f32
    %105 = vector.shape_cast %9 : vector<1x256xi1> to vector<1x256xi1>
    %106 = vector.broadcast %105 : vector<1x256xi1> to vector<32x256xi1>
    %107 = vector.broadcast %cst_65 : f32 to vector<32x256xf32>
    %108 = arith.select %106, %104, %107 : vector<32x256xi1>, vector<32x256xf32>
    %c0_66 = arith.constant 0 : index
    %c0_67 = arith.constant 0 : index
    %109 = vector.load %arg20[%c0_66, %c0_67] : memref<288x256xf32, #tpu.memory_space<vmem>>, vector<32x256xf32>
    tpu.vector_store %arg20[%c0_66, %c0_67], %108 {strides = array<i32>} : memref<288x256xf32, #tpu.memory_space<vmem>>, vector<32x256xf32>,
    %c0_68 = arith.constant 0 : index
    %c112_69 = arith.constant 112 : index
    %110 = vector.load %arg19[%c0_68, %c112_69] : memref<32x512xf32, #tpu.memory_space<vmem>>, vector<32x256xf32>
    %cst_70 = arith.constant 0.000000e+00 : f32
    %111 = vector.shape_cast %11 : vector<1x256xi1> to vector<1x256xi1>
    %112 = vector.broadcast %111 : vector<1x256xi1> to vector<32x256xi1>
    %113 = vector.broadcast %cst_70 : f32 to vector<32x256xf32>
    %114 = arith.select %112, %110, %113 : vector<32x256xi1>, vector<32x256xf32>
    %c32_71 = arith.constant 32 : index
    %c0_72 = arith.constant 0 : index
    %115 = vector.load %arg20[%c32_71, %c0_72] : memref<288x256xf32, #tpu.memory_space<vmem>>, vector<32x256xf32>
    tpu.vector_store %arg20[%c32_71, %c0_72], %114 {strides = array<i32>} : memref<288x256xf32, #tpu.memory_space<vmem>>, vector<32x256xf32>,
    %c0_73 = arith.constant 0 : index
    %c113_74 = arith.constant 113 : index
    %116 = vector.load %arg19[%c0_73, %c113_74] : memref<32x512xf32, #tpu.memory_space<vmem>>, vector<32x256xf32>
    %cst_75 = arith.constant 0.000000e+00 : f32
    %117 = vector.shape_cast %16 : vector<1x256xi1> to vector<1x256xi1>
    %118 = vector.broadcast %117 : vector<1x256xi1> to vector<32x256xi1>
    %119 = vector.broadcast %cst_75 : f32 to vector<32x256xf32>
    %120 = arith.select %118, %116, %119 : vector<32x256xi1>, vector<32x256xf32>
    %c64_76 = arith.constant 64 : index
    %c0_77 = arith.constant 0 : index
    %121 = vector.load %arg20[%c64_76, %c0_77] : memref<288x256xf32, #tpu.memory_space<vmem>>, vector<32x256xf32>
    tpu.vector_store %arg20[%c64_76, %c0_77], %120 {strides = array<i32>} : memref<288x256xf32, #tpu.memory_space<vmem>>, vector<32x256xf32>,
    %c0_78 = arith.constant 0 : index
    %c127_79 = arith.constant 127 : index
    %122 = vector.load %arg19[%c0_78, %c127_79] : memref<32x512xf32, #tpu.memory_space<vmem>>, vector<32x256xf32>
    %cst_80 = arith.constant 0.000000e+00 : f32
    %123 = vector.shape_cast %18 : vector<1x256xi1> to vector<1x256xi1>
    %124 = vector.broadcast %123 : vector<1x256xi1> to vector<32x256xi1>
    %125 = vector.broadcast %cst_80 : f32 to vector<32x256xf32>
    %126 = arith.select %124, %122, %125 : vector<32x256xi1>, vector<32x256xf32>
    %c96_81 = arith.constant 96 : index
    %c0_82 = arith.constant 0 : index
    %127 = vector.load %arg20[%c96_81, %c0_82] : memref<288x256xf32, #tpu.memory_space<vmem>>, vector<32x256xf32>
    tpu.vector_store %arg20[%c96_81, %c0_82], %126 {strides = array<i32>} : memref<288x256xf32, #tpu.memory_space<vmem>>, vector<32x256xf32>,
    %c0_83 = arith.constant 0 : index
    %c128_84 = arith.constant 128 : index
    %128 = vector.load %arg19[%c0_83, %c128_84] : memref<32x512xf32, #tpu.memory_space<vmem>>, vector<32x256xf32>
    %c128_85 = arith.constant 128 : index
    %c0_86 = arith.constant 0 : index
    %129 = vector.load %arg20[%c128_85, %c0_86] : memref<288x256xf32, #tpu.memory_space<vmem>>, vector<32x256xf32>
    tpu.vector_store %arg20[%c128_85, %c0_86], %128 {strides = array<i32>} : memref<288x256xf32, #tpu.memory_space<vmem>>, vector<32x256xf32>,
    %c0_87 = arith.constant 0 : index
    %c129_88 = arith.constant 129 : index
    %130 = vector.load %arg19[%c0_87, %c129_88] : memref<32x512xf32, #tpu.memory_space<vmem>>, vector<32x256xf32>
    %cst_89 = arith.constant 0.000000e+00 : f32
    %131 = vector.shape_cast %20 : vector<1x256xi1> to vector<1x256xi1>
    %132 = vector.broadcast %131 : vector<1x256xi1> to vector<32x256xi1>
    %133 = vector.broadcast %cst_89 : f32 to vector<32x256xf32>
    %134 = arith.select %132, %130, %133 : vector<32x256xi1>, vector<32x256xf32>
    %c160_90 = arith.constant 160 : index
    %c0_91 = arith.constant 0 : index
    %135 = vector.load %arg20[%c160_90, %c0_91] : memref<288x256xf32, #tpu.memory_space<vmem>>, vector<32x256xf32>
    tpu.vector_store %arg20[%c160_90, %c0_91], %134 {strides = array<i32>} : memref<288x256xf32, #tpu.memory_space<vmem>>, vector<32x256xf32>,
    %c0_92 = arith.constant 0 : index
    %c143_93 = arith.constant 143 : index
    %136 = vector.load %arg19[%c0_92, %c143_93] : memref<32x512xf32, #tpu.memory_space<vmem>>, vector<32x256xf32>
    %cst_94 = arith.constant 0.000000e+00 : f32
    %137 = vector.shape_cast %25 : vector<1x256xi1> to vector<1x256xi1>
    %138 = vector.broadcast %137 : vector<1x256xi1> to vector<32x256xi1>
    %139 = vector.broadcast %cst_94 : f32 to vector<32x256xf32>
    %140 = arith.select %138, %136, %139 : vector<32x256xi1>, vector<32x256xf32>
    %c192_95 = arith.constant 192 : index
    %c0_96 = arith.constant 0 : index
    %141 = vector.load %arg20[%c192_95, %c0_96] : memref<288x256xf32, #tpu.memory_space<vmem>>, vector<32x256xf32>
    tpu.vector_store %arg20[%c192_95, %c0_96], %140 {strides = array<i32>} : memref<288x256xf32, #tpu.memory_space<vmem>>, vector<32x256xf32>,
    %c0_97 = arith.constant 0 : index
    %c144_98 = arith.constant 144 : index
    %142 = vector.load %arg19[%c0_97, %c144_98] : memref<32x512xf32, #tpu.memory_space<vmem>>, vector<32x256xf32>
    %cst_99 = arith.constant 0.000000e+00 : f32
    %143 = vector.shape_cast %27 : vector<1x256xi1> to vector<1x256xi1>
    %144 = vector.broadcast %143 : vector<1x256xi1> to vector<32x256xi1>
    %145 = vector.broadcast %cst_99 : f32 to vector<32x256xf32>
    %146 = arith.select %144, %142, %145 : vector<32x256xi1>, vector<32x256xf32>
    %c224_100 = arith.constant 224 : index
    %c0_101 = arith.constant 0 : index
    %147 = vector.load %arg20[%c224_100, %c0_101] : memref<288x256xf32, #tpu.memory_space<vmem>>, vector<32x256xf32>
    tpu.vector_store %arg20[%c224_100, %c0_101], %146 {strides = array<i32>} : memref<288x256xf32, #tpu.memory_space<vmem>>, vector<32x256xf32>,
    %c0_102 = arith.constant 0 : index
    %c145_103 = arith.constant 145 : index
    %148 = vector.load %arg19[%c0_102, %c145_103] : memref<32x512xf32, #tpu.memory_space<vmem>>, vector<32x256xf32>
    %cst_104 = arith.constant 0.000000e+00 : f32
    %149 = vector.shape_cast %32 : vector<1x256xi1> to vector<1x256xi1>
    %150 = vector.broadcast %149 : vector<1x256xi1> to vector<32x256xi1>
    %151 = vector.broadcast %cst_104 : f32 to vector<32x256xf32>
    %152 = arith.select %150, %148, %151 : vector<32x256xi1>, vector<32x256xf32>
    %c256_105 = arith.constant 256 : index
    %c0_106 = arith.constant 0 : index
    %153 = vector.load %arg20[%c256_105, %c0_106] : memref<288x256xf32, #tpu.memory_space<vmem>>, vector<32x256xf32>
    tpu.vector_store %arg20[%c256_105, %c0_106], %152 {strides = array<i32>} : memref<288x256xf32, #tpu.memory_space<vmem>>, vector<32x256xf32>,
    %c0_107 = arith.constant 0 : index
    %c0_108 = arith.constant 0 : index
    %154 = vector.load %arg20[%c0_107, %c0_108] : memref<288x256xf32, #tpu.memory_space<vmem>>, vector<288x256xf32>
    %cst_109 = arith.constant dense<0.000000e+00> : vector<32x256xf32>
    %155 = tpu.matmul %100, %154, %cst_109 {dimension_numbers = #tpu.dot_dimension_numbers<[1], [0], [0], [1], [0, 0, 1, 1], [], []>} : vector<32x288xf32>, vector<288x256xf32>, vector<32x256xf32> -> vector<32x256xf32>
    %156 = vector.broadcast %102 : vector<32x1xf32> to vector<32x256xf32>
    %157 = arith.addf %155, %156 : vector<32x256xf32>
    %cst_110 = arith.constant 0.000000e+00 : f32
    %158 = vector.broadcast %cst_110 : f32 to vector<32x256xf32>
    %159 = arith.maximumf %157, %158 : vector<32x256xf32>
    %c0_111 = arith.constant 0 : index
    %c128_112 = arith.constant 128 : index
    %160 = vector.load %arg19[%c0_111, %c128_112] : memref<32x512xf32, #tpu.memory_space<vmem>>, vector<32x256xf32>
    tpu.vector_store %arg19[%c0_111, %c128_112], %159 {strides = array<i32>} : memref<32x512xf32, #tpu.memory_space<vmem>>, vector<32x256xf32>,
    %c0_113 = arith.constant 0 : index
    %c111_114 = arith.constant 111 : index
    %161 = vector.load %arg19[%c0_113, %c111_114] : memref<32x512xf32, #tpu.memory_space<vmem>>, vector<32x256xf32>
    %cst_115 = arith.constant 0.000000e+00 : f32
    %162 = vector.shape_cast %9 : vector<1x256xi1> to vector<1x256xi1>
    %163 = vector.broadcast %162 : vector<1x256xi1> to vector<32x256xi1>
    %164 = vector.broadcast %cst_115 : f32 to vector<32x256xf32>
    %165 = arith.select %163, %161, %164 : vector<32x256xi1>, vector<32x256xf32>
    %c0_116 = arith.constant 0 : index
    %c0_117 = arith.constant 0 : index
    %166 = vector.load %arg20[%c0_116, %c0_117] : memref<288x256xf32, #tpu.memory_space<vmem>>, vector<32x256xf32>
    tpu.vector_store %arg20[%c0_116, %c0_117], %165 {strides = array<i32>} : memref<288x256xf32, #tpu.memory_space<vmem>>, vector<32x256xf32>,
    %c0_118 = arith.constant 0 : index
    %c112_119 = arith.constant 112 : index
    %167 = vector.load %arg19[%c0_118, %c112_119] : memref<32x512xf32, #tpu.memory_space<vmem>>, vector<32x256xf32>
    %cst_120 = arith.constant 0.000000e+00 : f32
    %168 = vector.shape_cast %11 : vector<1x256xi1> to vector<1x256xi1>
    %169 = vector.broadcast %168 : vector<1x256xi1> to vector<32x256xi1>
    %170 = vector.broadcast %cst_120 : f32 to vector<32x256xf32>
    %171 = arith.select %169, %167, %170 : vector<32x256xi1>, vector<32x256xf32>
    %c32_121 = arith.constant 32 : index
    %c0_122 = arith.constant 0 : index
    %172 = vector.load %arg20[%c32_121, %c0_122] : memref<288x256xf32, #tpu.memory_space<vmem>>, vector<32x256xf32>
    tpu.vector_store %arg20[%c32_121, %c0_122], %171 {strides = array<i32>} : memref<288x256xf32, #tpu.memory_space<vmem>>, vector<32x256xf32>,
    %c0_123 = arith.constant 0 : index
    %c113_124 = arith.constant 113 : index
    %173 = vector.load %arg19[%c0_123, %c113_124] : memref<32x512xf32, #tpu.memory_space<vmem>>, vector<32x256xf32>
    %cst_125 = arith.constant 0.000000e+00 : f32
    %174 = vector.shape_cast %16 : vector<1x256xi1> to vector<1x256xi1>
    %175 = vector.broadcast %174 : vector<1x256xi1> to vector<32x256xi1>
    %176 = vector.broadcast %cst_125 : f32 to vector<32x256xf32>
    %177 = arith.select %175, %173, %176 : vector<32x256xi1>, vector<32x256xf32>
    %c64_126 = arith.constant 64 : index
    %c0_127 = arith.constant 0 : index
    %178 = vector.load %arg20[%c64_126, %c0_127] : memref<288x256xf32, #tpu.memory_space<vmem>>, vector<32x256xf32>
    tpu.vector_store %arg20[%c64_126, %c0_127], %177 {strides = array<i32>} : memref<288x256xf32, #tpu.memory_space<vmem>>, vector<32x256xf32>,
    %c0_128 = arith.constant 0 : index
    %c127_129 = arith.constant 127 : index
    %179 = vector.load %arg19[%c0_128, %c127_129] : memref<32x512xf32, #tpu.memory_space<vmem>>, vector<32x256xf32>
    %cst_130 = arith.constant 0.000000e+00 : f32
    %180 = vector.shape_cast %18 : vector<1x256xi1> to vector<1x256xi1>
    %181 = vector.broadcast %180 : vector<1x256xi1> to vector<32x256xi1>
    %182 = vector.broadcast %cst_130 : f32 to vector<32x256xf32>
    %183 = arith.select %181, %179, %182 : vector<32x256xi1>, vector<32x256xf32>
    %c96_131 = arith.constant 96 : index
    %c0_132 = arith.constant 0 : index
    %184 = vector.load %arg20[%c96_131, %c0_132] : memref<288x256xf32, #tpu.memory_space<vmem>>, vector<32x256xf32>
    tpu.vector_store %arg20[%c96_131, %c0_132], %183 {strides = array<i32>} : memref<288x256xf32, #tpu.memory_space<vmem>>, vector<32x256xf32>,
    %c0_133 = arith.constant 0 : index
    %c128_134 = arith.constant 128 : index
    %185 = vector.load %arg19[%c0_133, %c128_134] : memref<32x512xf32, #tpu.memory_space<vmem>>, vector<32x256xf32>
    %c128_135 = arith.constant 128 : index
    %c0_136 = arith.constant 0 : index
    %186 = vector.load %arg20[%c128_135, %c0_136] : memref<288x256xf32, #tpu.memory_space<vmem>>, vector<32x256xf32>
    tpu.vector_store %arg20[%c128_135, %c0_136], %185 {strides = array<i32>} : memref<288x256xf32, #tpu.memory_space<vmem>>, vector<32x256xf32>,
    %c0_137 = arith.constant 0 : index
    %c129_138 = arith.constant 129 : index
    %187 = vector.load %arg19[%c0_137, %c129_138] : memref<32x512xf32, #tpu.memory_space<vmem>>, vector<32x256xf32>
    %cst_139 = arith.constant 0.000000e+00 : f32
    %188 = vector.shape_cast %20 : vector<1x256xi1> to vector<1x256xi1>
    %189 = vector.broadcast %188 : vector<1x256xi1> to vector<32x256xi1>
    %190 = vector.broadcast %cst_139 : f32 to vector<32x256xf32>
    %191 = arith.select %189, %187, %190 : vector<32x256xi1>, vector<32x256xf32>
    %c160_140 = arith.constant 160 : index
    %c0_141 = arith.constant 0 : index
    %192 = vector.load %arg20[%c160_140, %c0_141] : memref<288x256xf32, #tpu.memory_space<vmem>>, vector<32x256xf32>
    tpu.vector_store %arg20[%c160_140, %c0_141], %191 {strides = array<i32>} : memref<288x256xf32, #tpu.memory_space<vmem>>, vector<32x256xf32>,
    %c0_142 = arith.constant 0 : index
    %c143_143 = arith.constant 143 : index
    %193 = vector.load %arg19[%c0_142, %c143_143] : memref<32x512xf32, #tpu.memory_space<vmem>>, vector<32x256xf32>
    %cst_144 = arith.constant 0.000000e+00 : f32
    %194 = vector.shape_cast %25 : vector<1x256xi1> to vector<1x256xi1>
    %195 = vector.broadcast %194 : vector<1x256xi1> to vector<32x256xi1>
    %196 = vector.broadcast %cst_144 : f32 to vector<32x256xf32>
    %197 = arith.select %195, %193, %196 : vector<32x256xi1>, vector<32x256xf32>
    %c192_145 = arith.constant 192 : index
    %c0_146 = arith.constant 0 : index
    %198 = vector.load %arg20[%c192_145, %c0_146] : memref<288x256xf32, #tpu.memory_space<vmem>>, vector<32x256xf32>
    tpu.vector_store %arg20[%c192_145, %c0_146], %197 {strides = array<i32>} : memref<288x256xf32, #tpu.memory_space<vmem>>, vector<32x256xf32>,
    %c0_147 = arith.constant 0 : index
    %c144_148 = arith.constant 144 : index
    %199 = vector.load %arg19[%c0_147, %c144_148] : memref<32x512xf32, #tpu.memory_space<vmem>>, vector<32x256xf32>
    %cst_149 = arith.constant 0.000000e+00 : f32
    %200 = vector.shape_cast %27 : vector<1x256xi1> to vector<1x256xi1>
    %201 = vector.broadcast %200 : vector<1x256xi1> to vector<32x256xi1>
    %202 = vector.broadcast %cst_149 : f32 to vector<32x256xf32>
    %203 = arith.select %201, %199, %202 : vector<32x256xi1>, vector<32x256xf32>
    %c224_150 = arith.constant 224 : index
    %c0_151 = arith.constant 0 : index
    %204 = vector.load %arg20[%c224_150, %c0_151] : memref<288x256xf32, #tpu.memory_space<vmem>>, vector<32x256xf32>
    tpu.vector_store %arg20[%c224_150, %c0_151], %203 {strides = array<i32>} : memref<288x256xf32, #tpu.memory_space<vmem>>, vector<32x256xf32>,
    %c0_152 = arith.constant 0 : index
    %c145_153 = arith.constant 145 : index
    %205 = vector.load %arg19[%c0_152, %c145_153] : memref<32x512xf32, #tpu.memory_space<vmem>>, vector<32x256xf32>
    %cst_154 = arith.constant 0.000000e+00 : f32
    %206 = vector.shape_cast %32 : vector<1x256xi1> to vector<1x256xi1>
    %207 = vector.broadcast %206 : vector<1x256xi1> to vector<32x256xi1>
    %208 = vector.broadcast %cst_154 : f32 to vector<32x256xf32>
    %209 = arith.select %207, %205, %208 : vector<32x256xi1>, vector<32x256xf32>
    %c256_155 = arith.constant 256 : index
    %c0_156 = arith.constant 0 : index
    %210 = vector.load %arg20[%c256_155, %c0_156] : memref<288x256xf32, #tpu.memory_space<vmem>>, vector<32x256xf32>
    tpu.vector_store %arg20[%c256_155, %c0_156], %209 {strides = array<i32>} : memref<288x256xf32, #tpu.memory_space<vmem>>, vector<32x256xf32>,
    %c0_157 = arith.constant 0 : index
    %c0_158 = arith.constant 0 : index
    %211 = vector.load %arg20[%c0_157, %c0_158] : memref<288x256xf32, #tpu.memory_space<vmem>>, vector<288x256xf32>
    %c0_159 = arith.constant 0 : index
    %c0_160 = arith.constant 0 : index
    %212 = vector.load %arg8[%c0_159, %c0_160] : memref<16x288xf32, #tpu.memory_space<vmem>>, vector<16x288xf32>
    %cst_161 = arith.constant dense<0.000000e+00> : vector<16x256xf32>
    %213 = tpu.matmul %212, %211, %cst_161 {dimension_numbers = #tpu.dot_dimension_numbers<[1], [0], [0], [1], [0, 0, 1, 1], [], []>} : vector<16x288xf32>, vector<288x256xf32>, vector<16x256xf32> -> vector<16x256xf32>
    %c0_162 = arith.constant 0 : index
    %c0_163 = arith.constant 0 : index
    %214 = vector.load %arg9[%c0_162, %c0_163] : memref<16x1xf32, #tpu.memory_space<vmem>>, vector<16x1xf32>
    %215 = vector.broadcast %214 : vector<16x1xf32> to vector<16x256xf32>
    %216 = arith.addf %213, %215 : vector<16x256xf32>
    %c0_164 = arith.constant 0 : index
    %c0_165 = arith.constant 0 : index
    %c0_166 = arith.constant 0 : index
    %217 = vector.load %arg16[%c0_164, %c0_165, %c0_166] : memref<1x16x256xf32, #tpu.memory_space<vmem>>, vector<1x16x256xf32>
    %218 = vector.shape_cast %217 : vector<1x16x256xf32> to vector<16x256xf32>
    %219 = vector.shape_cast %216 : vector<16x256xf32> to vector<1x16x256xf32>
    tpu.vector_store %arg16[%c0_164, %c0_165, %c0_166], %219 {strides = array<i32>} : memref<1x16x256xf32, #tpu.memory_space<vmem>>, vector<1x16x256xf32>,
    %c0_167 = arith.constant 0 : index
    %c0_168 = arith.constant 0 : index
    %220 = vector.load %arg21[%c0_167, %c0_168] : memref<32x256xf32, #tpu.memory_space<vmem>>, vector<32x256xf32>
    %c0_169 = arith.constant 0 : index
    %c0_170 = arith.constant 0 : index
    %c0_171 = arith.constant 0 : index
    %221 = vector.load %arg6[%c0_169, %c0_170, %c0_171] : memref<1x32x288xf32, #tpu.memory_space<vmem>>, vector<1x32x288xf32>
    %222 = vector.shape_cast %221 : vector<1x32x288xf32> to vector<32x288xf32>
    %c0_172 = arith.constant 0 : index
    %c0_173 = arith.constant 0 : index
    %c0_174 = arith.constant 0 : index
    %223 = vector.load %arg7[%c0_172, %c0_173, %c0_174] : memref<1x32x1xf32, #tpu.memory_space<vmem>>, vector<1x32x1xf32>
    %224 = vector.shape_cast %223 : vector<1x32x1xf32> to vector<32x1xf32>
    %c0_175 = arith.constant 0 : index
    %c128_176 = arith.constant 128 : index
    %225 = vector.load %arg19[%c0_175, %c128_176] : memref<32x512xf32, #tpu.memory_space<vmem>>, vector<32x256xf32>
    tpu.vector_store %arg19[%c0_175, %c128_176], %220 {strides = array<i32>} : memref<32x512xf32, #tpu.memory_space<vmem>>, vector<32x256xf32>,
    %c0_177 = arith.constant 0 : index
    %c111_178 = arith.constant 111 : index
    %226 = vector.load %arg19[%c0_177, %c111_178] : memref<32x512xf32, #tpu.memory_space<vmem>>, vector<32x256xf32>
    %cst_179 = arith.constant 0.000000e+00 : f32
    %227 = vector.shape_cast %9 : vector<1x256xi1> to vector<1x256xi1>
    %228 = vector.broadcast %227 : vector<1x256xi1> to vector<32x256xi1>
    %229 = vector.broadcast %cst_179 : f32 to vector<32x256xf32>
    %230 = arith.select %228, %226, %229 : vector<32x256xi1>, vector<32x256xf32>
    %c0_180 = arith.constant 0 : index
    %c0_181 = arith.constant 0 : index
    %231 = vector.load %arg20[%c0_180, %c0_181] : memref<288x256xf32, #tpu.memory_space<vmem>>, vector<32x256xf32>
    tpu.vector_store %arg20[%c0_180, %c0_181], %230 {strides = array<i32>} : memref<288x256xf32, #tpu.memory_space<vmem>>, vector<32x256xf32>,
    %c0_182 = arith.constant 0 : index
    %c112_183 = arith.constant 112 : index
    %232 = vector.load %arg19[%c0_182, %c112_183] : memref<32x512xf32, #tpu.memory_space<vmem>>, vector<32x256xf32>
    %cst_184 = arith.constant 0.000000e+00 : f32
    %233 = vector.shape_cast %11 : vector<1x256xi1> to vector<1x256xi1>
    %234 = vector.broadcast %233 : vector<1x256xi1> to vector<32x256xi1>
    %235 = vector.broadcast %cst_184 : f32 to vector<32x256xf32>
    %236 = arith.select %234, %232, %235 : vector<32x256xi1>, vector<32x256xf32>
    %c32_185 = arith.constant 32 : index
    %c0_186 = arith.constant 0 : index
    %237 = vector.load %arg20[%c32_185, %c0_186] : memref<288x256xf32, #tpu.memory_space<vmem>>, vector<32x256xf32>
    tpu.vector_store %arg20[%c32_185, %c0_186], %236 {strides = array<i32>} : memref<288x256xf32, #tpu.memory_space<vmem>>, vector<32x256xf32>,
    %c0_187 = arith.constant 0 : index
    %c113_188 = arith.constant 113 : index
    %238 = vector.load %arg19[%c0_187, %c113_188] : memref<32x512xf32, #tpu.memory_space<vmem>>, vector<32x256xf32>
    %cst_189 = arith.constant 0.000000e+00 : f32
    %239 = vector.shape_cast %16 : vector<1x256xi1> to vector<1x256xi1>
    %240 = vector.broadcast %239 : vector<1x256xi1> to vector<32x256xi1>
    %241 = vector.broadcast %cst_189 : f32 to vector<32x256xf32>
    %242 = arith.select %240, %238, %241 : vector<32x256xi1>, vector<32x256xf32>
    %c64_190 = arith.constant 64 : index
    %c0_191 = arith.constant 0 : index
    %243 = vector.load %arg20[%c64_190, %c0_191] : memref<288x256xf32, #tpu.memory_space<vmem>>, vector<32x256xf32>
    tpu.vector_store %arg20[%c64_190, %c0_191], %242 {strides = array<i32>} : memref<288x256xf32, #tpu.memory_space<vmem>>, vector<32x256xf32>,
    %c0_192 = arith.constant 0 : index
    %c127_193 = arith.constant 127 : index
    %244 = vector.load %arg19[%c0_192, %c127_193] : memref<32x512xf32, #tpu.memory_space<vmem>>, vector<32x256xf32>
    %cst_194 = arith.constant 0.000000e+00 : f32
    %245 = vector.shape_cast %18 : vector<1x256xi1> to vector<1x256xi1>
    %246 = vector.broadcast %245 : vector<1x256xi1> to vector<32x256xi1>
    %247 = vector.broadcast %cst_194 : f32 to vector<32x256xf32>
    %248 = arith.select %246, %244, %247 : vector<32x256xi1>, vector<32x256xf32>
    %c96_195 = arith.constant 96 : index
    %c0_196 = arith.constant 0 : index
    %249 = vector.load %arg20[%c96_195, %c0_196] : memref<288x256xf32, #tpu.memory_space<vmem>>, vector<32x256xf32>
    tpu.vector_store %arg20[%c96_195, %c0_196], %248 {strides = array<i32>} : memref<288x256xf32, #tpu.memory_space<vmem>>, vector<32x256xf32>,
    %c0_197 = arith.constant 0 : index
    %c128_198 = arith.constant 128 : index
    %250 = vector.load %arg19[%c0_197, %c128_198] : memref<32x512xf32, #tpu.memory_space<vmem>>, vector<32x256xf32>
    %c128_199 = arith.constant 128 : index
    %c0_200 = arith.constant 0 : index
    %251 = vector.load %arg20[%c128_199, %c0_200] : memref<288x256xf32, #tpu.memory_space<vmem>>, vector<32x256xf32>
    tpu.vector_store %arg20[%c128_199, %c0_200], %250 {strides = array<i32>} : memref<288x256xf32, #tpu.memory_space<vmem>>, vector<32x256xf32>,
    %c0_201 = arith.constant 0 : index
    %c129_202 = arith.constant 129 : index
    %252 = vector.load %arg19[%c0_201, %c129_202] : memref<32x512xf32, #tpu.memory_space<vmem>>, vector<32x256xf32>
    %cst_203 = arith.constant 0.000000e+00 : f32
    %253 = vector.shape_cast %20 : vector<1x256xi1> to vector<1x256xi1>
    %254 = vector.broadcast %253 : vector<1x256xi1> to vector<32x256xi1>
    %255 = vector.broadcast %cst_203 : f32 to vector<32x256xf32>
    %256 = arith.select %254, %252, %255 : vector<32x256xi1>, vector<32x256xf32>
    %c160_204 = arith.constant 160 : index
    %c0_205 = arith.constant 0 : index
    %257 = vector.load %arg20[%c160_204, %c0_205] : memref<288x256xf32, #tpu.memory_space<vmem>>, vector<32x256xf32>
    tpu.vector_store %arg20[%c160_204, %c0_205], %256 {strides = array<i32>} : memref<288x256xf32, #tpu.memory_space<vmem>>, vector<32x256xf32>,
    %c0_206 = arith.constant 0 : index
    %c143_207 = arith.constant 143 : index
    %258 = vector.load %arg19[%c0_206, %c143_207] : memref<32x512xf32, #tpu.memory_space<vmem>>, vector<32x256xf32>
    %cst_208 = arith.constant 0.000000e+00 : f32
    %259 = vector.shape_cast %25 : vector<1x256xi1> to vector<1x256xi1>
    %260 = vector.broadcast %259 : vector<1x256xi1> to vector<32x256xi1>
    %261 = vector.broadcast %cst_208 : f32 to vector<32x256xf32>
    %262 = arith.select %260, %258, %261 : vector<32x256xi1>, vector<32x256xf32>
    %c192_209 = arith.constant 192 : index
    %c0_210 = arith.constant 0 : index
    %263 = vector.load %arg20[%c192_209, %c0_210] : memref<288x256xf32, #tpu.memory_space<vmem>>, vector<32x256xf32>
    tpu.vector_store %arg20[%c192_209, %c0_210], %262 {strides = array<i32>} : memref<288x256xf32, #tpu.memory_space<vmem>>, vector<32x256xf32>,
    %c0_211 = arith.constant 0 : index
    %c144_212 = arith.constant 144 : index
    %264 = vector.load %arg19[%c0_211, %c144_212] : memref<32x512xf32, #tpu.memory_space<vmem>>, vector<32x256xf32>
    %cst_213 = arith.constant 0.000000e+00 : f32
    %265 = vector.shape_cast %27 : vector<1x256xi1> to vector<1x256xi1>
    %266 = vector.broadcast %265 : vector<1x256xi1> to vector<32x256xi1>
    %267 = vector.broadcast %cst_213 : f32 to vector<32x256xf32>
    %268 = arith.select %266, %264, %267 : vector<32x256xi1>, vector<32x256xf32>
    %c224_214 = arith.constant 224 : index
    %c0_215 = arith.constant 0 : index
    %269 = vector.load %arg20[%c224_214, %c0_215] : memref<288x256xf32, #tpu.memory_space<vmem>>, vector<32x256xf32>
    tpu.vector_store %arg20[%c224_214, %c0_215], %268 {strides = array<i32>} : memref<288x256xf32, #tpu.memory_space<vmem>>, vector<32x256xf32>,
    %c0_216 = arith.constant 0 : index
    %c145_217 = arith.constant 145 : index
    %270 = vector.load %arg19[%c0_216, %c145_217] : memref<32x512xf32, #tpu.memory_space<vmem>>, vector<32x256xf32>
    %cst_218 = arith.constant 0.000000e+00 : f32
    %271 = vector.shape_cast %32 : vector<1x256xi1> to vector<1x256xi1>
    %272 = vector.broadcast %271 : vector<1x256xi1> to vector<32x256xi1>
    %273 = vector.broadcast %cst_218 : f32 to vector<32x256xf32>
    %274 = arith.select %272, %270, %273 : vector<32x256xi1>, vector<32x256xf32>
    %c256_219 = arith.constant 256 : index
    %c0_220 = arith.constant 0 : index
    %275 = vector.load %arg20[%c256_219, %c0_220] : memref<288x256xf32, #tpu.memory_space<vmem>>, vector<32x256xf32>
    tpu.vector_store %arg20[%c256_219, %c0_220], %274 {strides = array<i32>} : memref<288x256xf32, #tpu.memory_space<vmem>>, vector<32x256xf32>,
    %c0_221 = arith.constant 0 : index
    %c0_222 = arith.constant 0 : index
    %276 = vector.load %arg20[%c0_221, %c0_222] : memref<288x256xf32, #tpu.memory_space<vmem>>, vector<288x256xf32>
    %cst_223 = arith.constant dense<0.000000e+00> : vector<32x256xf32>
    %277 = tpu.matmul %222, %276, %cst_223 {dimension_numbers = #tpu.dot_dimension_numbers<[1], [0], [0], [1], [0, 0, 1, 1], [], []>} : vector<32x288xf32>, vector<288x256xf32>, vector<32x256xf32> -> vector<32x256xf32>
    %278 = vector.broadcast %224 : vector<32x1xf32> to vector<32x256xf32>
    %279 = arith.addf %277, %278 : vector<32x256xf32>
    %cst_224 = arith.constant 0.000000e+00 : f32
    %280 = vector.broadcast %cst_224 : f32 to vector<32x256xf32>
    %281 = arith.maximumf %279, %280 : vector<32x256xf32>
    %c0_225 = arith.constant 0 : index
    %c128_226 = arith.constant 128 : index
    %282 = vector.load %arg19[%c0_225, %c128_226] : memref<32x512xf32, #tpu.memory_space<vmem>>, vector<32x256xf32>
    tpu.vector_store %arg19[%c0_225, %c128_226], %281 {strides = array<i32>} : memref<32x512xf32, #tpu.memory_space<vmem>>, vector<32x256xf32>,
    %c0_227 = arith.constant 0 : index
    %c111_228 = arith.constant 111 : index
    %283 = vector.load %arg19[%c0_227, %c111_228] : memref<32x512xf32, #tpu.memory_space<vmem>>, vector<32x256xf32>
    %cst_229 = arith.constant 0.000000e+00 : f32
    %284 = vector.shape_cast %9 : vector<1x256xi1> to vector<1x256xi1>
    %285 = vector.broadcast %284 : vector<1x256xi1> to vector<32x256xi1>
    %286 = vector.broadcast %cst_229 : f32 to vector<32x256xf32>
    %287 = arith.select %285, %283, %286 : vector<32x256xi1>, vector<32x256xf32>
    %c0_230 = arith.constant 0 : index
    %c0_231 = arith.constant 0 : index
    %288 = vector.load %arg20[%c0_230, %c0_231] : memref<288x256xf32, #tpu.memory_space<vmem>>, vector<32x256xf32>
    tpu.vector_store %arg20[%c0_230, %c0_231], %287 {strides = array<i32>} : memref<288x256xf32, #tpu.memory_space<vmem>>, vector<32x256xf32>,
    %c0_232 = arith.constant 0 : index
    %c112_233 = arith.constant 112 : index
    %289 = vector.load %arg19[%c0_232, %c112_233] : memref<32x512xf32, #tpu.memory_space<vmem>>, vector<32x256xf32>
    %cst_234 = arith.constant 0.000000e+00 : f32
    %290 = vector.shape_cast %11 : vector<1x256xi1> to vector<1x256xi1>
    %291 = vector.broadcast %290 : vector<1x256xi1> to vector<32x256xi1>
    %292 = vector.broadcast %cst_234 : f32 to vector<32x256xf32>
    %293 = arith.select %291, %289, %292 : vector<32x256xi1>, vector<32x256xf32>
    %c32_235 = arith.constant 32 : index
    %c0_236 = arith.constant 0 : index
    %294 = vector.load %arg20[%c32_235, %c0_236] : memref<288x256xf32, #tpu.memory_space<vmem>>, vector<32x256xf32>
    tpu.vector_store %arg20[%c32_235, %c0_236], %293 {strides = array<i32>} : memref<288x256xf32, #tpu.memory_space<vmem>>, vector<32x256xf32>,
    %c0_237 = arith.constant 0 : index
    %c113_238 = arith.constant 113 : index
    %295 = vector.load %arg19[%c0_237, %c113_238] : memref<32x512xf32, #tpu.memory_space<vmem>>, vector<32x256xf32>
    %cst_239 = arith.constant 0.000000e+00 : f32
    %296 = vector.shape_cast %16 : vector<1x256xi1> to vector<1x256xi1>
    %297 = vector.broadcast %296 : vector<1x256xi1> to vector<32x256xi1>
    %298 = vector.broadcast %cst_239 : f32 to vector<32x256xf32>
    %299 = arith.select %297, %295, %298 : vector<32x256xi1>, vector<32x256xf32>
    %c64_240 = arith.constant 64 : index
    %c0_241 = arith.constant 0 : index
    %300 = vector.load %arg20[%c64_240, %c0_241] : memref<288x256xf32, #tpu.memory_space<vmem>>, vector<32x256xf32>
    tpu.vector_store %arg20[%c64_240, %c0_241], %299 {strides = array<i32>} : memref<288x256xf32, #tpu.memory_space<vmem>>, vector<32x256xf32>,
    %c0_242 = arith.constant 0 : index
    %c127_243 = arith.constant 127 : index
    %301 = vector.load %arg19[%c0_242, %c127_243] : memref<32x512xf32, #tpu.memory_space<vmem>>, vector<32x256xf32>
    %cst_244 = arith.constant 0.000000e+00 : f32
    %302 = vector.shape_cast %18 : vector<1x256xi1> to vector<1x256xi1>
    %303 = vector.broadcast %302 : vector<1x256xi1> to vector<32x256xi1>
    %304 = vector.broadcast %cst_244 : f32 to vector<32x256xf32>
    %305 = arith.select %303, %301, %304 : vector<32x256xi1>, vector<32x256xf32>
    %c96_245 = arith.constant 96 : index
    %c0_246 = arith.constant 0 : index
    %306 = vector.load %arg20[%c96_245, %c0_246] : memref<288x256xf32, #tpu.memory_space<vmem>>, vector<32x256xf32>
    tpu.vector_store %arg20[%c96_245, %c0_246], %305 {strides = array<i32>} : memref<288x256xf32, #tpu.memory_space<vmem>>, vector<32x256xf32>,
    %c0_247 = arith.constant 0 : index
    %c128_248 = arith.constant 128 : index
    %307 = vector.load %arg19[%c0_247, %c128_248] : memref<32x512xf32, #tpu.memory_space<vmem>>, vector<32x256xf32>
    %c128_249 = arith.constant 128 : index
    %c0_250 = arith.constant 0 : index
    %308 = vector.load %arg20[%c128_249, %c0_250] : memref<288x256xf32, #tpu.memory_space<vmem>>, vector<32x256xf32>
    tpu.vector_store %arg20[%c128_249, %c0_250], %307 {strides = array<i32>} : memref<288x256xf32, #tpu.memory_space<vmem>>, vector<32x256xf32>,
    %c0_251 = arith.constant 0 : index
    %c129_252 = arith.constant 129 : index
    %309 = vector.load %arg19[%c0_251, %c129_252] : memref<32x512xf32, #tpu.memory_space<vmem>>, vector<32x256xf32>
    %cst_253 = arith.constant 0.000000e+00 : f32
    %310 = vector.shape_cast %20 : vector<1x256xi1> to vector<1x256xi1>
    %311 = vector.broadcast %310 : vector<1x256xi1> to vector<32x256xi1>
    %312 = vector.broadcast %cst_253 : f32 to vector<32x256xf32>
    %313 = arith.select %311, %309, %312 : vector<32x256xi1>, vector<32x256xf32>
    %c160_254 = arith.constant 160 : index
    %c0_255 = arith.constant 0 : index
    %314 = vector.load %arg20[%c160_254, %c0_255] : memref<288x256xf32, #tpu.memory_space<vmem>>, vector<32x256xf32>
    tpu.vector_store %arg20[%c160_254, %c0_255], %313 {strides = array<i32>} : memref<288x256xf32, #tpu.memory_space<vmem>>, vector<32x256xf32>,
    %c0_256 = arith.constant 0 : index
    %c143_257 = arith.constant 143 : index
    %315 = vector.load %arg19[%c0_256, %c143_257] : memref<32x512xf32, #tpu.memory_space<vmem>>, vector<32x256xf32>
    %cst_258 = arith.constant 0.000000e+00 : f32
    %316 = vector.shape_cast %25 : vector<1x256xi1> to vector<1x256xi1>
    %317 = vector.broadcast %316 : vector<1x256xi1> to vector<32x256xi1>
    %318 = vector.broadcast %cst_258 : f32 to vector<32x256xf32>
    %319 = arith.select %317, %315, %318 : vector<32x256xi1>, vector<32x256xf32>
    %c192_259 = arith.constant 192 : index
    %c0_260 = arith.constant 0 : index
    %320 = vector.load %arg20[%c192_259, %c0_260] : memref<288x256xf32, #tpu.memory_space<vmem>>, vector<32x256xf32>
    tpu.vector_store %arg20[%c192_259, %c0_260], %319 {strides = array<i32>} : memref<288x256xf32, #tpu.memory_space<vmem>>, vector<32x256xf32>,
    %c0_261 = arith.constant 0 : index
    %c144_262 = arith.constant 144 : index
    %321 = vector.load %arg19[%c0_261, %c144_262] : memref<32x512xf32, #tpu.memory_space<vmem>>, vector<32x256xf32>
    %cst_263 = arith.constant 0.000000e+00 : f32
    %322 = vector.shape_cast %27 : vector<1x256xi1> to vector<1x256xi1>
    %323 = vector.broadcast %322 : vector<1x256xi1> to vector<32x256xi1>
    %324 = vector.broadcast %cst_263 : f32 to vector<32x256xf32>
    %325 = arith.select %323, %321, %324 : vector<32x256xi1>, vector<32x256xf32>
    %c224_264 = arith.constant 224 : index
    %c0_265 = arith.constant 0 : index
    %326 = vector.load %arg20[%c224_264, %c0_265] : memref<288x256xf32, #tpu.memory_space<vmem>>, vector<32x256xf32>
    tpu.vector_store %arg20[%c224_264, %c0_265], %325 {strides = array<i32>} : memref<288x256xf32, #tpu.memory_space<vmem>>, vector<32x256xf32>,
    %c0_266 = arith.constant 0 : index
    %c145_267 = arith.constant 145 : index
    %327 = vector.load %arg19[%c0_266, %c145_267] : memref<32x512xf32, #tpu.memory_space<vmem>>, vector<32x256xf32>
    %cst_268 = arith.constant 0.000000e+00 : f32
    %328 = vector.shape_cast %32 : vector<1x256xi1> to vector<1x256xi1>
    %329 = vector.broadcast %328 : vector<1x256xi1> to vector<32x256xi1>
    %330 = vector.broadcast %cst_268 : f32 to vector<32x256xf32>
    %331 = arith.select %329, %327, %330 : vector<32x256xi1>, vector<32x256xf32>
    %c256_269 = arith.constant 256 : index
    %c0_270 = arith.constant 0 : index
    %332 = vector.load %arg20[%c256_269, %c0_270] : memref<288x256xf32, #tpu.memory_space<vmem>>, vector<32x256xf32>
    tpu.vector_store %arg20[%c256_269, %c0_270], %331 {strides = array<i32>} : memref<288x256xf32, #tpu.memory_space<vmem>>, vector<32x256xf32>,
    %c0_271 = arith.constant 0 : index
    %c0_272 = arith.constant 0 : index
    %333 = vector.load %arg20[%c0_271, %c0_272] : memref<288x256xf32, #tpu.memory_space<vmem>>, vector<288x256xf32>
    %c0_273 = arith.constant 0 : index
    %c0_274 = arith.constant 0 : index
    %334 = vector.load %arg10[%c0_273, %c0_274] : memref<16x288xf32, #tpu.memory_space<vmem>>, vector<16x288xf32>
    %cst_275 = arith.constant dense<0.000000e+00> : vector<16x256xf32>
    %335 = tpu.matmul %334, %333, %cst_275 {dimension_numbers = #tpu.dot_dimension_numbers<[1], [0], [0], [1], [0, 0, 1, 1], [], []>} : vector<16x288xf32>, vector<288x256xf32>, vector<16x256xf32> -> vector<16x256xf32>
    %c0_276 = arith.constant 0 : index
    %c0_277 = arith.constant 0 : index
    %336 = vector.load %arg11[%c0_276, %c0_277] : memref<16x1xf32, #tpu.memory_space<vmem>>, vector<16x1xf32>
    %337 = vector.broadcast %336 : vector<16x1xf32> to vector<16x256xf32>
    %338 = arith.addf %335, %337 : vector<16x256xf32>
    %c0_278 = arith.constant 0 : index
    %c0_279 = arith.constant 0 : index
    %c0_280 = arith.constant 0 : index
    %339 = vector.load %arg17[%c0_278, %c0_279, %c0_280] : memref<1x16x256xf32, #tpu.memory_space<vmem>>, vector<1x16x256xf32>
    %340 = vector.shape_cast %339 : vector<1x16x256xf32> to vector<16x256xf32>
    %341 = vector.shape_cast %338 : vector<16x256xf32> to vector<1x16x256xf32>
    tpu.vector_store %arg17[%c0_278, %c0_279, %c0_280], %341 {strides = array<i32>} : memref<1x16x256xf32, #tpu.memory_space<vmem>>, vector<1x16x256xf32>,
    %cst_281 = arith.constant dense<0.000000e+00> : vector<32xf32>
    %342 = vector.multi_reduction <add>, %1, %cst_281 [1] : vector<32x256xf32> to vector<32xf32>
    %343 = vector.shape_cast %342 : vector<32xf32> to vector<32x1xf32>
    %cst_282 = arith.constant 2.560000e+02 : f32
    %344 = vector.broadcast %cst_282 : f32 to vector<32x1xf32>
    %345 = arith.divf %343, %344 : vector<32x1xf32>
    %346 = vector.shape_cast %345 : vector<32x1xf32> to vector<1x32xf32>
    %c0_283 = arith.constant 0 : index
    %c0_284 = arith.constant 0 : index
    %347 = vector.load %arg12[%c0_283, %c0_284] : memref<32x32xf32, #tpu.memory_space<vmem>>, vector<32x32xf32>
    %cst_285 = arith.constant dense<0.000000e+00> : vector<1x32xf32>
    %348 = tpu.matmul %346, %347, %cst_285 {dimension_numbers = #tpu.dot_dimension_numbers<[1], [0], [0], [1], [0, 0, 1, 1], [], []>} : vector<1x32xf32>, vector<32x32xf32>, vector<1x32xf32> -> vector<1x32xf32>
    %c0_286 = arith.constant 0 : index
    %c0_287 = arith.constant 0 : index
    %349 = vector.load %arg13[%c0_286, %c0_287] : memref<1x32xf32, #tpu.memory_space<vmem>>, vector<1x32xf32>
    %350 = arith.addf %348, %349 : vector<1x32xf32>
    %cst_288 = arith.constant 0.000000e+00 : f32
    %351 = vector.broadcast %cst_288 : f32 to vector<1x32xf32>
    %352 = arith.maximumf %350, %351 : vector<1x32xf32>
    %c0_289 = arith.constant 0 : index
    %c0_290 = arith.constant 0 : index
    %353 = vector.load %arg14[%c0_289, %c0_290] : memref<32x4xf32, #tpu.memory_space<vmem>>, vector<32x4xf32>
    %cst_291 = arith.constant dense<0.000000e+00> : vector<1x4xf32>
    %354 = tpu.matmul %352, %353, %cst_291 {dimension_numbers = #tpu.dot_dimension_numbers<[1], [0], [0], [1], [0, 0, 1, 1], [], []>} : vector<1x32xf32>, vector<32x4xf32>, vector<1x4xf32> -> vector<1x4xf32>
    %c0_292 = arith.constant 0 : index
    %c0_293 = arith.constant 0 : index
    %355 = vector.load %arg15[%c0_292, %c0_293] : memref<1x4xf32, #tpu.memory_space<vmem>>, vector<1x4xf32>
    %356 = arith.addf %354, %355 : vector<1x4xf32>
    %c0_294 = arith.constant 0 : index
    %c0_295 = arith.constant 0 : index
    %c0_296 = arith.constant 0 : index
    %357 = vector.load %arg18[%c0_294, %c0_295, %c0_296] : memref<1x1x4xf32, #tpu.memory_space<vmem>>, vector<1x1x4xf32>
    %358 = vector.shape_cast %357 : vector<1x1x4xf32> to vector<1x4xf32>
    %359 = vector.shape_cast %356 : vector<1x4xf32> to vector<1x1x4xf32>
    tpu.vector_store %arg18[%c0_294, %c0_295, %c0_296], %359 {strides = array<i32>} : memref<1x1x4xf32, #tpu.memory_space<vmem>>, vector<1x1x4xf32>,
    return
  }
  func.func @transform_0(%arg0: i32) -> (i32, i32, i32) {
    %c0_i32 = arith.constant 0 : i32
    %c0_i32_0 = arith.constant 0 : i32
    %c0_i32_1 = arith.constant 0 : i32
    return %arg0, %c0_i32, %c0_i32_0 : i32, i32, i32
  }
  func.func @transform_1(%arg0: i32) -> (i32, i32) {
    %c0_i32 = arith.constant 0 : i32
    %c0_i32_0 = arith.constant 0 : i32
    %c0_i32_1 = arith.constant 0 : i32
    return %c0_i32, %c0_i32_0 : i32, i32
  }
  func.func @transform_2(%arg0: i32) -> (i32, i32) {
    %c0_i32 = arith.constant 0 : i32
    %c0_i32_0 = arith.constant 0 : i32
    %c0_i32_1 = arith.constant 0 : i32
    return %c0_i32, %c0_i32_0 : i32, i32
  }
  func.func @transform_3(%arg0: i32) -> (i32, i32, i32) {
    %c0_i32 = arith.constant 0 : i32
    %c0_i32_0 = arith.constant 0 : i32
    %c0_i32_1 = arith.constant 0 : i32
    %c0_i32_2 = arith.constant 0 : i32
    return %c0_i32, %c0_i32_0, %c0_i32_1 : i32, i32, i32
  }
  func.func @transform_4(%arg0: i32) -> (i32, i32, i32) {
    %c0_i32 = arith.constant 0 : i32
    %c0_i32_0 = arith.constant 0 : i32
    %c0_i32_1 = arith.constant 0 : i32
    %c0_i32_2 = arith.constant 0 : i32
    return %c0_i32, %c0_i32_0, %c0_i32_1 : i32, i32, i32
  }
  func.func @transform_5(%arg0: i32) -> (i32, i32, i32) {
    %c0_i32 = arith.constant 0 : i32
    %c0_i32_0 = arith.constant 0 : i32
    %c0_i32_1 = arith.constant 0 : i32
    %c0_i32_2 = arith.constant 0 : i32
    return %c0_i32, %c0_i32_0, %c0_i32_1 : i32, i32, i32
  }
  func.func @transform_6(%arg0: i32) -> (i32, i32, i32) {
    %c0_i32 = arith.constant 0 : i32
    %c0_i32_0 = arith.constant 0 : i32
    %c0_i32_1 = arith.constant 0 : i32
    %c0_i32_2 = arith.constant 0 : i32
    return %c0_i32, %c0_i32_0, %c0_i32_1 : i32, i32, i32
  }
  func.func @transform_7(%arg0: i32) -> (i32, i32) {
    %c0_i32 = arith.constant 0 : i32
    %c0_i32_0 = arith.constant 0 : i32
    %c0_i32_1 = arith.constant 0 : i32
    return %c0_i32, %c0_i32_0 : i32, i32
  }
  func.func @transform_8(%arg0: i32) -> (i32, i32) {
    %c0_i32 = arith.constant 0 : i32
    %c0_i32_0 = arith.constant 0 : i32
    %c0_i32_1 = arith.constant 0 : i32
    return %c0_i32, %c0_i32_0 : i32, i32
  }
  func.func @transform_9(%arg0: i32) -> (i32, i32) {
    %c0_i32 = arith.constant 0 : i32
    %c0_i32_0 = arith.constant 0 : i32
    %c0_i32_1 = arith.constant 0 : i32
    return %c0_i32, %c0_i32_0 : i32, i32
  }
  func.func @transform_10(%arg0: i32) -> (i32, i32) {
    %c0_i32 = arith.constant 0 : i32
    %c0_i32_0 = arith.constant 0 : i32
    %c0_i32_1 = arith.constant 0 : i32
    return %c0_i32, %c0_i32_0 : i32, i32
  }
  func.func @transform_11(%arg0: i32) -> (i32, i32) {
    %c0_i32 = arith.constant 0 : i32
    %c0_i32_0 = arith.constant 0 : i32
    %c0_i32_1 = arith.constant 0 : i32
    return %c0_i32, %c0_i32_0 : i32, i32
  }
  func.func @transform_12(%arg0: i32) -> (i32, i32) {
    %c0_i32 = arith.constant 0 : i32
    %c0_i32_0 = arith.constant 0 : i32
    %c0_i32_1 = arith.constant 0 : i32
    return %c0_i32, %c0_i32_0 : i32, i32
  }
  func.func @transform_13(%arg0: i32) -> (i32, i32) {
    %c0_i32 = arith.constant 0 : i32
    %c0_i32_0 = arith.constant 0 : i32
    %c0_i32_1 = arith.constant 0 : i32
    return %c0_i32, %c0_i32_0 : i32, i32
  }
  func.func @transform_14(%arg0: i32) -> (i32, i32) {
    %c0_i32 = arith.constant 0 : i32
    %c0_i32_0 = arith.constant 0 : i32
    %c0_i32_1 = arith.constant 0 : i32
    return %c0_i32, %c0_i32_0 : i32, i32
  }
  func.func @transform_15(%arg0: i32) -> (i32, i32, i32) {
    %c0_i32 = arith.constant 0 : i32
    %c0_i32_0 = arith.constant 0 : i32
    %c0_i32_1 = arith.constant 0 : i32
    return %arg0, %c0_i32, %c0_i32_0 : i32, i32, i32
  }
  func.func @transform_16(%arg0: i32) -> (i32, i32, i32) {
    %c0_i32 = arith.constant 0 : i32
    %c0_i32_0 = arith.constant 0 : i32
    %c0_i32_1 = arith.constant 0 : i32
    return %arg0, %c0_i32, %c0_i32_0 : i32, i32, i32
  }
  func.func @transform_17(%arg0: i32) -> (i32, i32, i32) {
    %c0_i32 = arith.constant 0 : i32
    %c0_i32_0 = arith.constant 0 : i32
    %c0_i32_1 = arith.constant 0 : i32
    return %arg0, %c0_i32, %c0_i32_0 : i32, i32, i32
  }
}

</mosaic_0001>

<bundles_post_ra>
// kernel: tpu_custom_call.1
= control target key start
LH: loop header
LB: loop body
LE: loop exit
PB: predicated region body
PF: predicated region fallthrough
CT: control target
= control target key end

     0   :  { %s10952_s0 = inlined_call_operand.hbm [shape: f32[2,32,256], index: 0, kind: input, shape index: {}]   ;;  %s10953_s1 = inlined_call_operand.vmem [shape: f32[64,288], index: 1, kind: input, shape index: {}]   ;;  %s10954_s2 = inlined_call_operand.vmem [shape: f32[64,1], index: 2, kind: input, shape index: {}]   ;;  %s10955_s3 = inlined_call_operand.hbm [shape: f32[1,32,288], index: 3, kind: input, shape index: {}]   ;;  %s10956_s4 = inlined_call_operand.vmem [shape: f32[1,32,1], index: 4, kind: input, shape index: {}]   ;;  %s10957_s5 = inlined_call_operand.hbm [shape: f32[1,32,288], index: 5, kind: input, shape index: {}]   ;;  %s10958_s6 = inlined_call_operand.vmem [shape: f32[1,32,1], index: 6, kind: input, shape index: {}]   ;;  %s10959_s7 = inlined_call_operand.hbm [shape: f32[16,288], index: 7, kind: input, shape index: {}]   ;;  %s10960_s8 = inlined_call_operand.vmem [shape: f32[16,1], index: 8, kind: input, shape index: {}]   ;;  %s10961_s9 = inlined_call_operand.hbm [shape: f32[16,288], index: 9, kind: input, shape index: {}]   ;;  %s10962_s10 = inlined_call_operand.vmem [shape: f32[16,1], index: 10, kind: input, shape index: {}]   ;;  %s10963_s11 = inlined_call_operand.vmem [shape: f32[32,32], index: 11, kind: input, shape index: {}]   ;;  %s10964_s12 = inlined_call_operand.vmem [shape: f32[1,32], index: 12, kind: input, shape index: {}]   ;;  %s10965_s13 = inlined_call_operand.vmem [shape: f32[32,4], index: 13, kind: input, shape index: {}]   ;;  %s10966_s14 = inlined_call_operand.vmem [shape: f32[1,4], index: 14, kind: input, shape index: {}]   ;;  %s10967_s15 = inlined_call_operand.hbm [shape: f32[2,16,256], index: 15, kind: output, shape index: {0}]   ;;  %s10968_s16 = inlined_call_operand.hbm [shape: f32[2,16,256], index: 16, kind: output, shape index: {1}]   ;;  %s10969_s17 = inlined_call_operand.hbm [shape: f32[2,1,4], index: 17, kind: output, shape index: {2}]  }
   0x1   :  { %11019 = sst [smem:[#allocation26_spill]] %s10952_s0 }
   0x2   :  { %11020 = sst [smem:[#allocation27_spill]] %s10953_s1 }
   0x3   :  { %11021 = sst [smem:[#allocation28_spill]] %s10954_s2 }
   0x4   :  { %11022 = sst [smem:[#allocation29_spill]] %s10955_s3 }
   0x5   :  { %11023 = sst [smem:[#allocation30_spill]] %s10956_s4 }
   0x6   :  { %11024 = sst [smem:[#allocation31_spill]] %s10957_s5 }
   0x7   :  { %11025 = sst [smem:[#allocation32_spill]] %s10958_s6 }
   0x8   :  { %11026 = sst [smem:[#allocation33_spill]] %s10960_s8 }
   0x9   :  { %11027 = sst [smem:[#allocation34_spill]] %s10962_s10 }
   0xa   :  { %11028 = sst [smem:[#allocation35_spill]] %s10964_s12 }
   0xb   :  { %11029 = sst [smem:[#allocation36_spill]] %s10966_s14 }
   0xc   :  { %11030 = sst [smem:[#allocation37_spill]] %s10967_s15 }
   0xd   :  { %11031 = sst [smem:[#allocation38_spill]] %s10968_s16 }
   0xe   :  { %11032 = sst [smem:[#allocation39_spill]] %s10969_s17 }
   0xf   :  { %23 = vsyncpa [#allocation6], 0 }
  0x10   :  { %25 = vsyncpa [#allocation6 + $0x1], 0 }
  0x11   :  { %26 = vsyncpa [#allocation9], 0 }
  0x12   :  { %27 = vsyncpa [#allocation12], 0 }
  0x13   :  { %28 = vsyncpa [#allocation7], 0 }
  0x14   :  { %30 = vsyncpa [#allocation7 + $0x1], 0 }
  0x15   :  { %31 = vsyncpa [#allocation16], 0 }
  0x16   :  { %33 = vsyncpa [#allocation16 + $0x1], 0  ;;  %s8683_s24 = smov 0   ;;  %s8685_s25 = smov 0  }
  0x17   :  { %s8687_s26 = smov 0   ;;  %s8689_s27 = smov 0  }
  0x18 LB: > { %11033 = sst [smem:[#allocation23_spill]] %s8554_s24  ;;  %s8704_s28 = sadd.s32 4294967295, %s8566_s27   ;;  %s8566_s27 = sphi %s8689_s27, %s11347_s27   ;;  %s8562_s26 = sphi %s8687_s26, %s11346_s26   ;;  %s8558_s25 = sphi %s8685_s25, %s11345_s25   ;;  %s8554_s24 = sphi %s8683_s24, %s11344_s24  }
  0x19   : > { %s10972_s29 = sadd.s32 4294967294, %s8566_s27   ;;  %p59_p0 = scmp.ne.s32.totalorder %s8558_s25, %s8554_s24 }
  0x1a   : > { %p10977_p1 = scmp.eq.s32.totalorder %s8704_s28, 0  ;;  %p383_p3 = scmp.eq.s32.totalorder %s10972_s29, 1 }
  0x1b   : > { %p6011_p5 = scmp.ge.s32.totalorder %s8566_s27, 1  ;;  %p442_p7 = scmp.lt.s32.totalorder %s8566_s27, 3 }
  0x1c   : > { %p8715_p4 = por %p10977_p1, %p59_p0  ;;  %p8720_p6 = por %p383_p3, %p59_p0 }
  0x1d   : > { %p8725_p8 = pnand %p6011_p5, %p442_p7  ;;  %s8568_s19 = smov [#allocation8]  }
  0x1e   : > { %s11034_s0 = scalar_select %p8715_p4, 1, 0 }
  0x1f   : > { %s11035_s30 = scalar_select %p8720_p6, 1, 0 }
  0x20   : > { %s11037_s18 = scalar_select %p8725_p8, 1, 0 }
  0x21   : > { %11036 = sst [smem:[#allocation24_spill]] %s11035_s30  ;;  %s460_s1 = sshll.u32 %s8568_s19, 4  ;;  %s8729_s1 = int_to_ptr.vmem [resolvable:$true] %s460_s1 }
  0x22   : > { %p6990_p9 = pneg %p8725_p8  ;;  %s8569_s21 = smov [#allocation11]  }
  0x23   : > { %s492_s22 = sshll.u32 %s8569_s21, 4  ;;  %s8570_s23 = smov [#allocation10]   ;;  %s8740_s22 = int_to_ptr.vmem [resolvable:$true] %s492_s22 }
  0x24   : > { %p8736_p11 = pnand %p6990_p9, %p10977_p1  ;;  %s8742_s29 = sshll.u32 %s8570_s23, 4  ;;  %s477_s29 = int_to_ptr.vmem [resolvable:$true] %s8742_s29 }
  0x25   : > { %s11039_s3 = sld [smem:[#allocation29_spill]] }
  0x26   : > { %p8752_p13 = pneg %p8736_p11 }
  0x2b   : > { %s8290_s24 = scalar_lea.hbm %s11039_s3, 1536 }
  0x2c   : > { %p8291_p12 = scmp.ne.s32.totalorder %s11039_s3, %s8290_s24  ;;  %p8297_p5 = scmp.lt.u32.totalorder %s8290_s24, %s11039_s3 }
  0x2e   : > { %p8293_p0 = pnand %p8752_p13, %p8291_p12 }
  0x30   : > { %p8294_p3 = pneg %p8293_p0 }
  0x32   : > { %p8299_p7 = pnand %p8297_p5, %p8294_p3 }
  0x34   : > { %8302 = shalt.err (!%p8299_p7)
}
  0x35   : > { %s8303_s16 = scalar_lea.vmem %s8729_s1, 1536  ;;  %p8311_p2 = scmp.lt.s32.totalorder %s8729_s1, %s8729_s1 }
  0x36   : > { %p8304_p9 = scmp.ne.s32.totalorder %s8729_s1, %s8303_s16  ;;  %p8312_p6 = scmp.lt.s32.totalorder %s8303_s16, %s8303_s16 }
  0x38   : > { %p8306_p10 = pnand %p8304_p9, %p8752_p13  ;;  %p8313_p12 = por %p8312_p6, %p8311_p2 }
  0x3a   : > { %p8307_p1 = pneg %p8306_p10 }
  0x3c   : > { %p8314_p0 = pnand %p8313_p12, %p8307_p1 }
  0x3e   : > { %8317 = shalt.err (!%p8314_p0)
}
  0x3f   : > { %s8571_s17 = smov 384   ;;  %s8572_s24 = smov 24  }
  0x40   : > { %6993 = dma.hbm_to_vmem [thread:$0]  (!%p8736_p11), %s11039_s3, 1536, %s8729_s1, [#allocation9], %s8571_s17, %s8571_s17, %s8572_s24  }
  0x41   : > { %s8318_s16 = scalar_lea.hbm %s10959_s7, 768 }
  0x42   : > { %p8319_p1 = scmp.ne.s32.totalorder %s10959_s7, %s8318_s16  ;;  %p8325_p10 = scmp.lt.u32.totalorder %s8318_s16, %s10959_s7 }
  0x44   : > { %p8321_p2 = pnand %p8319_p1, %p8752_p13 }
  0x46   : > { %p8322_p6 = pneg %p8321_p2 }
  0x48   : > { %p8327_p3 = pnand %p8325_p10, %p8322_p6 }
  0x4a   : > { %8330 = shalt.err (!%p8327_p3)
}
  0x4b   : > { %s8331_s1 = scalar_lea.vmem %s8740_s22, 768  ;;  %p8339_p12 = scmp.lt.s32.totalorder %s8740_s22, %s8740_s22 }
  0x4c   : > { %p8332_p5 = scmp.ne.s32.totalorder %s8740_s22, %s8331_s1  ;;  %p8340_p0 = scmp.lt.s32.totalorder %s8331_s1, %s8331_s1 }
  0x4e   : > { %p8334_p7 = pnand %p8332_p5, %p8752_p13  ;;  %p8341_p1 = por %p8340_p0, %p8339_p12 }
  0x50   : > { %p8335_p9 = pneg %p8334_p7 }
  0x52   : > { %p8342_p2 = pnand %p8341_p1, %p8335_p9 }
  0x54   : > { %8345 = shalt.err (!%p8342_p2)
}
  0x55   : > { %6999 = dma.hbm_to_vmem [thread:$0]  (!%p8736_p11), %s10959_s7, 768, %s8740_s22, [#allocation12], %s8571_s17, %s8571_s17, %s8572_s24  }
  0x56   : > { %s11041_s5 = sld [smem:[#allocation31_spill]] }
  0x5c   : > { %s8346_s30 = scalar_lea.hbm %s11041_s5, 1536 }
  0x5d   : > { %p8347_p6 = scmp.ne.s32.totalorder %s11041_s5, %s8346_s30  ;;  %p8353_p5 = scmp.lt.u32.totalorder %s8346_s30, %s11041_s5 }
  0x5f   : > { %p8349_p10 = pnand %p8347_p6, %p8752_p13 }
  0x61   : > { %p8350_p3 = pneg %p8349_p10 }
  0x63   : > { %p8355_p7 = pnand %p8353_p5, %p8350_p3 }
  0x65   : > { %8358 = shalt.err (!%p8355_p7)
}
  0x66   : > { %s8359_s1 = scalar_lea.vmem %s477_s29, 1536  ;;  %p8367_p1 = scmp.lt.s32.totalorder %s477_s29, %s477_s29 }
  0x67   : > { %p8360_p9 = scmp.ne.s32.totalorder %s477_s29, %s8359_s1  ;;  %p8368_p2 = scmp.lt.s32.totalorder %s8359_s1, %s8359_s1 }
  0x69   : > { %p8362_p12 = pnand %p8360_p9, %p8752_p13  ;;  %p8369_p4 = por %p8368_p2, %p8367_p1 }
  0x6b   : > { %p8363_p0 = pneg %p8362_p12 }
  0x6d   : > { %p8370_p8 = pnand %p8369_p4, %p8363_p0 }
  0x6f   : > { %8373 = shalt.err (!%p8370_p8)
}
  0x70   : > { %6996 = dma.hbm_to_vmem [thread:$0]  (!%p8736_p11), %s11041_s5, 1536, %s477_s29, [#allocation9], %s8571_s17, %s8571_s17, %s8572_s24  }
  0x71   : > { %s8573_s10 = smov [#allocation13]   ;;  %s8374_s19 = scalar_lea.hbm %s10961_s9, 768 }
  0x72   : > { %s508_s12 = sshll.u32 %s8573_s10, 4  ;;  %p8375_p4 = scmp.ne.s32.totalorder %s10961_s9, %s8374_s19  ;;  %s509_s12 = int_to_ptr.vmem [resolvable:$true] %s508_s12 }
  0x73   : > { %p8381_p10 = scmp.lt.u32.totalorder %s8374_s19, %s10961_s9 }
  0x74   : > { %p8377_p8 = pnand %p8375_p4, %p8752_p13 }
  0x76   : > { %p8378_p6 = pneg %p8377_p8 }
  0x78   : > { %p8383_p3 = pnand %p8381_p10, %p8378_p6 }
  0x7a   : > { %8386 = shalt.err (!%p8383_p3)
}
  0x7b   : > { %s8387_s29 = scalar_lea.vmem %s509_s12, 768  ;;  %p8395_p12 = scmp.lt.s32.totalorder %s509_s12, %s509_s12 }
  0x7c   : > { %p8388_p5 = scmp.ne.s32.totalorder %s509_s12, %s8387_s29  ;;  %p8396_p0 = scmp.lt.s32.totalorder %s8387_s29, %s8387_s29 }
  0x7e   : > { %p8390_p7 = pnand %p8388_p5, %p8752_p13  ;;  %p8397_p1 = por %p8396_p0, %p8395_p12 }
  0x80   : > { %p8391_p9 = pneg %p8390_p7 }
  0x82   : > { %p8398_p2 = pnand %p8397_p1, %p8391_p9 }
  0x84   : > { %8401 = shalt.err (!%p8398_p2)
}
  0x85   : > { %7002 = dma.hbm_to_vmem [thread:$0]  (!%p8736_p11), %s10961_s9, 768, %s509_s12, [#allocation12], %s8571_s17, %s8571_s17, %s8572_s24  }
  0x86   : > { %s8846_s14 = sadd.s32 1, %s8566_s27   ;;  %s46_s20 = sadd.s32 1, %s8562_s26 }
  0x87   : > { %s43_s10 = ssub.s32 %s8566_s27, %s8846_s14  ;;  %p53_p13 = scmp.ne.s32.totalorder %s8562_s26, %s8558_s25 }
  0x88   : > { %p44_p4 = scmp.eq.s32.totalorder %s43_s10, 0  ;;  %p54_p8 = scmp.eq.s32.totalorder %s8566_s27, 0 }
  0x89   : > { %p11042_p6 = scmp.eq.s32.totalorder %s8704_s28, 1  ;;  %p7021_p3 = scmp.lt.s32.totalorder %s8566_s27, 2 }
  0x8a   : > { %s8862_s30 = scalar_select %p44_p4, %s8562_s26, %s46_s20  }
  0x8b   : > { %p8856_p10 = por %p11042_p6, %p53_p13  ;;  %p55_p5 = por %p54_p8, %p53_p13 }
  0x8c   : > { %s537_s19 = sand.u32 1, %s8562_s26   ;;  %s6059_s17 = sshll.u32 %s8566_s27, 10 }
  0x8d   : > { %s6017_s21 = sshll.u32 %s537_s19, 6  ;;  %s11044_s23 = sld [smem:[#allocation26_spill]] }
  0x8e   : > { %s541_s1 = scalar_lea.vmem [#allocation5], %s6017_s21  ;;  %p8873_p11 = pnand %p7021_p3, %p55_p5 }
  0x8f   : > { %s548_s29 = sshll.u32 %s541_s1, 4  ;;  %s8877_s8 = scalar_lea.sflag [#allocation6], %s537_s19  ;;  %s8871_s29 = int_to_ptr.vmem [resolvable:$true] %s548_s29 }
  0x90   : > { %p8404_p9 = pneg %p8873_p11 }
  0x93   : > { %s8869_s16 = scalar_lea.hbm %s11044_s23, %s6059_s17  ;;  %s8407_s17 = scalar_lea.hbm %s11044_s23, 2048 }
  0x94   : > { %s8402_s20 = scalar_lea.hbm %s8869_s16, 1024  ;;  %p8408_p1 = scmp.lt.u32.totalorder %s8869_s16, %s11044_s23 }
  0x95   : > { %p8403_p7 = scmp.ne.s32.totalorder %s8869_s16, %s8402_s20  ;;  %p8409_p2 = scmp.lt.u32.totalorder %s8407_s17, %s8402_s20 }
  0x96   : > { %p8411_p4 = scmp.lt.u32.totalorder %s8402_s20, %s8869_s16 }
  0x97   : > { %p8405_p12 = pnand %p8404_p9, %p8403_p7  ;;  %p8410_p13 = por %p8409_p2, %p8408_p1 }
  0x99   : > { %p8406_p0 = pneg %p8405_p12  ;;  %p8412_p8 = por %p8411_p4, %p8410_p13 }
  0x9b   : > { %p8413_p6 = pnand %p8412_p8, %p8406_p0 }
  0x9d   : > { %8416 = shalt.err (!%p8413_p6)
}
  0x9e   : > { %s8417_s19 = scalar_lea.vmem %s8871_s29, 1024  ;;  %s8574_s1 = smov [#allocation5]  }
  0x9f   : > { %p8418_p3 = scmp.ne.s32.totalorder %s8871_s29, %s8417_s19  ;;  %s8422_s10 = sshll.u32 %s8574_s1, 4  ;;  %s8423_s10 = int_to_ptr.vmem [resolvable:$false] %s8422_s10 }
  0xa0   : > { %s8424_s21 = scalar_lea.vmem %s8423_s10, 2048  ;;  %p8425_p12 = scmp.lt.s32.totalorder %s8871_s29, %s8423_s10 }
  0xa1   : > { %p8420_p5 = pnand %p8418_p3, %p8404_p9  ;;  %p8426_p1 = scmp.lt.s32.totalorder %s8424_s21, %s8417_s19 }
  0xa3   : > { %p8421_p7 = pneg %p8420_p5  ;;  %p8427_p2 = por %p8426_p1, %p8425_p12 }
  0xa5   : > { %p8428_p13 = pnand %p8427_p2, %p8421_p7 }
  0xa7   : > { %8431 = shalt.err (!%p8428_p13)
}
  0xa8   : > { %s8575_s20 = smov 256   ;;  %s8576_s17 = smov 16  }
  0xa9   : > { %7006 = dma.hbm_to_vmem [thread:$0]  (!%p8873_p11), %s8869_s16, 1024, %s8871_s29, %s8877_s8, %s8575_s20, %s8575_s20, %s8576_s17  }
  0xaa   : > { %p11046_p9 = scmp.ne.s32.totalorder %s11037_s18, 0 }
  0xac   : > { %560 = sbr.rel (%p11046_p9) target bundleno = 1823 (0x71f), region = 80 }
  0xb3   : > { %s8908_s24 = sand.u32 1, %s8558_s25   ;;  %p11047_p0 = scmp.ne.s32.totalorder %s11034_s0, 0 }
  0xb4   : > { %s6021_s12 = sshll.u32 %s8908_s24, 6  ;;  %s563_s19 = scalar_lea.sflag [#allocation6], %s8908_s24 }
  0xb5   : > { %s8912_s1 = scalar_lea.vmem [#allocation5], %s6021_s12 }
  0xb6   : > { %8533 = dma.done.wait (%p11047_p0), %s563_s19, 1024  }
  0xb7   : > { %8535 = vsyncadd (%p11047_p0), %s563_s19, 4294966272  ;;  %p11048_p11 = scmp.eq.s32.totalorder %s8704_s28, 0 }
  0xb9   : > { %8537 = dma.done.wait (%p11048_p11), [#allocation9], 3072   ;;  %p11049_p4 = pmov %p11048_p11 }
  0xbb   : > { %8539 = vsyncadd (%p11049_p4), [#allocation9], 4294964224  ;;  %p11050_p8 = pmov %p11049_p4 }
  0xbc   : > { %p11051_p6 = pmov %p11049_p4 }
  0xbd   : > { %8541 = dma.done.wait (%p11050_p8), [#allocation12], 1536  }
  0xbe   : > { %8543 = vsyncadd (%p11051_p6), [#allocation12], 4294965760  ;;  %v11003_v0 = vmov 0.0   ;;  %s11000_s0 = smov 17   ;;  %v8929_v1 = vld [vmem:[%s8912_s1] sm:$0xff]  ;;  %v8932_v2 = vld [vmem:[%s8912_s1 + $0x8] sm:$0xff]  ;;  %v11002_v20 = vlaneseq }
  0xbf   : > { %7081 = vrot.lane.b32.xlu1 %v11003_v0, %s11000_s0  ;;  %v8937_v3 = vld [vmem:[%s8912_s1 + $0x10] sm:$0xff]  ;;  %v7090_v4 = vpack.i.bf16 %v8932_v2, %v8929_v1  ;;  %v8942_v5 = vld [vmem:[%s8912_s1 + $0x18] sm:$0xff]  ;;  %v8945_v6 = vld [vmem:[%s8912_s1 + $0x20] sm:$0xff]  ;;  %s10998_s18 = smov 16   ;;  %s10996_s16 = smov 15   ;;  %v7200_v15 = vpack.i.bf16 %v11003_v0, %v8932_v2  ;;  %vm11009_vm2 = vcmask 138240  }
  0xc0   : > { %v8948_v7 = vld [vmem:[%s8912_s1 + $0x28] sm:$0xff]  ;;  %v7095_v9 = vpack.i.bf16 %v8942_v5, %v8937_v3  ;;  %v8957_v10 = vld [vmem:[%s8912_s1 + $0x30] sm:$0xff]  ;;  %v8960_v11 = vld [vmem:[%s8912_s1 + $0x38] sm:$0xff]  ;;  %s11011_s29 = smov 1   ;;  %v7205_v13 = vpack.i.bf16 %v11003_v0, %v8942_v5  ;;  %s10994_s22 = smov 127   ;;  %v7210_v17 = vpack.i.bf16 %v8937_v3, %v8929_v1  ;;  %v9030_v21 = vand.u32 127, %v11002_v20 }
  0xc1   : > { %v7100_v8 = vpack.i.bf16 %v8948_v7, %v8945_v6  ;;  %7091 = vrot.lane.b32.xlu0 %v7090_v4, %s11000_s0  ;;  %v7105_v12 = vpack.i.bf16 %v8960_v11, %v8957_v10  ;;  %v7215_v14 = vpack.i.bf16 %v11003_v0, %v8948_v7  ;;  %v7225_v16 = vpack.i.bf16 %v8957_v10, %v8945_v6  ;;  %s10992_s8 = smov 113   ;;  %s10990_s10 = smov 112  }
  0xc2   : > { %v7220_v18 = vpack.i.bf16 %v11003_v0, %v8960_v11  ;;  %s11052_s17 = sld [smem:[#allocation27_spill]]  ;;  %s10983_s12 = smov 111   ;;  %11053 = vst [vmem:[#allocation25_spill] sm:$0xff] %v9030_v21  ;;  %v9033_v23 = vadd.s32 128, %v9030_v21  ;;  %v653_v25 = vand.u32 15, %v9030_v21  ;;  %vm655_vm0 = vcmp.ge.s32.totalorder %v9030_v21, 16 }
  0xc3   : > { %7086 = vrot.lane.b32.xlu1 %v11003_v0, %s11000_s0  ;;  %vm11008_vm7 = vcmask 130048   ;;  %vm9088_vm8 = vmpackc.low %vm655_vm0, %vm655_vm0  ;;  %vm10986_vm9 = vcmask 121856   ;;  %s11064_s2 = sld [smem:[#allocation28_spill]]  ;;  %vm10985_vm15 = vcmask 7168   ;;  %s11083_s21 = smov 17  }
  0xc4   : > { %v654_v27 = vand.u32 15, %v9033_v23  ;;  %vm9040_vm1 = vcmp.ge.s32.totalorder %v653_v25, 1  ;;  %vm9113_vm11 = vcmp.lt.s32.totalorder %v653_v25, 15  ;;  %s11084_s20 = smov 16   ;;  %s11112_s6 = sld [smem:[#allocation32_spill]] }
  0xc5   : > { %7096 = vrot.lane.b32.xlu0 %v7095_v9, %s11000_s0  ;;  %vm659_vm4 = vmand %vm655_vm0, %vm9040_vm1  ;;  %s11191_s4 = sld [smem:[#allocation30_spill]]  ;;  %s8589_s5 = smov [#allocation14]  }
  0xc6   : > { %vm9046_vm3 = vcmp.ge.s32.totalorder %v654_v27, 1  ;;  %vm9066_vm6 = vmpackc.low %vm659_vm4, %vm659_vm4  ;;  %vm9106_vm10 = vcmp.lt.s32.totalorder %v654_v27, 15  ;;  %vm666_vm4 = vcmp.lt.s32.totalorder %v9033_v23, 240 }
  0xc7   : > { %7101 = vrot.lane.b32.xlu1 %v7100_v8, %s11000_s0  ;;  %vm9059_vm5 = vmpackc.low %vm9046_vm3, %vm9046_vm3 }
  0xc8   : > { %v1456_v19 = vld [vmem:[%s11052_s17 + $0x8] sm:$0xff]  ;;  %vm9129_vm12 = vmpackc.low %vm9106_vm10, %vm9106_vm10 }
  0xc9   : > { %7106 = vrot.lane.b32.xlu0 %v7105_v12, %s11000_s0  ;;  %1616 = vmatprep.mubr.f32.mxu0 %v1456_v19  ;;  %v1485_v27 = vld [vmem:[%s11064_s2 + $0x30] sm:$0xff]  ;;  %vm663_vm13 = vmand %vm655_vm0, %vm9113_vm11 }
  0xca   : > { %vm9141_vm14 = vmpackc.low %vm663_vm13, %vm663_vm13 }
  0xcb   : > { %7116 = vrot.lane.b32.xlu1 %v7095_v9, %s10998_s18  ;;  %vm9178_vm0 = vmpackc.low %vm9040_vm1, %vm9040_vm1  ;;  %vm10988_vm1 = vcmask 1039360  }
  0xcc   : > { %vm9223_vm13 = vmpackc.low %vm9113_vm11, %vm9113_vm11 }
  0xcd   : > { %7111 = vrot.lane.b32.xlu0 %v7090_v4, %s10998_s18  ;;  %vm668_vm11 = vmand %vm666_vm4, %vm9046_vm3  ;;  %vm10989_vm3 = vcmask 916480  }
  0xcf   : > { %7126 = vrot.lane.b32.xlu1 %v7100_v8, %s10998_s18 }
  0xd1   : > { %7121 = vrot.lane.b32.xlu0 %v11003_v0, %s10998_s18 }
  0xd3   : > { %7136 = vrot.lane.b32.xlu1 %v11003_v0, %s10998_s18 }
  0xd5   : > { %7131 = vrot.lane.b32.xlu0 %v7105_v12, %s10998_s18 }
  0xd7   : > { %7146 = vrot.lane.b32.xlu1 %v7095_v9, %s10996_s16 }
  0xd9   : > { %7141 = vrot.lane.b32.xlu0 %v7090_v4, %s10996_s16 }
  0xdb   : > { %7156 = vrot.lane.b32.xlu1 %v7100_v8, %s10996_s16 }
  0xdd   : > { %7151 = vrot.lane.b32.xlu0 %v11003_v0, %s10996_s16 }
  0xdf   : > { %7166 = vrot.lane.b32.xlu1 %v11003_v0, %s10996_s16 }
  0xe1   : > { %7161 = vrot.lane.b32.xlu0 %v7105_v12, %s10996_s16 }
  0xe3   : > { %7176 = vrot.lane.b32.xlu1 %v7095_v9, %s11011_s29 }
  0xe5   : > { %7171 = vrot.lane.b32.xlu0 %v7090_v4, %s11011_s29 }
  0xe7   : > { %7186 = vrot.lane.b32.xlu1 %v7100_v8, %s11011_s29 }
  0xe9   : > { %7181 = vrot.lane.b32.xlu0 %v11003_v0, %s11011_s29 }
  0xeb   : > { %7196 = vrot.lane.b32.xlu1 %v11003_v0, %s11011_s29 }
  0xed   : > { %7191 = vrot.lane.b32.xlu0 %v7105_v12, %s11011_s29 }
  0xef   : > { %7206 = vrot.lane.b32.xlu1 %v7205_v13, %s10994_s22 }
  0xf1   : > { %7201 = vrot.lane.b32.xlu0 %v7200_v15, %s10994_s22 }
  0xf3   : > { %7216 = vrot.lane.b32.xlu1 %v7215_v14, %s10994_s22 }
  0xf5   : > { %7211 = vrot.lane.b32.xlu0 %v7210_v17, %s10994_s22 }
  0xf7   : > { %7226 = vrot.lane.b32.xlu1 %v7225_v16, %s10994_s22 }
  0xf9   : > { %7221 = vrot.lane.b32.xlu0 %v7220_v18, %s10994_s22  ;;  %s11086_s22 = smov 127  }
  0xfb   : > { %7236 = vrot.lane.b32.xlu1 %v7205_v13, %s10992_s8 }
  0xfd   : > { %7231 = vrot.lane.b32.xlu0 %v7200_v15, %s10992_s8 }
  0xff   : > { %7246 = vrot.lane.b32.xlu1 %v7215_v14, %s10992_s8 }
 0x101   : > { %7241 = vrot.lane.b32.xlu0 %v7210_v17, %s10992_s8 }
 0x103   : > { %7256 = vrot.lane.b32.xlu1 %v7225_v16, %s10992_s8 }
 0x105   : > { %7251 = vrot.lane.b32.xlu0 %v7220_v18, %s10992_s8  ;;  %s11089_s8 = smov 111  }
 0x107   : > { %7266 = vrot.lane.b32.xlu1 %v7205_v13, %s10990_s10 }
 0x109   : > { %7261 = vrot.lane.b32.xlu0 %v7200_v15, %s10990_s10 }
 0x10b   : > { %7276 = vrot.lane.b32.xlu1 %v7215_v14, %s10990_s10 }
 0x10d   : > { %7271 = vrot.lane.b32.xlu0 %v7210_v17, %s10990_s10 }
 0x10f   : > { %7286 = vrot.lane.b32.xlu1 %v7225_v16, %s10990_s10 }
 0x111   : > { %7281 = vrot.lane.b32.xlu0 %v7220_v18, %s10990_s10 }
 0x113   : > { %7296 = vrot.lane.b32.xlu1 %v7205_v13, %s10983_s12 }
 0x115   : > { %7291 = vrot.lane.b32.xlu0 %v7200_v15, %s10983_s12 }
 0x117   : > { %7306 = vrot.lane.b32.xlu1 %v7215_v14, %s10983_s12 }
 0x119   : > { %7301 = vrot.lane.b32.xlu0 %v7210_v17, %s10983_s12 }
 0x11b   : > { %7316 = vrot.lane.b32.xlu1 %v7225_v16, %s10983_s12 }
 0x11d   : > { %7311 = vrot.lane.b32.xlu0 %v7220_v18, %s10983_s12  ;;  %s11204_s12 = smov 1  }
 0x131   : > { %v7082_v22 = vpop.permute.xlu1 %7081 }
 0x132   : > { %v7083_v30 = vunpack.i.l.bf16 %v7082_v22  ;;  %v7084_v36 = vunpack.i.h.bf16 %v7082_v22 }
 0x133   : > { %v7092_v26 = vpop.permute.xlu0 %7091 }
 0x134   : > { %v7094_v31 = vunpack.i.h.bf16 %v7092_v26  ;;  %v7093_v32 = vunpack.i.l.bf16 %v7092_v26 }
 0x135   : > { %v7087_v24 = vpop.permute.xlu1 %7086 }
 0x136   : > { %v7088_v40 = vunpack.i.l.bf16 %v7087_v24  ;;  %v741_v42 = vsel %vm11009_vm2, %v7093_v32, %v7094_v31  ;;  %v740_v45 = vsel %vm11009_vm2, %v7083_v30, %v7093_v32  ;;  %v7089_v47 = vunpack.i.h.bf16 %v7087_v24 }
 0x137   : > { %v7097_v33 = vpop.permute.xlu0 %7096 }
 0x138   : > { %v7099_v37 = vunpack.i.h.bf16 %v7097_v33  ;;  %v7098_v38 = vunpack.i.l.bf16 %v7097_v33 }
 0x139   : > { %v7102_v28 = vpop.permute.xlu1 %7101 }
 0x13a   : > { %v7104_v34 = vunpack.i.h.bf16 %v7102_v28  ;;  %v7103_v41 = vunpack.i.l.bf16 %v7102_v28  ;;  %v743_v43 = vsel %vm11009_vm2, %v7098_v38, %v7099_v37  ;;  %v742_v46 = vsel %vm11009_vm2, %v7084_v36, %v7098_v38 }
 0x13b   : > { %v7107_v49 = vpop.permute.xlu0 %7106  ;;  %v6374_v50 = vpack.c.bf16 %v743_v43, %v741_v42  ;;  %v6377_v51 = vpack.c.bf16 %v742_v46, %v740_v45  ;;  %v1483_v42 = vld [vmem:[%s11064_s2 + $0x20] sm:$0xff] }
 0x13c   : > { %v745_v48 = vsel %vm11009_vm2, %v7103_v41, %v7104_v34  ;;  %v7109_v53 = vunpack.i.h.bf16 %v7107_v49  ;;  %v7108_v54 = vunpack.i.l.bf16 %v7107_v49  ;;  %v744_v58 = vsel %vm11009_vm2, %v7088_v40, %v7103_v41  ;;  %v1484_v41 = vld [vmem:[%s11064_s2 + $0x28] sm:$0xff] }
 0x13d   : > { %v7117_v39 = vpop.permute.xlu1 %7116  ;;  %6376 = vmatprep.subr.msk.bf16.mxu0 %vm9059_vm5, %v6374_v50 }
 0x13e   : > { %v7119_v55 = vunpack.i.h.bf16 %v7117_v39  ;;  %v7118_v56 = vunpack.i.l.bf16 %v7117_v39  ;;  %v746_v59 = vsel %vm11009_vm2, %v7089_v47, %v7108_v54  ;;  %v747_v60 = vsel %vm11009_vm2, %v7108_v54, %v7109_v53  ;;  %6379 = vmatpush1.bf16.msk.msra.mxu0 %vm9066_vm6, %v6377_v51 }
 0x13f   : > { %v7112_v61 = vpop.permute.xlu0 %7111  ;;  %v6380_v62 = vpack.c.bf16 %v747_v60, %v745_v48  ;;  %v6383_v63 = vpack.c.bf16 %v746_v59, %v744_v58  ;;  %v8586_v47 = vmov 0   ;;  %v1486_v58 = vld [vmem:[%s11064_s2 + $0x38] sm:$0xff] }
 0x140   : > { %v7114_v4 = vunpack.i.h.bf16 %v7112_v61  ;;  %v7113_v8 = vunpack.i.l.bf16 %v7112_v61  ;;  %v828_v9 = vsel %vm11008_vm7, %v7118_v56, %v7119_v55  ;;  %7321 = vset.pattern.permute.xlu1 %v8586_v47  ;;  %7320 = vset.pattern.permute.xlu0 %v8586_v47 }
 0x141   : > { %v7127_v57 = vpop.permute.xlu1 %7126  ;;  %6382 = vmatprep.subr.msk.bf16.mxu0 %vm9059_vm5, %v6380_v62  ;;  %1514 = vperm.xlu1 %7321, %v1484_v41  }
 0x142   : > { %6385 = vmatpush1.bf16.msk.msra.mxu0 %vm9066_vm6, %v6383_v63  ;;  %v826_v13 = vsel %vm11008_vm7, %v7113_v8, %v7114_v4  ;;  %v7129_v19 = vunpack.i.h.bf16 %v7127_v57  ;;  %v7128_v22 = vunpack.i.l.bf16 %v7127_v57  ;;  %1509 = vperm.xlu0 %7320, %v1483_v42  }
 0x143   : > { %v7122_v14 = vpop.permute.xlu0 %7121  ;;  %v6386_v15 = vpack.c.bf16 %v828_v9, %v826_v13 }
 0x144   : > { %v7124_v16 = vunpack.i.h.bf16 %v7122_v14  ;;  %v7123_v17 = vunpack.i.l.bf16 %v7122_v14  ;;  %v830_v40 = vsel %vm11008_vm7, %v7128_v22, %v7129_v19 }
 0x145   : > { %v7137_v12 = vpop.permute.xlu1 %7136  ;;  %6387 = vmatprep.subr.bf16.mxu0 %v6386_v15  ;;  %1519 = vperm.xlu1 %7321, %v1485_v27  }
 0x146   : > { %v827_v24 = vsel %vm11008_vm7, %v7124_v16, %v7118_v56  ;;  %v825_v26 = vsel %vm11008_vm7, %v7123_v17, %v7113_v8  ;;  %v7139_v28 = vunpack.i.h.bf16 %v7137_v12  ;;  %v7138_v30 = vunpack.i.l.bf16 %v7137_v12  ;;  %1524 = vperm.xlu0 %7320, %v1486_v58  }
 0x147   : > { %v7132_v32 = vpop.permute.xlu0 %7131  ;;  %v6388_v33 = vpack.c.bf16 %v827_v24, %v825_v26 }
 0x148   : > { %v7134_v34 = vunpack.i.h.bf16 %v7132_v32  ;;  %v7133_v36 = vunpack.i.l.bf16 %v7132_v32  ;;  %v829_v43 = vsel %vm11008_vm7, %v7138_v30, %v7128_v22 }
 0x149   : > { %v7147_v18 = vpop.permute.xlu1 %7146  ;;  %6390 = vmatpush1.bf16.msk.msra.mxu0 %vm9088_vm8, %v6388_v33  ;;  %7323 = vrot.lane.b32.xlu1 %v11003_v0, %s11000_s0 }
 0x14a   : > { %v7149_v37 = vunpack.i.h.bf16 %v7147_v18  ;;  %v7148_v38 = vunpack.i.l.bf16 %v7147_v18  ;;  %v831_v45 = vsel %vm11008_vm7, %v7139_v28, %v7133_v36  ;;  %v832_v46 = vsel %vm11008_vm7, %v7133_v36, %v7134_v34  ;;  %7328 = vrot.lane.b32.xlu0 %v11003_v0, %s11000_s0  ;;  %s11087_s0 = smov 113  }
 0x14b   : > { %v7142_v48 = vpop.permute.xlu0 %7141  ;;  %v6391_v49 = vpack.c.bf16 %v832_v46, %v830_v40  ;;  %v6393_v50 = vpack.c.bf16 %v831_v45, %v829_v43  ;;  %v1479_v43 = vld [vmem:[%s11064_s2] sm:$0xff] }
 0x14c   : > { %v913_v53 = vsel %vm10986_vm9, %v7148_v38, %v7149_v37  ;;  %v7144_v54 = vunpack.i.h.bf16 %v7142_v48  ;;  %v7143_v55 = vunpack.i.l.bf16 %v7142_v48 }
 0x14d   : > { %v7157_v39 = vpop.permute.xlu1 %7156  ;;  %6392 = vmatprep.subr.bf16.mxu0 %v6391_v49  ;;  %7333 = vrot.lane.b32.xlu1 %v11003_v0, %s10998_s18 }
 0x14e   : > { %v911_v59 = vsel %vm10986_vm9, %v7143_v55, %v7144_v54  ;;  %6395 = vmatpush1.bf16.msk.msra.mxu0 %vm9088_vm8, %v6393_v50  ;;  %v7159_v8 = vunpack.i.h.bf16 %v7157_v39  ;;  %v7158_v9 = vunpack.i.l.bf16 %v7157_v39  ;;  %7338 = vrot.lane.b32.xlu0 %v11003_v0, %s10998_s18  ;;  %s11088_s18 = smov 112  }
 0x14f   : > { %v7152_v60 = vpop.permute.xlu0 %7151  ;;  %v6396_v61 = vpack.c.bf16 %v913_v53, %v911_v59  ;;  %v1480_v53 = vld [vmem:[%s11064_s2 + $0x8] sm:$0xff] }
 0x150   : > { %v7154_v62 = vunpack.i.h.bf16 %v7152_v60  ;;  %v7153_v63 = vunpack.i.l.bf16 %v7152_v60  ;;  %v915_v30 = vsel %vm10986_vm9, %v7158_v9, %v7159_v8  ;;  %v1481_v8 = vld [vmem:[%s11064_s2 + $0x10] sm:$0xff] }
 0x151   : > { %v7167_v56 = vpop.permute.xlu1 %7166  ;;  %6398 = vmatprep.subr.msk.bf16.mxu0 %vm9129_vm12, %v6396_v61  ;;  %7343 = vrot.lane.b32.xlu1 %v11003_v0, %s10996_s16 }
 0x152   : > { %v912_v12 = vsel %vm10986_vm9, %v7154_v62, %v7148_v38  ;;  %v910_v13 = vsel %vm10986_vm9, %v7153_v63, %v7143_v55  ;;  %v7169_v14 = vunpack.i.h.bf16 %v7167_v56  ;;  %v7168_v15 = vunpack.i.l.bf16 %v7167_v56  ;;  %1489 = vperm.xlu0 %7320, %v1479_v43  }
 0x153   : > { %v7162_v17 = vpop.permute.xlu0 %7161  ;;  %v6399_v18 = vpack.c.bf16 %v912_v12, %v910_v13 }
 0x154   : > { %v7164_v19 = vunpack.i.h.bf16 %v7162_v17  ;;  %v7163_v22 = vunpack.i.l.bf16 %v7162_v17  ;;  %v914_v32 = vsel %vm10986_vm9, %v7168_v15, %v7158_v9  ;;  %v1482_v9 = vld [vmem:[%s11064_s2 + $0x18] sm:$0xff]  ;;  %s11237_s2 = sld [smem:[#allocation33_spill]] }
 0x155   : > { %v7177_v4 = vpop.permute.xlu1 %7176  ;;  %6401 = vmatpush1.bf16.msk.msra.mxu0 %vm9141_vm14, %v6399_v18  ;;  %1494 = vperm.xlu1 %7321, %v1480_v53  }
 0x156   : > { %v7179_v24 = vunpack.i.h.bf16 %v7177_v4  ;;  %v7178_v26 = vunpack.i.l.bf16 %v7177_v4  ;;  %v916_v33 = vsel %vm10986_vm9, %v7169_v14, %v7163_v22  ;;  %v917_v34 = vsel %vm10986_vm9, %v7163_v22, %v7164_v19  ;;  %7348 = vrot.lane.b32.xlu0 %v11003_v0, %s10996_s16  ;;  %vm9242_vm9 = vmpackc.low %vm668_vm11, %vm668_vm11  ;;  %s11085_s16 = smov 15  }
 0x157   : > { %v7172_v36 = vpop.permute.xlu0 %7171  ;;  %v6402_v37 = vpack.c.bf16 %v917_v34, %v915_v30  ;;  %v6405_v38 = vpack.c.bf16 %v916_v33, %v914_v32  ;;  %v6420_v22 = vpack.c.bf16 %v8942_v5, %v8932_v2  ;;  %v6424_v2 = vpack.c.bf16 %v8960_v11, %v8948_v7  ;;  %vm9267_vm11 = vmpackc.low %vm666_vm4, %vm666_vm4 }
 0x158   : > { %v998_v39 = vsel %vm10985_vm15, %v7178_v26, %v7179_v24  ;;  %v7174_v40 = vunpack.i.h.bf16 %v7172_v36  ;;  %v7173_v41 = vunpack.i.l.bf16 %v7172_v36 }
 0x159   : > { %v7187_v28 = vpop.permute.xlu1 %7186  ;;  %6404 = vmatprep.subr.msk.bf16.mxu0 %vm9129_vm12, %v6402_v37  ;;  %1499 = vperm.xlu1 %7321, %v1481_v8  }
 0x15a   : > { %v996_v45 = vsel %vm10985_vm15, %v7173_v41, %v7174_v40  ;;  %6407 = vmatpush1.bf16.msk.msra.mxu0 %vm9141_vm14, %v6405_v38  ;;  %v7189_v54 = vunpack.i.h.bf16 %v7187_v28  ;;  %v7188_v55 = vunpack.i.l.bf16 %v7187_v28  ;;  %1504 = vperm.xlu0 %7320, %v1482_v9  }
 0x15b   : > { %v7182_v46 = vpop.permute.xlu0 %7181  ;;  %v6408_v47 = vpack.c.bf16 %v998_v39, %v996_v45 }
 0x15c   : > { %v7184_v48 = vunpack.i.h.bf16 %v7182_v46  ;;  %v7183_v49 = vunpack.i.l.bf16 %v7182_v46  ;;  %v1000_v12 = vsel %vm10985_vm15, %v7188_v55, %v7189_v54 }
 0x15d   : > { %v7197_v42 = vpop.permute.xlu1 %7196  ;;  %6410 = vmatprep.subr.msk.bf16.mxu0 %vm9059_vm5, %v6408_v47  ;;  %7353 = vrot.lane.b32.xlu1 %v11003_v0, %s11011_s29 }
 0x15e   : > { %v997_v27 = vsel %vm10985_vm15, %v7184_v48, %v7178_v26  ;;  %v995_v58 = vsel %vm10985_vm15, %v7183_v49, %v7173_v41  ;;  %v7199_v59 = vunpack.i.h.bf16 %v7197_v42  ;;  %v7198_v60 = vunpack.i.l.bf16 %v7197_v42 }
 0x15f   : > { %v7192_v61 = vpop.permute.xlu0 %7191  ;;  %v6411_v62 = vpack.c.bf16 %v997_v27, %v995_v58  ;;  %v6422_v26 = vpack.c.bf16 %v8937_v3, %v8929_v1  ;;  %v6426_v3 = vpack.c.bf16 %v8957_v10, %v8945_v6 }
 0x160   : > { %v7194_v63 = vunpack.i.h.bf16 %v7192_v61  ;;  %v7193_v4 = vunpack.i.l.bf16 %v7192_v61  ;;  %v999_v13 = vsel %vm10985_vm15, %v7198_v60, %v7188_v55 }
 0x161   : > { %v7207_v50 = vpop.permute.xlu1 %7206  ;;  %6413 = vmatpush1.bf16.msk.msra.mxu0 %vm9178_vm0, %v6411_v62 }
 0x162   : > { %v1001_v14 = vsel %vm10985_vm15, %v7199_v59, %v7193_v4  ;;  %v1002_v15 = vsel %vm10985_vm15, %v7193_v4, %v7194_v63  ;;  %v7209_v28 = vunpack.i.h.bf16 %v7207_v50  ;;  %v7208_v30 = vunpack.i.l.bf16 %v7207_v50 }
 0x163   : > { %v7202_v17 = vpop.permute.xlu0 %7201  ;;  %v6414_v18 = vpack.c.bf16 %v1002_v15, %v1000_v12  ;;  %v6417_v19 = vpack.c.bf16 %v1001_v14, %v999_v13  ;;  %vm10987_vm15 = vcmask 924672  }
 0x164   : > { %v7204_v32 = vunpack.i.h.bf16 %v7202_v17  ;;  %v7203_v33 = vunpack.i.l.bf16 %v7202_v17  ;;  %v1099_v38 = vsel %vm10988_vm1, %v7208_v30, %v7209_v28 }
 0x165   : > { %v9186_v29 = vpop.permute.xlu1 %7216  ;;  %6416 = vmatprep.subr.msk.bf16.mxu0 %vm9059_vm5, %v6414_v18 }
 0x166   : > { %6419 = vmatpush1.bf16.msk.msra.mxu0 %vm9178_vm0, %v6417_v19  ;;  %v1097_v1 = vsel %vm10988_vm1, %v7203_v33, %v7204_v32  ;;  %v7219_v40 = vunpack.i.h.bf16 %v9186_v29  ;;  %v7218_v41 = vunpack.i.l.bf16 %v9186_v29 }
 0x167   : > { %v7212_v34 = vpop.permute.xlu0 %7211  ;;  %6421 = vmatprep.subr.bf16.mxu0 %v6420_v22  ;;  %v6428_v47 = vpack.c.bf16 %v1099_v38, %v1097_v1 }
 0x168   : > { %v7214_v36 = vunpack.i.h.bf16 %v7212_v34  ;;  %v7213_v37 = vunpack.i.l.bf16 %v7212_v34  ;;  %v1101_v54 = vsel %vm10988_vm1, %v7218_v41, %v7219_v40 }
 0x169   : > { %v7227_v24 = vpop.permute.xlu1 %7226 }
 0x16a   : > { %6423 = vmatpush1.bf16.msra.mxu0 %v6422_v26  ;;  %v1098_v11 = vsel %vm10988_vm1, %v7214_v36, %v7208_v30  ;;  %v1096_v45 = vsel %vm10988_vm1, %v7213_v37, %v7203_v33  ;;  %v7229_v46 = vunpack.i.h.bf16 %v7227_v24  ;;  %v7228_v10 = vunpack.i.l.bf16 %v7227_v24 }
 0x16b   : > { %v7222_v39 = vpop.permute.xlu0 %7221  ;;  %6425 = vmatprep.subr.bf16.mxu0 %v6424_v2  ;;  %v6431_v58 = vpack.c.bf16 %v1098_v11, %v1096_v45 }
 0x16c   : > { %v7224_v42 = vunpack.i.h.bf16 %v7222_v39  ;;  %v7223_v43 = vunpack.i.l.bf16 %v7222_v39  ;;  %v1100_v63 = vsel %vm10988_vm1, %v7228_v10, %v7218_v41 }
 0x16d   : > { %v7237_v5 = vpop.permute.xlu1 %7236 }
 0x16e   : > { %v1103_v48 = vsel %vm10988_vm1, %v7223_v43, %v7224_v42  ;;  %v7239_v49 = vunpack.i.h.bf16 %v7237_v5  ;;  %v7238_v50 = vunpack.i.l.bf16 %v7237_v5  ;;  %6427 = vmatpush1.bf16.msra.mxu0 %v6426_v3  ;;  %v1102_v60 = vsel %vm10988_vm1, %v7229_v46, %v7223_v43  ;;  %vm670_vm1 = vmand %vm666_vm4, %vm9106_vm10 }
 0x16f   : > { %v7232_v53 = vpop.permute.xlu0 %7231  ;;  %6430 = vmatprep.subr.msk.bf16.mxu0 %vm9129_vm12, %v6428_v47  ;;  %v6434_v57 = vpack.c.bf16 %v1103_v48, %v1101_v54  ;;  %v6437_v9 = vpack.c.bf16 %v1102_v60, %v1100_v63  ;;  %vm11007_vm10 = vcmask 261120  }
 0x170   : > { %v7234_v55 = vunpack.i.h.bf16 %v7232_v53  ;;  %v7233_v27 = vunpack.i.l.bf16 %v7232_v53  ;;  %v1184_v61 = vsel %vm10987_vm15, %v7238_v50, %v7239_v49 }
 0x171   : > { %v7247_v7 = vpop.permute.xlu1 %7246 }
 0x172   : > { %v1182_v62 = vsel %vm10987_vm15, %v7233_v27, %v7234_v55  ;;  %6433 = vmatpush1.bf16.msk.msra.mxu0 %vm9223_vm13, %v6431_v58  ;;  %v7249_v13 = vunpack.i.h.bf16 %v7247_v7  ;;  %v7248_v14 = vunpack.i.l.bf16 %v7247_v7  ;;  %v11079_v7 = vmov 0 }
 0x173   : > { %v7242_v4 = vpop.permute.xlu0 %7241  ;;  %6436 = vmatprep.subr.msk.bf16.mxu0 %vm9129_vm12, %v6434_v57  ;;  %v6440_v15 = vpack.c.bf16 %v1184_v61, %v1182_v62  ;;  %v11080_v7 = vsel %vm9267_vm11, 4294967295, %v11079_v7 }
 0x174   : > { %v7244_v29 = vunpack.i.h.bf16 %v7242_v4  ;;  %v7243_v8 = vunpack.i.l.bf16 %v7242_v4  ;;  %v1186_v2 = vsel %vm10987_vm15, %v7248_v14, %v7249_v13 }
 0x175   : > { %v7257_v59 = vpop.permute.xlu1 %7256 }
 0x176   : > { %v1183_v17 = vsel %vm10987_vm15, %v7244_v29, %v7238_v50  ;;  %v1181_v18 = vsel %vm10987_vm15, %v7243_v8, %v7233_v27  ;;  %v7259_v19 = vunpack.i.h.bf16 %v7257_v59  ;;  %v7258_v22 = vunpack.i.l.bf16 %v7257_v59  ;;  %6439 = vmatpush1.bf16.msk.msra.mxu0 %vm9223_vm13, %v6437_v9 }
 0x177   : > { %v7252_v24 = vpop.permute.xlu0 %7251  ;;  %6442 = vmatprep.subr.msk.bf16.mxu0 %vm9242_vm9, %v6440_v15  ;;  %v6443_v26 = vpack.c.bf16 %v1183_v17, %v1181_v18 }
 0x178   : > { %v7254_v28 = vunpack.i.h.bf16 %v7252_v24  ;;  %v7253_v30 = vunpack.i.l.bf16 %v7252_v24  ;;  %v1185_v5 = vsel %vm10987_vm15, %v7258_v22, %v7248_v14  ;;  %v1455_v22 = vld [vmem:[%s11052_s17] sm:$0xff] }
 0x179   : > { %v7267_v12 = vpop.permute.xlu1 %7266 }
 0x17a   : > { %v7269_v32 = vunpack.i.h.bf16 %v7267_v12  ;;  %v7268_v33 = vunpack.i.l.bf16 %v7267_v12  ;;  %v1187_v36 = vsel %vm10987_vm15, %v7259_v19, %v7253_v30  ;;  %v1188_v37 = vsel %vm10987_vm15, %v7253_v30, %v7254_v28  ;;  %6445 = vmatpush1.bf16.msk.msra.mxu0 %vm9178_vm0, %v6443_v26  ;;  %v1459_v26 = vld [vmem:[%s11052_s17 + $0x20] sm:$0xff] }
 0x17b   : > { %v7262_v38 = vpop.permute.xlu0 %7261  ;;  %v6446_v1 = vpack.c.bf16 %v1188_v37, %v1186_v2  ;;  %v6449_v3 = vpack.c.bf16 %v1187_v36, %v1185_v5  ;;  %vm11010_vm15 = vcmask 908288   ;;  %v1458_v36 = vld [vmem:[%s11052_s17 + $0x18] sm:$0xff] }
 0x17c   : > { %v1269_v39 = vsel %vm10989_vm3, %v7268_v33, %v7269_v32  ;;  %v7264_v40 = vunpack.i.h.bf16 %v7262_v38  ;;  %v7263_v41 = vunpack.i.l.bf16 %v7262_v38 }
 0x17d   : > { %v7277_v34 = vpop.permute.xlu1 %7276  ;;  %6448 = vmatprep.subr.msk.bf16.mxu0 %vm9242_vm9, %v6446_v1  ;;  %v1462_v1 = vld [vmem:[%s11052_s17 + $0x38] sm:$0xff] }
 0x17e   : > { %v1267_v43 = vsel %vm10989_vm3, %v7263_v41, %v7264_v40  ;;  %6451 = vmatpush1.bf16.msk.msra.mxu0 %vm9178_vm0, %v6449_v3  ;;  %v7279_v49 = vunpack.i.h.bf16 %v7277_v34  ;;  %v7278_v50 = vunpack.i.l.bf16 %v7277_v34 }
 0x17f   : > { %v7272_v11 = vpop.permute.xlu0 %7271  ;;  %v6452_v45 = vpack.c.bf16 %v1269_v39, %v1267_v43  ;;  %v1461_v43 = vld [vmem:[%s11052_s17 + $0x30] sm:$0xff] }
 0x180   : > { %v7274_v46 = vunpack.i.h.bf16 %v7272_v11  ;;  %v7273_v47 = vunpack.i.l.bf16 %v7272_v11  ;;  %v1271_v63 = vsel %vm10989_vm3, %v7278_v50, %v7279_v49  ;;  %v1464_v49 = vld [vmem:[%s11052_s17 + $0x48] sm:$0xff] }
 0x181   : > { %v7287_v42 = vpop.permute.xlu1 %7286  ;;  %6454 = vmatprep.subr.msk.bf16.mxu0 %vm9267_vm11, %v6452_v45 }
 0x182   : > { %v7289_v10 = vunpack.i.h.bf16 %v7287_v42  ;;  %v7288_v53 = vunpack.i.l.bf16 %v7287_v42  ;;  %v1266_v54 = vsel %vm10989_vm3, %v7273_v47, %v7263_v41  ;;  %v1268_v55 = vsel %vm10989_vm3, %v7274_v46, %v7268_v33  ;;  %v1465_v47 = vld [vmem:[%s11052_s17 + $0x50] sm:$0xff] }
 0x183   : > { %v7282_v27 = vpop.permute.xlu0 %7281  ;;  %v6455_v58 = vpack.c.bf16 %v1268_v55, %v1266_v54  ;;  %v1470_v54 = vld [vmem:[%s11052_s17 + $0x78] sm:$0xff] }
 0x184   : > { %v7284_v59 = vunpack.i.h.bf16 %v7282_v27  ;;  %v7283_v60 = vunpack.i.l.bf16 %v7282_v27  ;;  %v1270_v29 = vsel %vm10989_vm3, %v7288_v53, %v7278_v50  ;;  %v1468_v50 = vld [vmem:[%s11052_s17 + $0x68] sm:$0xff]  ;;  %v1471_v53 = vld [vmem:[%s11052_s17 + $0x80] sm:$0xff]  ;;  %v1474_v55 = vld [vmem:[%s11052_s17 + $0x98] sm:$0xff] }
 0x185   : > { %v7297_v48 = vpop.permute.xlu1 %7296  ;;  %6456 = vmatpush1.bf16.msra.mxu0 %v6455_v58  ;;  %v1473_v27 = vld [vmem:[%s11052_s17 + $0x90] sm:$0xff] }
 0x186   : > { %v7299_v57 = vunpack.i.h.bf16 %v7297_v48  ;;  %v7298_v61 = vunpack.i.l.bf16 %v7297_v48  ;;  %v1273_v4 = vsel %vm10989_vm3, %v7283_v60, %v7284_v59  ;;  %v1272_v8 = vsel %vm10989_vm3, %v7289_v10, %v7283_v60  ;;  %vm9290_vm3 = vmpackc.low %vm670_vm1, %vm670_vm1  ;;  %v1467_v10 = vld [vmem:[%s11052_s17 + $0x60] sm:$0xff]  ;;  %v1477_v58 = vld [vmem:[%s11052_s17 + $0xb0] sm:$0xff] }
 0x187   : > { %v7292_v9 = vpop.permute.xlu0 %7291  ;;  %v6457_v12 = vpack.c.bf16 %v1273_v4, %v1271_v63  ;;  %v6460_v13 = vpack.c.bf16 %v1272_v8, %v1270_v29  ;;  %v1476_v59 = vld [vmem:[%s11052_s17 + $0xa8] sm:$0xff]  ;;  %v1457_v60 = vld [vmem:[%s11052_s17 + $0x10] sm:$0xff]  ;;  %v1475_v29 = vld [vmem:[%s11052_s17 + $0xa0] sm:$0xff]  ;;  %vm11090_vm1 = vcmask 121856  }
 0x188   : > { %v1354_v14 = vsel %vm11010_vm15, %v7298_v61, %v7299_v57  ;;  %v7294_v15 = vunpack.i.h.bf16 %v7292_v9  ;;  %v7293_v17 = vunpack.i.l.bf16 %v7292_v9  ;;  %v1460_v57 = vld [vmem:[%s11052_s17 + $0x28] sm:$0xff]  ;;  %v1469_v63 = vld [vmem:[%s11052_s17 + $0x70] sm:$0xff]  ;;  %v1478_v8 = vld [vmem:[%s11052_s17 + $0xb8] sm:$0xff] }
 0x189   : > { %v7307_v62 = vpop.permute.xlu1 %7306  ;;  %6459 = vmatprep.subr.msk.bf16.mxu0 %vm9267_vm11, %v6457_v12  ;;  %v1472_v4 = vld [vmem:[%s11052_s17 + $0x88] sm:$0xff]  ;;  %vm11091_vm4 = vmmov %vm11090_vm1 }
 0x18a   : > { %v1352_v19 = vsel %vm11010_vm15, %v7293_v17, %v7294_v15  ;;  %6461 = vmatpush1.bf16.msra.mxu0 %v6460_v13  ;;  %v7309_v28 = vunpack.i.h.bf16 %v7307_v62  ;;  %v7308_v33 = vunpack.i.l.bf16 %v7307_v62  ;;  %v1466_v62 = vld [vmem:[%s11052_s17 + $0x58] sm:$0xff] }
 0x18b   : > { %v7302_v23 = vpop.permute.xlu0 %7301  ;;  %v6462_v24 = vpack.c.bf16 %v1354_v14, %v1352_v19 }
 0x18c   : > { %v7304_v30 = vunpack.i.h.bf16 %v7302_v23  ;;  %v7303_v32 = vunpack.i.l.bf16 %v7302_v23  ;;  %v1356_v39 = vsel %vm11010_vm15, %v7308_v33, %v7309_v28 }
 0x18d   : > { %v7317_v18 = vpop.permute.xlu1 %7316  ;;  %1617 = vmatmul.mubr.f32.vlgmr.msra.gmra.mrb[0].mxu0 %v1455_v22  ;;  %6464 = vmatprep.subr.msk.bf16.mxu0 %vm9290_vm3, %v6462_v24 }
 0x18e   : > { %v7318_v34 = vunpack.i.l.bf16 %v7317_v18  ;;  %v1353_v2 = vsel %vm11010_vm15, %v7304_v30, %v7298_v61  ;;  %v1351_v5 = vsel %vm11010_vm15, %v7303_v32, %v7293_v17  ;;  %1622 = vmatprep.mubr.f32.mxu0 %v1459_v26  ;;  %v7319_v37 = vunpack.i.h.bf16 %v7317_v18  ;;  %v1463_v61 = vld [vmem:[%s11052_s17 + $0x40] sm:$0xff] }
 0x18f   : > { %v6465_v38 = vpack.c.bf16 %v1353_v2, %v1351_v5  ;;  %v7312_v3 = vpop.permute.xlu0 %7311 }
 0x190   : > { %v7314_v40 = vunpack.i.h.bf16 %v7312_v3  ;;  %v7313_v41 = vunpack.i.l.bf16 %v7312_v3  ;;  %v1355_v42 = vsel %vm11010_vm15, %v7318_v34, %v7308_v33 }
 0x191   : > { %1623 = vmatmul.mubr.f32.gmra.mrb[2].mxu0 %v1458_v36 }
 0x192   : > { %6467 = vmatpush1.bf16.msk.msra.mxu0 %vm9223_vm13, %v6465_v38  ;;  %1628 = vmatprep.mubr.f32.mxu0 %v1462_v1  ;;  %v1358_v11 = vsel %vm11010_vm15, %v7313_v41, %v7314_v40  ;;  %v1357_v45 = vsel %vm11010_vm15, %v7319_v37, %v7313_v41 }
 0x193   : > { %v6471_v46 = vpack.c.bf16 %v1357_v45, %v1355_v42  ;;  %v6468_v48 = vpack.c.bf16 %v1358_v11, %v1356_v39 }
 0x195   : > { %1629 = vmatmul.mubr.f32.gmra.mrb[4].mxu0 %v1461_v43  ;;  %6470 = vmatprep.subr.msk.bf16.mxu0 %vm9290_vm3, %v6468_v48 }
 0x196   : > { %1634 = vmatprep.mubr.f32.mxu0 %v1465_v47  ;;  %6473 = vmatpush1.bf16.msk.msra.mxu0 %vm9223_vm13, %v6471_v46 }
 0x199   : > { %1635 = vmatmul.mubr.f32.gmra.mrb[6].mxu0 %v1464_v49 }
 0x19a   : > { %1640 = vmatprep.mubr.f32.mxu0 %v1468_v50 }
 0x19d   : > { %1641 = vmatmul.mubr.f32.gmra.mrb[8].mxu0 %v1467_v10 }
 0x19e   : > { %1646 = vmatprep.mubr.f32.mxu0 %v1471_v53 }
 0x1a1   : > { %1647 = vmatmul.mubr.f32.gmra.mrb[10].mxu0 %v1470_v54 }
 0x1a2   : > { %1652 = vmatprep.mubr.f32.mxu0 %v1474_v55 }
 0x1a5   : > { %1653 = vmatmul.mubr.f32.gmra.mrb[12].mxu0 %v1473_v27 }
 0x1a6   : > { %1658 = vmatprep.mubr.f32.mxu0 %v1477_v58 }
 0x1a9   : > { %1659 = vmatmul.mubr.f32.gmra.mrb[14].mxu0 %v1476_v59 }
 0x1aa   : > { %1729 = vmatprep.mubr.f32.mxu0 %v11003_v0 }
 0x1ad   : > { %6028 = vmatmul.mubr.msk.f32.vlgmr.msra.gmra.mrb[0].mxu0 %vm11007_vm10, %v1457_v60 }
 0x1ae   : > { %1735 = vmatprep.mubr.f32.mxu0 %v11003_v0 }
 0x1b1   : > { %6029 = vmatmul.mubr.msk.f32.gmra.mrb[2].mxu0 %vm11007_vm10, %v1460_v57 }
 0x1b2   : > { %1741 = vmatprep.mubr.f32.mxu0 %v11003_v0 }
 0x1b5   : > { %6030 = vmatmul.mubr.msk.f32.gmra.mrb[4].mxu0 %vm11007_vm10, %v1463_v61 }
 0x1b6   : > { %1747 = vmatprep.mubr.f32.mxu0 %v11003_v0 }
 0x1b9   : > { %6031 = vmatmul.mubr.msk.f32.gmra.mrb[6].mxu0 %vm11007_vm10, %v1466_v62 }
 0x1ba   : > { %1753 = vmatprep.mubr.f32.mxu0 %v11003_v0 }
 0x1bd   : > { %6032 = vmatmul.mubr.msk.f32.gmra.mrb[8].mxu0 %vm11007_vm10, %v1469_v63 }
 0x1be   : > { %1759 = vmatprep.mubr.f32.mxu0 %v11003_v0 }
 0x1c0   : > { %v1515_v9 = vpop.permute.xlu1 %1514 }
 0x1c1   : > { %6033 = vmatmul.mubr.msk.f32.gmra.mrb[10].mxu0 %vm11007_vm10, %v1472_v4  ;;  %v1510_v12 = vpop.permute.xlu0 %1509 }
 0x1c2   : > { %1765 = vmatprep.mubr.f32.mxu0 %v11003_v0 }
 0x1c4   : > { %v9392_v13 = vpop.permute.xlu1 %1519 }
 0x1c5   : > { %6034 = vmatmul.mubr.msk.f32.gmra.mrb[12].mxu0 %vm11007_vm10, %v1475_v29  ;;  %v9394_v14 = vpop.permute.xlu0 %1524 }
 0x1c6   : > { %1771 = vmatprep.mubr.f32.mxu0 %v11003_v0 }
 0x1c8   : > { %v9396_v15 = vpop.permute.xlu1 %7323 }
 0x1c9   : > { %6035 = vmatmul.mubr.msk.f32.gmra.mrb[14].mxu0 %vm11007_vm10, %v1478_v8  ;;  %v9398_v17 = vpop.permute.xlu0 %7328  ;;  %vm11092_vm10 = vmmov %vm11090_vm1 }
 0x1cc   : > { %v9400_v18 = vpop.permute.xlu1 %7333 }
 0x1cd   : > { %v9402_v19 = vpop.permute.xlu0 %7338 }
 0x1d0   : > { %v9404_v22 = vpop.permute.xlu1 %7343 }
 0x1d1   : > { %v1490_v23 = vpop.permute.xlu0 %1489 }
 0x1d4   : > { %v1495_v26 = vpop.permute.xlu1 %1494 }
 0x1d5   : > { %v9410_v5 = vpop.permute.xlu0 %7348 }
 0x1d8   : > { %v1500_v1 = vpop.permute.xlu1 %1499 }
 0x1d9   : > { %v1505_v46 = vpop.permute.xlu0 %1504 }
 0x280   : > { %v1731_v24 = vpop.f32.mrb[0].mxu0 }
 0x281   : > { %v6886_v28 = vadd.f32 %v1731_v24, %v1490_v23  ;;  %v1733_v30 = vpop.f32.mrb[1].mxu0 }
 0x282   : > { %v6887_v32 = vadd.f32 %v1733_v30, %v1490_v23 }
 0x283   : > { %v9406_v33 = vmax.f32 %v6886_v28, 0.0 }
 0x284   : > { %v9408_v34 = vmax.f32 %v6887_v32, 0.0  ;;  %v1737_v2 = vpop.f32.mrb[2].mxu0 }
 0x285   : > { %v6888_v36 = vadd.f32 %v1737_v2, %v1495_v26  ;;  %v1739_v37 = vpop.f32.mrb[3].mxu0 }
 0x286   : > { %v6889_v38 = vadd.f32 %v1739_v37, %v1495_v26  ;;  %v9414_v3 = vpack.i.bf16 %v9408_v34, %v9406_v33 }
 0x287   : > { %v9416_v39 = vmax.f32 %v6888_v36, 0.0 }
 0x288   : > { %v9418_v40 = vmax.f32 %v6889_v38, 0.0  ;;  %v1743_v41 = vpop.f32.mrb[4].mxu0 }
 0x289   : > { %v6890_v42 = vadd.f32 %v1743_v41, %v1500_v1  ;;  %v1745_v43 = vpop.f32.mrb[5].mxu0  ;;  %v9422_v11 = vpack.i.bf16 %v9416_v39, %v9406_v33 }
 0x28a   : > { %v6891_v45 = vadd.f32 %v1745_v43, %v1500_v1  ;;  %v9426_v47 = vpack.i.bf16 %v9418_v40, %v9416_v39 }
 0x28b   : > { %v9428_v48 = vmax.f32 %v6890_v42, 0.0 }
 0x28c   : > { %v9430_v49 = vmax.f32 %v6891_v45, 0.0  ;;  %v1749_v50 = vpop.f32.mrb[6].mxu0 }
 0x28d   : > { %v6892_v10 = vadd.f32 %v1749_v50, %v1505_v46  ;;  %v1751_v53 = vpop.f32.mrb[7].mxu0 }
 0x28e   : > { %v6893_v27 = vadd.f32 %v1751_v53, %v1505_v46  ;;  %v9438_v58 = vpack.i.bf16 %v9430_v49, %v9428_v48 }
 0x28f   : > { %v9440_v59 = vmax.f32 %v6892_v10, 0.0 }
 0x290   : > { %v9442_v60 = vmax.f32 %v6893_v27, 0.0  ;;  %v1755_v57 = vpop.f32.mrb[8].mxu0 }
 0x291   : > { %v6894_v61 = vadd.f32 %v1755_v57, %v1510_v12  ;;  %v1757_v62 = vpop.f32.mrb[9].mxu0  ;;  %v9446_v63 = vpack.i.bf16 %v9440_v59, %v9428_v48 }
 0x292   : > { %v6895_v4 = vadd.f32 %v1757_v62, %v1510_v12  ;;  %v9450_v29 = vpack.i.bf16 %v9442_v60, %v9440_v59 }
 0x293   : > { %v9452_v8 = vmax.f32 %v6894_v61, 0.0 }
 0x294   : > { %v9454_v23 = vmax.f32 %v6895_v4, 0.0  ;;  %v1761_v24 = vpop.f32.mrb[10].mxu0 }
 0x295   : > { %v6896_v26 = vadd.f32 %v1761_v24, %v1515_v9  ;;  %v1763_v28 = vpop.f32.mrb[11].mxu0 }
 0x296   : > { %v6897_v32 = vadd.f32 %v1763_v28, %v1515_v9  ;;  %v7357_v2 = vpack.i.bf16 %v9454_v23, %v9452_v8 }
 0x297   : > { %v9460_v36 = vmax.f32 %v6896_v26, 0.0 }
 0x298   : > { %v9462_v12 = vmax.f32 %v6897_v32, 0.0  ;;  %v1767_v37 = vpop.f32.mrb[12].mxu0  ;;  %7358 = vrot.lane.b32.xlu1 %v7357_v2, %s11083_s21  ;;  %v7427_v32 = vpack.i.bf16 %v11003_v0, %v9454_v23 }
 0x299   : > { %v6898_v1 = vadd.f32 %v1767_v37, %v9392_v13  ;;  %v1769_v41 = vpop.f32.mrb[13].mxu0  ;;  %v7442_v42 = vpack.i.bf16 %v9460_v36, %v9452_v8 }
 0x29a   : > { %v6899_v9 = vadd.f32 %v1769_v41, %v9392_v13  ;;  %v7377_v43 = vpack.i.bf16 %v9462_v12, %v9460_v36  ;;  %v3699_v41 = vld [vmem:[#allocation10 + $0x8] sm:$0xff] }
 0x29b   : > { %v9473_v45 = vmax.f32 %v6898_v1, 0.0  ;;  %4546 = vmatprep.mubr.f32.mxu0 %v3699_v41 }
 0x29c   : > { %v9475_v46 = vmax.f32 %v6899_v9, 0.0  ;;  %v1773_v50 = vpop.f32.mrb[14].mxu0  ;;  %7378 = vrot.lane.b32.xlu0 %v7377_v43, %s11083_s21  ;;  %7363 = vrot.lane.b32.xlu1 %v7357_v2, %s11084_s20 }
 0x29d   : > { %v6900_v10 = vadd.f32 %v1773_v50, %v9394_v14  ;;  %v1775_v53 = vpop.f32.mrb[15].mxu0 }
 0x29e   : > { %v6901_v57 = vadd.f32 %v1775_v53, %v9394_v14  ;;  %v7397_v61 = vpack.i.bf16 %v9475_v46, %v9473_v45  ;;  %v7447_v37 = vpack.i.bf16 %v11003_v0, %v9475_v46 }
 0x29f   : > { %v9487_v62 = vmax.f32 %v6900_v10, 0.0 }
 0x2a0   : > { %v9489_v4 = vmax.f32 %v6901_v57, 0.0  ;;  %7383 = vrot.lane.b32.xlu0 %v7377_v43, %s11084_s20  ;;  %7368 = vrot.lane.b32.xlu1 %v7357_v2, %s11085_s16  ;;  %v7326_v57 = vunpack.i.h.bf16 %v9396_v15 }
 0x2a1   : > { %v7452_v24 = vpack.i.bf16 %v9487_v62, %v9473_v45 }
 0x2a2   : > { %v7422_v26 = vpack.i.bf16 %v9489_v4, %v9487_v62  ;;  %v7517_v1 = vpack.i.bf16 %v11003_v0, %v9489_v4 }
 0x2a4   : > { %7388 = vrot.lane.b32.xlu0 %v7377_v43, %s11085_s16  ;;  %7373 = vrot.lane.b32.xlu1 %v7357_v2, %s11011_s29  ;;  %v7432_v2 = vpack.i.bf16 %v11003_v0, %v9462_v12 }
 0x2a8   : > { %7393 = vrot.lane.b32.xlu0 %v7377_v43, %s11011_s29  ;;  %7423 = vrot.lane.b32.xlu1 %v7422_v26, %s11083_s21 }
 0x2ac   : > { %7398 = vrot.lane.b32.xlu0 %v7397_v61, %s11083_s21  ;;  %7428 = vrot.lane.b32.xlu1 %v7427_v32, %s11086_s22 }
 0x2b0   : > { %7403 = vrot.lane.b32.xlu0 %v11003_v0, %s11011_s29  ;;  %7438 = vrot.lane.b32.xlu1 %v7422_v26, %s11084_s20 }
 0x2b4   : > { %7408 = vrot.lane.b32.xlu0 %v7397_v61, %s11084_s20  ;;  %7443 = vrot.lane.b32.xlu1 %v7442_v42, %s11086_s22 }
 0x2b8   : > { %7413 = vrot.lane.b32.xlu0 %v7397_v61, %s11085_s16  ;;  %7458 = vrot.lane.b32.xlu1 %v7422_v26, %s11085_s16 }
 0x2bc   : > { %7418 = vrot.lane.b32.xlu0 %v7397_v61, %s11011_s29  ;;  %7463 = vrot.lane.b32.xlu1 %v7427_v32, %s11087_s0  ;;  %v7325_v61 = vunpack.i.l.bf16 %v9396_v15 }
 0x2c0   : > { %7433 = vrot.lane.b32.xlu0 %v7432_v2, %s11086_s22  ;;  %7473 = vrot.lane.b32.xlu1 %v7422_v26, %s11011_s29 }
 0x2c4   : > { %7448 = vrot.lane.b32.xlu0 %v7447_v37, %s11086_s22  ;;  %7478 = vrot.lane.b32.xlu1 %v7442_v42, %s11087_s0 }
 0x2c8   : > { %7453 = vrot.lane.b32.xlu0 %v7452_v24, %s11086_s22  ;;  %7493 = vrot.lane.b32.xlu1 %v7427_v32, %s11088_s18 }
 0x2cc   : > { %7468 = vrot.lane.b32.xlu0 %v7432_v2, %s11087_s0  ;;  %7503 = vrot.lane.b32.xlu1 %v7442_v42, %s11088_s18 }
 0x2d0   : > { %7483 = vrot.lane.b32.xlu0 %v7447_v37, %s11087_s0  ;;  %7518 = vrot.lane.b32.xlu1 %v7517_v1, %s11086_s22 }
 0x2d4   : > { %7488 = vrot.lane.b32.xlu0 %v7452_v24, %s11087_s0  ;;  %7523 = vrot.lane.b32.xlu1 %v7427_v32, %s11089_s8 }
 0x2d8   : > { %7498 = vrot.lane.b32.xlu0 %v7432_v2, %s11088_s18  ;;  %7533 = vrot.lane.b32.xlu1 %v7517_v1, %s11087_s0 }
 0x2dc   : > { %7508 = vrot.lane.b32.xlu0 %v7447_v37, %s11088_s18  ;;  %7538 = vrot.lane.b32.xlu1 %v7442_v42, %s11089_s8  ;;  %v9574_v42 = vpop.permute.xlu1 %7353 }
 0x2e0   : > { %7513 = vrot.lane.b32.xlu0 %v7452_v24, %s11088_s18  ;;  %7553 = vrot.lane.b32.xlu1 %v7517_v1, %s11088_s18 }
 0x2e4   : > { %7528 = vrot.lane.b32.xlu0 %v7432_v2, %s11089_s8  ;;  %7558 = vrot.lane.b32.xlu1 %v9414_v3, %s11083_s21 }
 0x2e8   : > { %7543 = vrot.lane.b32.xlu0 %v7447_v37, %s11089_s8  ;;  %7568 = vrot.lane.b32.xlu1 %v11003_v0, %s11083_s21 }
 0x2ec   : > { %7548 = vrot.lane.b32.xlu0 %v7452_v24, %s11089_s8  ;;  %7578 = vrot.lane.b32.xlu1 %v9450_v29, %s11083_s21 }
 0x2f0   : > { %7563 = vrot.lane.b32.xlu0 %v9426_v47, %s11083_s21  ;;  %7588 = vrot.lane.b32.xlu1 %v7517_v1, %s11089_s8 }
 0x2f4   : > { %7573 = vrot.lane.b32.xlu0 %v9438_v58, %s11083_s21  ;;  %7593 = vrot.lane.b32.xlu1 %v9414_v3, %s11084_s20 }
 0x2f8   : > { %7583 = vrot.lane.b32.xlu0 %v11003_v0, %s11083_s21  ;;  %7603 = vrot.lane.b32.xlu1 %v11003_v0, %s11084_s20 }
 0x2fc   : > { %7598 = vrot.lane.b32.xlu0 %v9426_v47, %s11084_s20  ;;  %7613 = vrot.lane.b32.xlu1 %v9450_v29, %s11084_s20 }
 0x300   : > { %7608 = vrot.lane.b32.xlu0 %v9438_v58, %s11084_s20  ;;  %7623 = vrot.lane.b32.xlu1 %v9414_v3, %s11085_s16 }
 0x304   : > { %7618 = vrot.lane.b32.xlu0 %v11003_v0, %s11084_s20  ;;  %7633 = vrot.lane.b32.xlu1 %v11003_v0, %s11085_s16 }
 0x308   : > { %7628 = vrot.lane.b32.xlu0 %v9426_v47, %s11085_s16  ;;  %7643 = vrot.lane.b32.xlu1 %v9450_v29, %s11085_s16 }
 0x30a   : > { %v7359_v9 = vpop.permute.xlu1 %7358 }
 0x30b   : > { %v7361_v43 = vunpack.i.h.bf16 %v7359_v9  ;;  %v7360_v50 = vunpack.i.l.bf16 %v7359_v9 }
 0x30c   : > { %7638 = vrot.lane.b32.xlu0 %v9438_v58, %s11085_s16  ;;  %7653 = vrot.lane.b32.xlu1 %v9414_v3, %s11011_s29 }
 0x30d   : > { %v3770_v32 = vsel %vm11009_vm2, %v7325_v61, %v7360_v50  ;;  %v3771_v3 = vsel %vm11009_vm2, %v7360_v50, %v7361_v43 }
 0x30e   : > { %v7379_v10 = vpop.permute.xlu0 %7378  ;;  %v9584_v53 = vpop.permute.xlu1 %7363 }
 0x30f   : > { %v7381_v24 = vunpack.i.h.bf16 %v7379_v10  ;;  %v7380_v26 = vunpack.i.l.bf16 %v7379_v10  ;;  %v9612_v10 = vpack.i.bf16 %v11003_v0, %v9408_v34 }
 0x310   : > { %7648 = vrot.lane.b32.xlu0 %v11003_v0, %s11085_s16  ;;  %7663 = vrot.lane.b32.xlu1 %v11003_v0, %s11011_s29 }
 0x311   : > { %v3772_v2 = vsel %vm11009_vm2, %v7326_v57, %v7380_v26  ;;  %v3773_v37 = vsel %vm11009_vm2, %v7380_v26, %v7381_v24 }
 0x312   : > { %v6677_v1 = vpack.c.bf16 %v3772_v2, %v3770_v32  ;;  %v7384_v41 = vpop.permute.xlu0 %7383  ;;  %v9596_v9 = vpop.permute.xlu1 %7368  ;;  %v6674_v15 = vpack.c.bf16 %v3773_v37, %v3771_v3  ;;  %v7331_v32 = vunpack.i.h.bf16 %v9398_v17  ;;  %v9630_v37 = vpack.i.bf16 %v11003_v0, %v9418_v40 }
 0x313   : > { %v7386_v57 = vunpack.i.h.bf16 %v7384_v41  ;;  %v7385_v61 = vunpack.i.l.bf16 %v7384_v41  ;;  %v7366_v41 = vunpack.i.h.bf16 %v9584_v53 }
 0x314   : > { %6676 = vmatprep.subr.msk.bf16.mxu0 %vm9059_vm5, %v6674_v15  ;;  %7658 = vrot.lane.b32.xlu0 %v9426_v47, %s11011_s29  ;;  %v7365_v15 = vunpack.i.l.bf16 %v9584_v53  ;;  %v7336_v53 = vunpack.i.h.bf16 %v9400_v18 }
 0x315   : > { %7673 = vrot.lane.b32.xlu1 %v9450_v29, %s11011_s29  ;;  %6679 = vmatpush1.bf16.msk.msra.mxu0 %vm9066_vm6, %v6677_v1  ;;  %v9634_v1 = vpack.i.bf16 %v11003_v0, %v9442_v60 }
 0x316   : > { %v9606_v43 = vpop.permute.xlu0 %7388  ;;  %v9608_v50 = vpop.permute.xlu1 %7373 }
 0x318   : > { %7668 = vrot.lane.b32.xlu0 %v9438_v58, %s11011_s29  ;;  %v7330_v58 = vunpack.i.l.bf16 %v9398_v17  ;;  %v3853_v17 = vsel %vm11008_vm7, %v7385_v61, %v7386_v57  ;;  %v9652_v57 = vpack.i.bf16 %v11003_v0, %v9430_v49 }
 0x319   : > { %7683 = vrot.lane.b32.xlu1 %v9612_v10, %s11086_s22 }
 0x31a   : > { %v9618_v47 = vpop.permute.xlu0 %7393  ;;  %v7424_v29 = vpop.permute.xlu1 %7423 }
 0x31b   : > { %v7426_v24 = vunpack.i.h.bf16 %v7424_v29  ;;  %v7425_v26 = vunpack.i.l.bf16 %v7424_v29 }
 0x31c   : > { %7678 = vrot.lane.b32.xlu0 %v11003_v0, %s11011_s29  ;;  %s6026_s29 = sshll.u32 %s8908_s24, 5 }
 0x31d   : > { %7693 = vrot.lane.b32.xlu1 %v9422_v11, %s11086_s22  ;;  %v3776_v38 = vsel %vm11009_vm2, %v7331_v32, %v7425_v26  ;;  %v3777_v30 = vsel %vm11009_vm2, %v7425_v26, %v7426_v24  ;;  %v3851_v24 = vsel %vm11008_vm7, %v7365_v15, %v7366_v41  ;;  %v7335_v26 = vunpack.i.l.bf16 %v9400_v18  ;;  %s628_s19 = scalar_lea.vmem [#allocation14], %s6026_s29 }
 0x31e   : > { %v7399_v3 = vpop.permute.xlu0 %7398  ;;  %v9626_v2 = vpop.permute.xlu1 %7428 }
 0x31f   : > { %v7401_v29 = vunpack.i.h.bf16 %v7399_v3  ;;  %v7400_v20 = vunpack.i.l.bf16 %v7399_v3  ;;  %v3850_v18 = vsel %vm11008_vm7, %v7335_v26, %v7365_v15 }
 0x320   : > { %7688 = vrot.lane.b32.xlu0 %v9630_v37, %s11086_s22 }
 0x321   : > { %v3774_v55 = vsel %vm11009_vm2, %v7330_v58, %v7400_v20  ;;  %v3775_v54 = vsel %vm11009_vm2, %v7400_v20, %v7401_v29  ;;  %7703 = vrot.lane.b32.xlu1 %v9634_v1, %s11086_s22  ;;  %v3852_v20 = vsel %vm11008_vm7, %v7336_v53, %v7385_v61  ;;  %v7390_v61 = vunpack.i.l.bf16 %v9606_v43 }
 0x322   : > { %v6683_v28 = vpack.c.bf16 %v3776_v38, %v3774_v55  ;;  %v9648_v3 = vpop.permute.xlu0 %7403  ;;  %v7439_v14 = vpop.permute.xlu1 %7438  ;;  %v6680_v13 = vpack.c.bf16 %v3777_v30, %v3775_v54  ;;  %v6686_v55 = vpack.c.bf16 %v3853_v17, %v3851_v24  ;;  %v7341_v54 = vunpack.i.h.bf16 %v9402_v19 }
 0x323   : > { %v7440_v32 = vunpack.i.l.bf16 %v7439_v14  ;;  %v7441_v38 = vunpack.i.h.bf16 %v7439_v14  ;;  %v7391_v30 = vunpack.i.h.bf16 %v9606_v43  ;;  %v7340_v14 = vunpack.i.l.bf16 %v9402_v19 }
 0x324   : > { %6682 = vmatprep.subr.msk.bf16.mxu0 %vm9059_vm5, %v6680_v13  ;;  %7698 = vrot.lane.b32.xlu0 %v9652_v57, %s11086_s22  ;;  %v6688_v41 = vpack.c.bf16 %v3852_v20, %v3850_v18  ;;  %v7371_v53 = vunpack.i.h.bf16 %v9596_v9  ;;  %v7346_v43 = vunpack.i.h.bf16 %v9404_v22 }
 0x325   : > { %7713 = vrot.lane.b32.xlu1 %v9612_v10, %s11087_s0  ;;  %6685 = vmatpush1.bf16.msk.msra.mxu0 %vm9066_vm6, %v6683_v28  ;;  %v7370_v28 = vunpack.i.l.bf16 %v9596_v9  ;;  %v3856_v24 = vsel %vm11008_vm7, %v7341_v54, %v7440_v32  ;;  %v3857_v26 = vsel %vm11008_vm7, %v7440_v32, %v7441_v38  ;;  %v3933_v9 = vsel %vm11090_vm1, %v7390_v61, %v7391_v30 }
 0x326   : > { %v7409_v13 = vpop.permute.xlu0 %7408  ;;  %v9669_v58 = vpop.permute.xlu1 %7443  ;;  %6687 = vmatprep.subr.bf16.mxu0 %v6686_v55  ;;  %v3932_v32 = vsel %vm11092_vm10, %v7346_v43, %v7390_v61  ;;  %v7396_v30 = vunpack.i.h.bf16 %v9618_v47  ;;  %v7350_v61 = vunpack.i.l.bf16 %v9410_v5  ;;  %vm11094_vm10 = vmmov %vm11090_vm1  ;;  %v7376_v43 = vunpack.i.h.bf16 %v9608_v50 }
 0x327   : > { %v7411_v29 = vunpack.i.h.bf16 %v7409_v13  ;;  %v7410_v17 = vunpack.i.l.bf16 %v7409_v13  ;;  %v3931_v21 = vsel %vm11091_vm4, %v7370_v28, %v7371_v53  ;;  %vm11096_vm4 = vmmov %vm11090_vm1 }
 0x328   : > { %7708 = vrot.lane.b32.xlu0 %v9446_v63, %s11086_s22  ;;  %v6696_v38 = vpack.c.bf16 %v3933_v9, %v3931_v21 }
 0x329   : > { %v3854_v15 = vsel %vm11008_vm7, %v7340_v14, %v7410_v17  ;;  %7723 = vrot.lane.b32.xlu1 %v9422_v11, %s11087_s0  ;;  %6690 = vmatpush1.bf16.msk.msra.mxu0 %vm9088_vm8, %v6688_v41  ;;  %v3855_v19 = vsel %vm11008_vm7, %v7410_v17, %v7411_v29  ;;  %v7345_v41 = vunpack.i.l.bf16 %v9404_v22  ;;  %v7395_v29 = vunpack.i.l.bf16 %v9618_v47  ;;  %vm11093_vm7 = vmmov %vm11090_vm1 }
 0x32a   : > { %v6693_v20 = vpack.c.bf16 %v3856_v24, %v3854_v15  ;;  %v7414_v55 = vpop.permute.xlu0 %7413  ;;  %v7459_v54 = vpop.permute.xlu1 %7458  ;;  %v6691_v18 = vpack.c.bf16 %v3857_v26, %v3855_v19  ;;  %v7351_v22 = vunpack.i.h.bf16 %v9410_v5 }
 0x32b   : > { %v7416_v13 = vunpack.i.h.bf16 %v7414_v55  ;;  %v7415_v0 = vunpack.i.l.bf16 %v7414_v55  ;;  %v7461_v27 = vunpack.i.h.bf16 %v7459_v54  ;;  %v7460_v14 = vunpack.i.l.bf16 %v7459_v54 }
 0x32c   : > { %6692 = vmatprep.subr.bf16.mxu0 %v6691_v18  ;;  %7718 = vrot.lane.b32.xlu0 %v9630_v37, %s11087_s0  ;;  %v3930_v21 = vsel %vm11094_vm10, %v7345_v41, %v7370_v28  ;;  %v7355_v41 = vunpack.i.l.bf16 %v9574_v42 }
 0x32d   : > { %7733 = vrot.lane.b32.xlu1 %v9634_v1, %s11087_s0  ;;  %v3935_v17 = vsel %vm11090_vm1, %v7415_v0, %v7416_v13  ;;  %v3937_v53 = vsel %vm11093_vm7, %v7460_v14, %v7461_v27  ;;  %6695 = vmatpush1.bf16.msk.msra.mxu0 %vm9088_vm8, %v6693_v20  ;;  %v6699_v47 = vpack.c.bf16 %v3932_v32, %v3930_v21  ;;  %v7375_v27 = vunpack.i.l.bf16 %v9608_v50  ;;  %vm11095_vm7 = vmmov %vm11090_vm1 }
 0x32e   : > { %v7419_v24 = vpop.permute.xlu0 %7418  ;;  %v9699_v15 = vpop.permute.xlu1 %7463  ;;  %6698 = vmatprep.subr.msk.bf16.mxu0 %vm9129_vm12, %v6696_v38  ;;  %v3934_v19 = vsel %vm11095_vm7, %v7350_v61, %v7415_v0  ;;  %v3936_v26 = vsel %vm11096_vm4, %v7351_v22, %v7460_v14  ;;  %v6702_v5 = vpack.c.bf16 %v3937_v53, %v3935_v17  ;;  %vm11097_vm1 = vcmask 7168  }
 0x32f   : > { %v4013_v28 = vsel %vm11097_vm1, %v7395_v29, %v7396_v30  ;;  %v7356_v50 = vunpack.i.h.bf16 %v9574_v42  ;;  %vm11098_vm10 = vmmov %vm11097_vm1  ;;  %v6705_v18 = vpack.c.bf16 %v3936_v26, %v3934_v19  ;;  %v7421_v13 = vunpack.i.h.bf16 %v7419_v24 }
 0x330   : > { %7728 = vrot.lane.b32.xlu0 %v9652_v57, %s11087_s0  ;;  %v4011_v0 = vsel %vm11098_vm10, %v7375_v27, %v7376_v43  ;;  %v7420_v14 = vunpack.i.l.bf16 %v7419_v24  ;;  %vm11099_vm7 = vmmov %vm11097_vm1  ;;  %v4010_v24 = vsel %vm11097_vm1, %v7355_v41, %v7375_v27  ;;  %v7406_v22 = vunpack.i.h.bf16 %v9648_v3 }
 0x331   : > { %7743 = vrot.lane.b32.xlu1 %v9612_v10, %s11088_s18  ;;  %6701 = vmatpush1.bf16.msk.msra.mxu0 %vm9141_vm14, %v6699_v47  ;;  %v4012_v32 = vsel %vm11099_vm7, %v7356_v50, %v7395_v29  ;;  %v6708_v38 = vpack.c.bf16 %v4013_v28, %v4011_v0  ;;  %vm11100_vm4 = vmmov %vm11097_vm1  ;;  %v7405_v61 = vunpack.i.l.bf16 %v9648_v3  ;;  %v1803_v3 = vld [vmem:[#allocation8 + $0x8] sm:$0xff]  ;;  %v11106_v0 = vpack.c.bf16 %v9460_v36, %v9452_v8 }
 0x332   : > { %v9717_v9 = vpop.permute.xlu0 %7433  ;;  %v7474_v20 = vpop.permute.xlu1 %7473  ;;  %6704 = vmatprep.subr.msk.bf16.mxu0 %vm9129_vm12, %v6702_v5  ;;  %v6711_v42 = vpack.c.bf16 %v4012_v32, %v4010_v24  ;;  %vm11101_vm10 = vmmov %vm11097_vm1  ;;  %2650 = vmatprep.mubr.f32.mxu1 %v1803_v3  ;;  %v11107_v41 = vpack.c.bf16 %v9489_v4, %v9475_v46  ;;  %v11111_v4 = vpack.c.bf16 %v9487_v62, %v9473_v45  ;;  %v7465_v45 = vunpack.i.l.bf16 %v9699_v15 }
 0x333   : > { %v7476_v55 = vunpack.i.h.bf16 %v7474_v20  ;;  %v7475_v54 = vunpack.i.l.bf16 %v7474_v20  ;;  %v4015_v29 = vsel %vm11101_vm10, %v7420_v14, %v7421_v13  ;;  %vm11102_vm7 = vmmov %vm11097_vm1  ;;  %v7436_v5 = vunpack.i.h.bf16 %v9717_v9 }
 0x334   : > { %7738 = vrot.lane.b32.xlu0 %v9446_v63, %s11087_s0  ;;  %v7435_v28 = vunpack.i.l.bf16 %v9717_v9  ;;  %v7445_v13 = vunpack.i.l.bf16 %v9669_v58 }
 0x335   : > { %7753 = vrot.lane.b32.xlu1 %v9422_v11, %s11088_s18  ;;  %v4017_v30 = vsel %vm11100_vm4, %v7475_v54, %v7476_v55  ;;  %6707 = vmatpush1.bf16.msk.msra.mxu0 %vm9141_vm14, %v6705_v18  ;;  %v4016_v21 = vsel %vm11102_vm7, %v7406_v22, %v7475_v54  ;;  %vm11103_vm4 = vmmov %vm11097_vm1  ;;  %v11104_v55 = vpack.c.bf16 %v9462_v12, %v9454_v23  ;;  %v7431_v54 = vunpack.i.h.bf16 %v9626_v2 }
 0x336   : > { %v9732_v17 = vpop.permute.xlu0 %7448  ;;  %v9734_v53 = vpop.permute.xlu1 %7478  ;;  %6710 = vmatprep.subr.msk.bf16.mxu0 %vm9059_vm5, %v6708_v38  ;;  %v6714_v47 = vpack.c.bf16 %v4017_v30, %v4015_v29  ;;  %v4014_v19 = vsel %vm11103_vm4, %v7405_v61, %v7420_v14  ;;  %vm11105_vm1 = vcmask 1039360   ;;  %v7446_v12 = vunpack.i.h.bf16 %v9669_v58 }
 0x337   : > { %v6717_v26 = vpack.c.bf16 %v4016_v21, %v4014_v19  ;;  %v4109_v9 = vsel %vm11105_vm1, %v7435_v28, %v7436_v5  ;;  %vm11108_vm10 = vmmov %vm11105_vm1  ;;  %v7451_v32 = vunpack.i.h.bf16 %v9732_v17  ;;  %v7450_v8 = vunpack.i.l.bf16 %v9732_v17 }
 0x338   : > { %7748 = vrot.lane.b32.xlu0 %v9630_v37, %s11088_s18  ;;  %vm11109_vm7 = vmmov %vm11105_vm1  ;;  %v7466_v29 = vunpack.i.h.bf16 %v9699_v15  ;;  %v7481_v19 = vunpack.i.h.bf16 %v9734_v53  ;;  %v3712_v15 = vld [vmem:[%s11112_s6 + $0x10] sm:$0xff]  ;;  %v7480_v5 = vunpack.i.l.bf16 %v9734_v53 }
 0x339   : > { %7763 = vrot.lane.b32.xlu1 %v9634_v1, %s11088_s18  ;;  %6713 = vmatpush1.bf16.msk.msra.mxu0 %vm9178_vm0, %v6711_v42  ;;  %v4108_v36 = vsel %vm11109_vm7, %v7446_v12, %v7435_v28  ;;  %vm11110_vm4 = vmmov %vm11105_vm1 }
 0x33a   : > { %v9749_v43 = vpop.permute.xlu0 %7453  ;;  %v9751_v27 = vpop.permute.xlu1 %7493  ;;  %6716 = vmatprep.subr.msk.bf16.mxu0 %vm9059_vm5, %v6714_v47  ;;  %vm11114_vm7 = vmmov %vm11105_vm1 }
 0x33b   : > { %v7455_v42 = vunpack.i.l.bf16 %v9749_v43 }
 0x33c   : > { %7758 = vrot.lane.b32.xlu0 %v9652_v57, %s11088_s18 }
 0x33d   : > { %7773 = vrot.lane.b32.xlu1 %v9612_v10, %s11089_s8  ;;  %6719 = vmatpush1.bf16.msk.msra.mxu0 %vm9178_vm0, %v6717_v26  ;;  %v7430_v10 = vunpack.i.l.bf16 %v9626_v2 }
 0x33e   : > { %v7469_v20 = vpop.permute.xlu0 %7468  ;;  %v9764_v50 = vpop.permute.xlu1 %7503  ;;  %6721 = vmatprep.subr.bf16.mxu0 %v11104_v55 }
 0x33f   : > { %v7471_v38 = vunpack.i.h.bf16 %v7469_v20  ;;  %v7470_v30 = vunpack.i.l.bf16 %v7469_v20  ;;  %v4106_v17 = vsel %vm11105_vm1, %v7445_v13, %v7430_v10 }
 0x340   : > { %7768 = vrot.lane.b32.xlu0 %v9446_v63, %s11088_s18  ;;  %v6731_v62 = vpack.c.bf16 %v4108_v36, %v4106_v17  ;;  %v7505_v17 = vunpack.i.l.bf16 %v9764_v50 }
 0x341   : > { %7783 = vrot.lane.b32.xlu1 %v9422_v11, %s11089_s8  ;;  %6723 = vmatpush1.bf16.msra.mxu0 %v11106_v0  ;;  %v4107_v11 = vsel %vm11108_vm10, %v7430_v10, %v7431_v54  ;;  %vm11113_vm10 = vmmov %vm11105_vm1 }
 0x342   : > { %v9779_v18 = vpop.permute.xlu0 %7483  ;;  %v7519_v23 = vpop.permute.xlu1 %7518  ;;  %6725 = vmatprep.subr.bf16.mxu0 %v11107_v41  ;;  %v6728_v58 = vpack.c.bf16 %v4109_v9, %v4107_v11  ;;  %v4111_v61 = vsel %vm11113_vm10, %v7450_v8, %v7451_v32  ;;  %v7496_v32 = vunpack.i.h.bf16 %v9751_v27 }
 0x343   : > { %v7521_v2 = vunpack.i.h.bf16 %v7519_v23  ;;  %v7520_v14 = vunpack.i.l.bf16 %v7519_v23  ;;  %v7486_v54 = vunpack.i.h.bf16 %v9779_v18  ;;  %v7485_v10 = vunpack.i.l.bf16 %v9779_v18  ;;  %v3711_v23 = vld [vmem:[%s11112_s6 + $0x8] sm:$0xff] }
 0x344   : > { %7778 = vrot.lane.b32.xlu0 %v9630_v37, %s11089_s8  ;;  %v3710_v37 = vld [vmem:[%s11112_s6] sm:$0xff] }
 0x345   : > { %7793 = vrot.lane.b32.xlu1 %v9634_v1, %s11089_s8  ;;  %v4113_v46 = vsel %vm11110_vm4, %v7520_v14, %v7521_v2  ;;  %6727 = vmatpush1.bf16.msra.mxu0 %v11111_v4  ;;  %v7456_v1 = vunpack.i.h.bf16 %v9749_v43  ;;  %vm11115_vm4 = vcmask 924672   ;;  %v7506_v4 = vunpack.i.h.bf16 %v9764_v50 }
 0x346   : > { %v7489_v24 = vpop.permute.xlu0 %7488  ;;  %v9798_v22 = vpop.permute.xlu1 %7523  ;;  %6730 = vmatprep.subr.msk.bf16.mxu0 %vm9129_vm12, %v6728_v58  ;;  %v6734_v47 = vpack.c.bf16 %v4113_v46, %v4111_v61  ;;  %v4189_v43 = vsel %vm11115_vm4, %v7470_v30, %v7471_v38  ;;  %vm11116_vm10 = vmmov %vm11115_vm4  ;;  %v3713_v46 = vld [vmem:[%s11112_s6 + $0x18] sm:$0xff]  ;;  %s8436_s6 = sshll.u32 %s8589_s5, 4  ;;  %s8437_s6 = int_to_ptr.vmem [resolvable:$false] %s8436_s6 }
 0x347   : > { %v4112_v21 = vsel %vm11114_vm7, %v7456_v1, %v7520_v14  ;;  %v4187_v55 = vsel %vm11116_vm10, %v7465_v45, %v7466_v29  ;;  %vm11117_vm7 = vmmov %vm11115_vm4  ;;  %v7491_v41 = vunpack.i.h.bf16 %v7489_v24  ;;  %v7490_v11 = vunpack.i.l.bf16 %v7489_v24 }
 0x348   : > { %7788 = vrot.lane.b32.xlu0 %v9652_v57, %s11089_s8  ;;  %v4110_v57 = vsel %vm11105_vm1, %v7455_v42, %v7450_v8  ;;  %v4188_v0 = vsel %vm11117_vm7, %v7481_v19, %v7470_v30  ;;  %v6740_v53 = vpack.c.bf16 %v4189_v43, %v4187_v55  ;;  %vm11118_vm1 = vmmov %vm11115_vm4  ;;  %v7495_v8 = vunpack.i.l.bf16 %v9751_v27 }
 0x349   : > { %4452 = vperm.xlu1 %7321, %v3710_v37   ;;  %6733 = vmatpush1.bf16.msk.msra.mxu0 %vm9223_vm13, %v6731_v62  ;;  %v6737_v9 = vpack.c.bf16 %v4112_v21, %v4110_v57  ;;  %vm11119_vm10 = vmmov %vm11118_vm1  ;;  %v4190_v1 = vsel %vm11118_vm1, %v7490_v11, %v7485_v10  ;;  %v7525_v55 = vunpack.i.l.bf16 %v9798_v22 }
 0x34a   : > { %v7499_v26 = vpop.permute.xlu0 %7498  ;;  %v7534_v3 = vpop.permute.xlu1 %7533  ;;  %6736 = vmatprep.subr.msk.bf16.mxu0 %vm9129_vm12, %v6734_v47  ;;  %v4191_v58 = vsel %vm11119_vm10, %v7485_v10, %v7486_v54  ;;  %vm11120_vm7 = vmmov %vm11118_vm1 }
 0x34b   : > { %v7536_v28 = vunpack.i.h.bf16 %v7534_v3  ;;  %v7535_v20 = vunpack.i.l.bf16 %v7534_v3  ;;  %v7501_v12 = vunpack.i.h.bf16 %v7499_v26  ;;  %v7500_v13 = vunpack.i.l.bf16 %v7499_v26 }
 0x34c   : > { %7798 = vrot.lane.b32.xlu0 %v9446_v63, %s11089_s8  ;;  %v4186_v63 = vsel %vm11118_vm1, %v7480_v5, %v7465_v45 }
 0x34d   : > { %4462 = vperm.xlu1 %7321, %v3712_v15   ;;  %v4193_v2 = vsel %vm11115_vm4, %v7535_v20, %v7536_v28  ;;  %6739 = vmatpush1.bf16.msk.msra.mxu0 %vm9223_vm13, %v6737_v9  ;;  %v6743_v36 = vpack.c.bf16 %v4188_v0, %v4186_v63  ;;  %v4192_v38 = vsel %vm11120_vm7, %v7491_v41, %v7535_v20  ;;  %vm11121_vm4 = vcmask 916480  }
 0x34e   : > { %v7509_v18 = vpop.permute.xlu0 %7508  ;;  %v9837_v14 = vpop.permute.xlu1 %7538  ;;  %6742 = vmatprep.subr.msk.bf16.mxu0 %vm9242_vm9, %v6740_v53  ;;  %v6746_v30 = vpack.c.bf16 %v4193_v2, %v4191_v58  ;;  %v4269_v24 = vsel %vm11121_vm4, %v7500_v13, %v7501_v12  ;;  %vm11122_vm10 = vmmov %vm11121_vm4  ;;  %v6749_v62 = vpack.c.bf16 %v4192_v38, %v4190_v1  ;;  %v7526_v20 = vunpack.i.h.bf16 %v9798_v22 }
 0x34f   : > { %v4267_v45 = vsel %vm11122_vm10, %v7495_v8, %v7496_v32  ;;  %v7511_v61 = vunpack.i.h.bf16 %v7509_v18  ;;  %v7510_v21 = vunpack.i.l.bf16 %v7509_v18  ;;  %vm11123_vm7 = vmmov %vm11121_vm4  ;;  %v7541_v2 = vunpack.i.h.bf16 %v9837_v14 }
 0x350   : > { %4457 = vperm.xlu0 %7320, %v3711_v23   ;;  %v4268_v47 = vsel %vm11123_vm7, %v7506_v4, %v7500_v13  ;;  %v6752_v26 = vpack.c.bf16 %v4269_v24, %v4267_v45  ;;  %vm11124_vm1 = vmmov %vm11121_vm4  ;;  %v7540_v18 = vunpack.i.l.bf16 %v9837_v14  ;;  %v4347_v22 = vsel %vm11010_vm15, %v7525_v55, %v7526_v20  ;;  %v3702_v4 = vld [vmem:[#allocation10 + $0x20] sm:$0xff] }
 0x351   : > { %6745 = vmatpush1.bf16.msk.msra.mxu0 %vm9178_vm0, %v6743_v36  ;;  %v4266_v5 = vsel %vm11124_vm1, %v7505_v17, %v7495_v8  ;;  %vm11125_vm10 = vmmov %vm11124_vm1 }
 0x352   : > { %v7514_v37 = vpop.permute.xlu0 %7513  ;;  %v7554_v27 = vpop.permute.xlu1 %7553  ;;  %6748 = vmatprep.subr.msk.bf16.mxu0 %vm9242_vm9, %v6746_v30  ;;  %v4271_v54 = vsel %vm11125_vm10, %v7510_v21, %v7511_v61  ;;  %v6755_v10 = vpack.c.bf16 %v4268_v47, %v4266_v5  ;;  %vm11126_vm7 = vmmov %vm11124_vm1  ;;  %v4346_v14 = vsel %vm11010_vm15, %v7540_v18, %v7525_v55  ;;  %v3708_v18 = vld [vmem:[#allocation10 + $0x50] sm:$0xff] }
 0x353   : > { %v7556_v42 = vunpack.i.h.bf16 %v7554_v27  ;;  %v7555_v29 = vunpack.i.l.bf16 %v7554_v27  ;;  %v7516_v19 = vunpack.i.h.bf16 %v7514_v37  ;;  %v7515_v43 = vunpack.i.l.bf16 %v7514_v37 }
 0x354   : > { %4467 = vperm.xlu0 %7320, %v3713_v46   ;;  %v3698_v46 = vld [vmem:[#allocation10] sm:$0xff] }
 0x355   : > { %v4273_v50 = vsel %vm11121_vm4, %v7555_v29, %v7556_v42  ;;  %6751 = vmatpush1.bf16.msk.msra.mxu0 %vm9178_vm0, %v6749_v62  ;;  %v4270_v9 = vsel %vm11126_vm7, %v7515_v43, %v7510_v21  ;;  %vm11127_vm4 = vmmov %vm11124_vm1  ;;  %v3701_v62 = vld [vmem:[#allocation10 + $0x18] sm:$0xff]  ;;  %vm11129_vm1 = vcmask 130048  }
 0x356   : > { %v7529_v3 = vpop.permute.xlu0 %7528  ;;  %v7559_v15 = vpop.permute.xlu1 %7558  ;;  %6754 = vmatprep.subr.msk.bf16.mxu0 %vm9267_vm11, %v6752_v26  ;;  %v4272_v0 = vsel %vm11127_vm4, %v7516_v19, %v7555_v29  ;;  %v6757_v53 = vpack.c.bf16 %v4273_v50, %v4271_v54  ;;  %v3705_v26 = vld [vmem:[#allocation10 + $0x38] sm:$0xff]  ;;  %vm11130_vm10 = vmmov %vm11129_vm1  ;;  %vm11132_vm4 = vcmask 261120  }
 0x357   : > { %v7531_v57 = vunpack.i.h.bf16 %v7529_v3  ;;  %v7530_v28 = vunpack.i.l.bf16 %v7529_v3  ;;  %v6760_v63 = vpack.c.bf16 %v4272_v0, %v4270_v9  ;;  %v7561_v32 = vunpack.i.h.bf16 %v7559_v15  ;;  %vm11131_vm7 = vmmov %vm11129_vm1 }
 0x358   : > { %v7560_v8 = vunpack.i.l.bf16 %v7559_v15 }
 0x359   : > { %v4349_v23 = vsel %vm11010_vm15, %v7530_v28, %v7531_v57  ;;  %6756 = vmatpush1.bf16.msra.mxu0 %v6755_v10  ;;  %v4348_v41 = vsel %vm11010_vm15, %v7541_v2, %v7530_v28 }
 0x35a   : > { %v7544_v12 = vpop.permute.xlu0 %7543  ;;  %v7569_v13 = vpop.permute.xlu1 %7568  ;;  %6759 = vmatprep.subr.msk.bf16.mxu0 %vm9267_vm11, %v6757_v53  ;;  %v6762_v11 = vpack.c.bf16 %v4349_v23, %v4347_v22  ;;  %v6765_v24 = vpack.c.bf16 %v4348_v41, %v4346_v14  ;;  %v1875_v61 = vsel %vm11009_vm2, %v7560_v8, %v7561_v32  ;;  %v3704_v53 = vld [vmem:[#allocation10 + $0x30] sm:$0xff] }
 0x35b   : > { %v7546_v36 = vunpack.i.h.bf16 %v7544_v12  ;;  %v7545_v58 = vunpack.i.l.bf16 %v7544_v12  ;;  %v7570_v37 = vunpack.i.l.bf16 %v7569_v13  ;;  %v7571_v1 = vunpack.i.h.bf16 %v7569_v13 }
 0x35d   : > { %6761 = vmatpush1.bf16.msra.mxu0 %v6760_v63  ;;  %v4351_v17 = vsel %vm11010_vm15, %v7545_v58, %v7546_v36  ;;  %v1874_v5 = vsel %vm11009_vm2, %v7570_v37, %v7560_v8  ;;  %v3707_v8 = vld [vmem:[#allocation10 + $0x48] sm:$0xff]  ;;  %v8282_v37 = vld [vmem:[%s8912_s1] sm:$0xff] }
 0x35e   : > { %v7549_v38 = vpop.permute.xlu0 %7548  ;;  %v9877_v30 = vpop.permute.xlu1 %7578  ;;  %6764 = vmatprep.subr.msk.bf16.mxu0 %vm9290_vm3, %v6762_v11 }
 0x35f   : > { %v7550_v27 = vunpack.i.l.bf16 %v7549_v38  ;;  %v7551_v42 = vunpack.i.h.bf16 %v7549_v38  ;;  %v7581_v3 = vunpack.i.h.bf16 %v9877_v30  ;;  %v7580_v15 = vunpack.i.l.bf16 %v9877_v30 }
 0x360   : > { %4547 = vmatmul.mubr.f32.vlgmr.msra.gmra.mrb[16].mxu0 %v3698_v46 }
 0x361   : > { %6767 = vmatpush1.bf16.msk.msra.mxu0 %vm9223_vm13, %v6765_v24  ;;  %4552 = vmatprep.mubr.f32.mxu0 %v3702_v4  ;;  %v4350_v50 = vsel %vm11010_vm15, %v7550_v27, %v7545_v58  ;;  %v1881_v22 = vsel %vm11009_vm2, %v7580_v15, %v7581_v3  ;;  %v8283_v27 = vld [vmem:[%s8912_s1 + $0x8] sm:$0xff] }
 0x362   : > { %v7564_v29 = vpop.permute.xlu0 %7563  ;;  %v7589_v45 = vpop.permute.xlu1 %7588 }
 0x363   : > { %v7566_v21 = vunpack.i.h.bf16 %v7564_v29  ;;  %v7565_v47 = vunpack.i.l.bf16 %v7564_v29  ;;  %v7591_v19 = vunpack.i.h.bf16 %v7589_v45  ;;  %v7590_v43 = vunpack.i.l.bf16 %v7589_v45 }
 0x364   : > { %4553 = vmatmul.mubr.f32.gmra.mrb[18].mxu0 %v3701_v62  ;;  %v11128_v29 = vmov 0.0   ;;  %v3700_v62 = vld [vmem:[#allocation10 + $0x10] sm:$0xff] }
 0x365   : > { %v4352_v57 = vsel %vm11010_vm15, %v7551_v42, %v7590_v43  ;;  %v4353_v28 = vsel %vm11010_vm15, %v7590_v43, %v7591_v19  ;;  %v1877_v20 = vsel %vm11009_vm2, %v7565_v47, %v7566_v21  ;;  %v1876_v55 = vsel %vm11009_vm2, %v7571_v1, %v7565_v47  ;;  %4558 = vmatprep.mubr.f32.mxu0 %v3705_v26  ;;  %v8284_v47 = vld [vmem:[%s8912_s1 + $0x10] sm:$0xff]  ;;  %v8285_v19 = vld [vmem:[%s8912_s1 + $0x18] sm:$0xff] }
 0x366   : > { %v6771_v54 = vpack.c.bf16 %v4352_v57, %v4350_v50  ;;  %v7574_v10 = vpop.permute.xlu0 %7573  ;;  %v7594_v9 = vpop.permute.xlu1 %7593  ;;  %v6474_v0 = vpack.c.bf16 %v1877_v20, %v1875_v61  ;;  %v6768_v23 = vpack.c.bf16 %v4353_v28, %v4351_v17  ;;  %v6477_v12 = vpack.c.bf16 %v1876_v55, %v1874_v5 }
 0x367   : > { %v7576_v13 = vunpack.i.h.bf16 %v7574_v10  ;;  %v7575_v2 = vunpack.i.l.bf16 %v7574_v10  ;;  %v7596_v38 = vunpack.i.h.bf16 %v7594_v9  ;;  %v7595_v30 = vunpack.i.l.bf16 %v7594_v9 }
 0x368   : > { %6476 = vmatprep.subr.msk.bf16.mxu1 %vm9059_vm5, %v6474_v0  ;;  %6770 = vmatprep.subr.msk.bf16.mxu0 %vm9290_vm3, %v6768_v23  ;;  %v5586_v17 = vadd.f32 %v8283_v27, %v8282_v37  ;;  %v5589_v43 = vadd.f32 %v8285_v19, %v8284_v47  ;;  %v8287_v23 = vld [vmem:[%s8912_s1 + $0x28] sm:$0xff]  ;;  %v3709_v37 = vld [vmem:[#allocation10 + $0x58] sm:$0xff] }
 0x369   : > { %v1879_v63 = vsel %vm11009_vm2, %v7575_v2, %v7576_v13  ;;  %4559 = vmatmul.mubr.f32.gmra.mrb[20].mxu0 %v3704_v53  ;;  %6479 = vmatpush1.bf16.msk.msra.mxu1 %vm9066_vm6, %v6477_v12  ;;  %v1955_v50 = vsel %vm11130_vm10, %v7595_v30, %v7596_v38  ;;  %v8286_v53 = vld [vmem:[%s8912_s1 + $0x20] sm:$0xff] }
 0x36a   : > { %6773 = vmatpush1.bf16.msk.msra.mxu0 %vm9223_vm13, %v6771_v54  ;;  %v7584_v41 = vpop.permute.xlu0 %7583  ;;  %v7604_v11 = vpop.permute.xlu1 %7603  ;;  %4564 = vmatprep.mubr.f32.mxu0 %v3708_v18  ;;  %v6480_v32 = vpack.c.bf16 %v1881_v22, %v1879_v63  ;;  %v3703_v54 = vld [vmem:[#allocation10 + $0x28] sm:$0xff]  ;;  %v5592_v12 = vadd.f32 %v8287_v23, %v8286_v53 }
 0x36b   : > { %v7586_v36 = vunpack.i.h.bf16 %v7584_v41  ;;  %v7585_v58 = vunpack.i.l.bf16 %v7584_v41  ;;  %v7605_v46 = vunpack.i.l.bf16 %v7604_v11  ;;  %v7606_v24 = vunpack.i.h.bf16 %v7604_v11  ;;  %v3706_v41 = vld [vmem:[#allocation10 + $0x40] sm:$0xff] }
 0x36c   : > { %6482 = vmatprep.subr.msk.bf16.mxu1 %vm9059_vm5, %v6480_v32 }
 0x36d   : > { %v1878_v14 = vsel %vm11009_vm2, %v7585_v58, %v7575_v2  ;;  %v1880_v4 = vsel %vm11009_vm2, %v7586_v36, %v7580_v15  ;;  %4565 = vmatmul.mubr.f32.gmra.mrb[22].mxu0 %v3707_v8  ;;  %v1954_v26 = vsel %vm11129_vm1, %v7605_v46, %v7595_v30  ;;  %vm11133_vm2 = vmmov %vm11129_vm1 }
 0x36e   : > { %v7599_v1 = vpop.permute.xlu0 %7598  ;;  %v7614_v42 = vpop.permute.xlu1 %7613  ;;  %4635 = vmatprep.mubr.f32.mxu0 %v11128_v29  ;;  %v6483_v45 = vpack.c.bf16 %v1880_v4, %v1878_v14  ;;  %vm11134_vm1 = vmmov %vm11132_vm4 }
 0x36f   : > { %v7601_v61 = vunpack.i.h.bf16 %v7599_v1  ;;  %v7600_v21 = vunpack.i.l.bf16 %v7599_v1  ;;  %v7616_v15 = vunpack.i.h.bf16 %v7614_v42  ;;  %v7615_v5 = vunpack.i.l.bf16 %v7614_v42  ;;  %vm11135_vm10 = vmmov %vm11133_vm2 }
 0x370   : > { %6485 = vmatpush1.bf16.msk.msra.mxu1 %vm9066_vm6, %v6483_v45 }
 0x371   : > { %v1956_v3 = vsel %vm11131_vm7, %v7606_v24, %v7600_v21  ;;  %6042 = vmatmul.mubr.msk.f32.vlgmr.msra.gmra.mrb[16].mxu0 %vm11132_vm4, %v3700_v62  ;;  %v1957_v57 = vsel %vm11133_vm2, %v7600_v21, %v7601_v61  ;;  %5587 = vadd.xlane.f32.xlu1 %v5586_v17  ;;  %v1961_v2 = vsel %vm11135_vm10, %v7615_v5, %v7616_v15  ;;  %vm11136_vm7 = vmmov %vm11133_vm2 }
 0x372   : > { %v7609_v28 = vpop.permute.xlu0 %7608  ;;  %v7624_v20 = vpop.permute.xlu1 %7623  ;;  %4641 = vmatprep.mubr.f32.mxu0 %v11128_v29  ;;  %v6486_v55 = vpack.c.bf16 %v1957_v57, %v1955_v50  ;;  %v6488_v10 = vpack.c.bf16 %v1956_v3, %v1954_v26  ;;  %vm11137_vm4 = vmmov %vm11133_vm2 }
 0x373   : > { %v7611_v9 = vunpack.i.h.bf16 %v7609_v28  ;;  %v7610_v0 = vunpack.i.l.bf16 %v7609_v28  ;;  %5590 = vadd.xlane.f32.xlu0 %v5589_v43  ;;  %v7626_v8 = vunpack.i.h.bf16 %v7624_v20  ;;  %v7625_v36 = vunpack.i.l.bf16 %v7624_v20 }
 0x374   : > { %6487 = vmatprep.subr.bf16.mxu1 %v6486_v55 }
 0x375   : > { %6043 = vmatmul.mubr.msk.f32.gmra.mrb[18].mxu0 %vm11134_vm1, %v3703_v54  ;;  %6490 = vmatpush1.bf16.msk.msra.mxu1 %vm9088_vm8, %v6488_v10  ;;  %v1959_v13 = vsel %vm11133_vm2, %v7610_v0, %v7611_v9  ;;  %vm11138_vm2 = vcmask 121856  }
 0x376   : > { %v7619_v18 = vpop.permute.xlu0 %7618  ;;  %v7634_v22 = vpop.permute.xlu1 %7633  ;;  %4647 = vmatprep.mubr.f32.mxu0 %v11128_v29  ;;  %v6491_v63 = vpack.c.bf16 %v1961_v2, %v1959_v13  ;;  %v2035_v1 = vsel %vm11138_vm2, %v7625_v36, %v7626_v8  ;;  %vm11139_vm10 = vmmov %vm11138_vm2 }
 0x377   : > { %v7621_v11 = vunpack.i.h.bf16 %v7619_v18  ;;  %v7620_v32 = vunpack.i.l.bf16 %v7619_v18  ;;  %5593 = vadd.xlane.f32.xlu0 %v5592_v12  ;;  %v7635_v58 = vunpack.i.l.bf16 %v7634_v22  ;;  %v7636_v46 = vunpack.i.h.bf16 %v7634_v22 }
 0x378   : > { %6492 = vmatprep.subr.bf16.mxu1 %v6491_v63 }
 0x379   : > { %v1958_v38 = vsel %vm11136_vm7, %v7620_v32, %v7610_v0  ;;  %v1960_v30 = vsel %vm11137_vm4, %v7621_v11, %v7615_v5  ;;  %6044 = vmatmul.mubr.msk.f32.gmra.mrb[20].mxu0 %vm11134_vm1, %v3706_v41  ;;  %v2034_v42 = vsel %vm11139_vm10, %v7635_v58, %v7625_v36  ;;  %vm11140_vm7 = vmmov %vm11138_vm2 }
 0x37a   : > { %v7629_v14 = vpop.permute.xlu0 %7628  ;;  %v7644_v4 = vpop.permute.xlu1 %7643  ;;  %4653 = vmatprep.mubr.f32.mxu0 %v11128_v29  ;;  %v6493_v24 = vpack.c.bf16 %v1960_v30, %v1958_v38  ;;  %vm11141_vm4 = vmmov %vm11138_vm2 }
 0x37b   : > { %v7631_v27 = vunpack.i.h.bf16 %v7629_v14  ;;  %v7630_v17 = vunpack.i.l.bf16 %v7629_v14  ;;  %v7646_v61 = vunpack.i.h.bf16 %v7644_v4  ;;  %v7645_v21 = vunpack.i.l.bf16 %v7644_v4  ;;  %vm11142_vm10 = vmmov %vm11138_vm2 }
 0x37c   : > { %6495 = vmatpush1.bf16.msk.msra.mxu1 %vm9088_vm8, %v6493_v24 }
 0x37d   : > { %v2036_v45 = vsel %vm11140_vm7, %v7636_v46, %v7630_v17  ;;  %v2037_v62 = vsel %vm11141_vm4, %v7630_v17, %v7631_v27  ;;  %6045 = vmatmul.mubr.msk.f32.gmra.mrb[22].mxu0 %vm11134_vm1, %v3709_v37  ;;  %v2041_v15 = vsel %vm11138_vm2, %v7645_v21, %v7646_v61  ;;  %vm11143_vm7 = vmmov %vm11138_vm2  ;;  %vm11145_vm1 = vcmask 7168  }
 0x37e   : > { %v7639_v47 = vpop.permute.xlu0 %7638  ;;  %v7654_v19 = vpop.permute.xlu1 %7653  ;;  %v6496_v43 = vpack.c.bf16 %v2037_v62, %v2035_v1  ;;  %v6499_v26 = vpack.c.bf16 %v2036_v45, %v2034_v42  ;;  %5569 = vmatprep.mubr.f32.mxu0 %v11128_v29  ;;  %vm11144_vm4 = vmmov %vm11138_vm2 }
 0x37f   : > { %v7641_v50 = vunpack.i.h.bf16 %v7639_v47  ;;  %v7640_v3 = vunpack.i.l.bf16 %v7639_v47  ;;  %v7656_v10 = vunpack.i.h.bf16 %v7654_v19  ;;  %v7655_v9 = vunpack.i.l.bf16 %v7654_v19  ;;  %vm11146_vm2 = vmmov %vm11145_vm1 }
 0x380   : > { %6498 = vmatprep.subr.msk.bf16.mxu1 %vm9129_vm12, %v6496_v43  ;;  %vm11148_vm15 = vmmov %vm11145_vm1 }
 0x381   : > { %v2039_v5 = vsel %vm11142_vm10, %v7640_v3, %v7641_v50  ;;  %6501 = vmatpush1.bf16.msk.msra.mxu1 %vm9141_vm14, %v6499_v26  ;;  %v2115_v41 = vsel %vm11145_vm1, %v7655_v9, %v7656_v10  ;;  %vm11147_vm10 = vmmov %vm11145_vm1 }
 0x382   : > { %v7649_v57 = vpop.permute.xlu0 %7648  ;;  %v7664_v28 = vpop.permute.xlu1 %7663  ;;  %v6502_v20 = vpack.c.bf16 %v2041_v15, %v2039_v5 }
 0x383   : > { %v7651_v55 = vunpack.i.h.bf16 %v7649_v57  ;;  %v7650_v54 = vunpack.i.l.bf16 %v7649_v57  ;;  %v7665_v0 = vunpack.i.l.bf16 %v7664_v28  ;;  %v7666_v12 = vunpack.i.h.bf16 %v7664_v28 }
 0x384   : > { %6504 = vmatprep.subr.msk.bf16.mxu1 %vm9129_vm12, %v6502_v20 }
 0x385   : > { %v2038_v53 = vsel %vm11143_vm7, %v7650_v54, %v7640_v3  ;;  %v2040_v23 = vsel %vm11144_vm4, %v7651_v55, %v7645_v21  ;;  %v2114_v11 = vsel %vm11146_vm2, %v7665_v0, %v7655_v9  ;;  %vm11149_vm7 = vmmov %vm11145_vm1  ;;  %v11152_v3 = vpack.c.bf16 %v9418_v40, %v9408_v34 }
 0x386   : > { %v7659_v13 = vpop.permute.xlu0 %7658  ;;  %v6505_v2 = vpack.c.bf16 %v2040_v23, %v2038_v53  ;;  %vm11150_vm4 = vmmov %vm11145_vm1  ;;  %vm11153_vm2 = vcmask 1039360   ;;  %v11154_v9 = vpack.c.bf16 %v9416_v39, %v9406_v33  ;;  %v11155_v34 = vpack.c.bf16 %v9442_v60, %v9430_v49 }
 0x387   : > { %v7661_v18 = vunpack.i.h.bf16 %v7659_v13  ;;  %v7660_v22 = vunpack.i.l.bf16 %v7659_v13  ;;  %v7674_v63 = vpop.permute.xlu1 %7673 }
 0x388   : > { %6507 = vmatpush1.bf16.msk.msra.mxu1 %vm9141_vm14, %v6505_v2  ;;  %v7676_v36 = vunpack.i.h.bf16 %v7674_v63  ;;  %v7675_v58 = vunpack.i.l.bf16 %v7674_v63 }
 0x389   : > { %v2116_v32 = vsel %vm11147_vm10, %v7666_v12, %v7660_v22  ;;  %v2117_v8 = vsel %vm11148_vm15, %v7660_v22, %v7661_v18  ;;  %vm11151_vm15 = vmmov %vm11145_vm1 }
 0x38a   : > { %v7669_v38 = vpop.permute.xlu0 %7668  ;;  %v6508_v30 = vpack.c.bf16 %v2117_v8, %v2115_v41  ;;  %v6511_v46 = vpack.c.bf16 %v2116_v32, %v2114_v11  ;;  %v2121_v37 = vsel %vm11149_vm7, %v7675_v58, %v7676_v36  ;;  %vm11156_vm10 = vmmov %vm11153_vm2  ;;  %v11159_v11 = vpack.c.bf16 %v9440_v59, %v9428_v48 }
 0x38b   : > { %v7671_v14 = vunpack.i.h.bf16 %v7669_v38  ;;  %v7670_v4 = vunpack.i.l.bf16 %v7669_v38  ;;  %v7684_v24 = vpop.permute.xlu1 %7683  ;;  %vm11157_vm7 = vmmov %vm11153_vm2 }
 0x38c   : > { %6510 = vmatprep.subr.msk.bf16.mxu1 %vm9059_vm5, %v6508_v30  ;;  %v7686_v15 = vunpack.i.h.bf16 %v7684_v24  ;;  %v7685_v5 = vunpack.i.l.bf16 %v7684_v24 }
 0x38d   : > { %v2119_v27 = vsel %vm11150_vm4, %v7670_v4, %v7671_v14  ;;  %6513 = vmatpush1.bf16.msk.msra.mxu1 %vm9178_vm0, %v6511_v46  ;;  %vm11158_vm4 = vmmov %vm11153_vm2 }
 0x38e   : > { %v7679_v17 = vpop.permute.xlu0 %7678  ;;  %v6514_v1 = vpack.c.bf16 %v2121_v37, %v2119_v27  ;;  %v2211_v40 = vsel %vm11156_vm10, %v7685_v5, %v7686_v15 }
 0x38f   : > { %v7681_v42 = vunpack.i.h.bf16 %v7679_v17  ;;  %v7680_v45 = vunpack.i.l.bf16 %v7679_v17  ;;  %v7694_v62 = vpop.permute.xlu1 %7693 }
 0x390   : > { %6516 = vmatprep.subr.msk.bf16.mxu1 %vm9059_vm5, %v6514_v1  ;;  %v7696_v54 = vunpack.i.h.bf16 %v7694_v62  ;;  %v7695_v0 = vunpack.i.l.bf16 %v7694_v62 }
 0x391   : > { %v2118_v61 = vsel %vm11151_vm15, %v7680_v45, %v7670_v4  ;;  %v2120_v21 = vsel %vm11145_vm1, %v7681_v42, %v7675_v58  ;;  %vm11160_vm15 = vmmov %vm11153_vm2 }
 0x392   : > { %v7689_v47 = vpop.permute.xlu0 %7688  ;;  %v6517_v19 = vpack.c.bf16 %v2120_v21, %v2118_v61  ;;  %v2210_v49 = vsel %vm11160_vm15, %v7695_v0, %v7685_v5  ;;  %vm11161_vm1 = vmmov %vm11153_vm2 }
 0x393   : > { %v7704_v43 = vpop.permute.xlu1 %7703  ;;  %v7691_v26 = vunpack.i.h.bf16 %v7689_v47  ;;  %v7690_v50 = vunpack.i.l.bf16 %v7689_v47  ;;  %vm11163_vm10 = vmmov %vm11161_vm1 }
 0x394   : > { %6519 = vmatpush1.bf16.msk.msra.mxu1 %vm9178_vm0, %v6517_v19  ;;  %v7706_v53 = vunpack.i.h.bf16 %v7704_v43  ;;  %v7705_v23 = vunpack.i.l.bf16 %v7704_v43 }
 0x395   : > { %6521 = vmatprep.subr.bf16.mxu1 %v11152_v3  ;;  %v2213_v10 = vsel %vm11153_vm2, %v7690_v50, %v7691_v26  ;;  %v2212_v12 = vsel %vm11157_vm7, %v7696_v54, %v7690_v50  ;;  %vm11162_vm2 = vmmov %vm11161_vm1  ;;  %vm11164_vm7 = vcmask 924672  }
 0x396   : > { %v7699_v57 = vpop.permute.xlu0 %7698  ;;  %v6528_v41 = vpack.c.bf16 %v2213_v10, %v2211_v40  ;;  %v2217_v60 = vsel %vm11161_vm1, %v7705_v23, %v7706_v53  ;;  %v6531_v8 = vpack.c.bf16 %v2212_v12, %v2210_v49 }
 0x397   : > { %v7701_v28 = vunpack.i.h.bf16 %v7699_v57  ;;  %v7700_v20 = vunpack.i.l.bf16 %v7699_v57  ;;  %v7714_v55 = vpop.permute.xlu1 %7713 }
 0x398   : > { %6523 = vmatpush1.bf16.msra.mxu1 %v11154_v9  ;;  %v7716_v33 = vunpack.i.h.bf16 %v7714_v55  ;;  %v7715_v39 = vunpack.i.l.bf16 %v7714_v55 }
 0x399   : > { %6525 = vmatprep.subr.bf16.mxu1 %v11155_v34  ;;  %v2215_v2 = vsel %vm11158_vm4, %v7700_v20, %v7701_v28  ;;  %vm11165_vm4 = vmmov %vm11164_vm7 }
 0x39a   : > { %v7709_v13 = vpop.permute.xlu0 %7708  ;;  %v6534_v36 = vpack.c.bf16 %v2217_v60, %v2215_v2  ;;  %v2291_v48 = vsel %vm11164_vm7, %v7715_v39, %v7716_v33  ;;  %vm11166_vm15 = vmmov %vm11165_vm4 }
 0x39b   : > { %v7711_v18 = vunpack.i.h.bf16 %v7709_v13  ;;  %v7710_v22 = vunpack.i.l.bf16 %v7709_v13  ;;  %v7724_v63 = vpop.permute.xlu1 %7723  ;;  %vm11167_vm1 = vmmov %vm11165_vm4 }
 0x39c   : > { %6527 = vmatpush1.bf16.msra.mxu1 %v11159_v11  ;;  %v7726_v59 = vunpack.i.h.bf16 %v7724_v63  ;;  %v7725_v4 = vunpack.i.l.bf16 %v7724_v63  ;;  %vm11170_vm7 = vmmov %vm11167_vm1 }
 0x39d   : > { %6530 = vmatprep.subr.msk.bf16.mxu1 %vm9129_vm12, %v6528_v41  ;;  %v2214_v58 = vsel %vm11162_vm2, %v7710_v22, %v7700_v20  ;;  %v2216_v38 = vsel %vm11163_vm10, %v7711_v18, %v7705_v23  ;;  %vm11168_vm2 = vmmov %vm11167_vm1 }
 0x39e   : > { %v7719_v32 = vpop.permute.xlu0 %7718  ;;  %v6537_v1 = vpack.c.bf16 %v2216_v38, %v2214_v58  ;;  %v2290_v47 = vsel %vm11167_vm1, %v7725_v4, %v7715_v39  ;;  %vm11169_vm10 = vmmov %vm11167_vm1 }
 0x39f   : > { %v7721_v30 = vunpack.i.h.bf16 %v7719_v32  ;;  %v7720_v46 = vunpack.i.l.bf16 %v7719_v32  ;;  %v7734_v14 = vpop.permute.xlu1 %7733 }
 0x3a0   : > { %6533 = vmatpush1.bf16.msk.msra.mxu1 %vm9223_vm13, %v6531_v8  ;;  %v7736_v37 = vunpack.i.h.bf16 %v7734_v14  ;;  %v7735_v27 = vunpack.i.l.bf16 %v7734_v14 }
 0x3a1   : > { %v2293_v24 = vsel %vm11165_vm4, %v7720_v46, %v7721_v30  ;;  %6536 = vmatprep.subr.msk.bf16.mxu1 %vm9129_vm12, %v6534_v36  ;;  %v2292_v45 = vsel %vm11166_vm15, %v7726_v59, %v7720_v46  ;;  %vm11171_vm4 = vmmov %vm11167_vm1  ;;  %vm11172_vm15 = vcmask 916480  }
 0x3a2   : > { %v7729_v17 = vpop.permute.xlu0 %7728  ;;  %v6540_v42 = vpack.c.bf16 %v2293_v24, %v2291_v48  ;;  %v2297_v19 = vsel %vm11168_vm2, %v7735_v27, %v7736_v37  ;;  %v6543_v50 = vpack.c.bf16 %v2292_v45, %v2290_v47  ;;  %vm11173_vm1 = vmmov %vm11172_vm15 }
 0x3a3   : > { %v7731_v62 = vunpack.i.h.bf16 %v7729_v17  ;;  %v7730_v61 = vunpack.i.l.bf16 %v7729_v17  ;;  %v7744_v21 = vpop.permute.xlu1 %7743  ;;  %vm11174_vm2 = vmmov %vm11173_vm1 }
 0x3a4   : > { %6539 = vmatpush1.bf16.msk.msra.mxu1 %vm9223_vm13, %v6537_v1  ;;  %v7746_v28 = vunpack.i.h.bf16 %v7744_v21  ;;  %v7745_v20 = vunpack.i.l.bf16 %v7744_v21  ;;  %v1802_v21 = vld [vmem:[#allocation8] sm:$0xff] }
 0x3a5   : > { %v2295_v43 = vsel %vm11169_vm10, %v7730_v61, %v7731_v62  ;;  %6542 = vmatprep.subr.msk.bf16.mxu1 %vm9242_vm9, %v6540_v42  ;;  %vm11175_vm10 = vmmov %vm11173_vm1 }
 0x3a6   : > { %v7739_v26 = vpop.permute.xlu0 %7738  ;;  %v6546_v3 = vpack.c.bf16 %v2297_v19, %v2295_v43  ;;  %v2371_v12 = vsel %vm11172_vm15, %v7745_v20, %v7746_v28  ;;  %vm11178_vm15 = vmmov %vm11173_vm1 }
 0x3a7   : > { %v7741_v15 = vunpack.i.h.bf16 %v7739_v26  ;;  %v7740_v5 = vunpack.i.l.bf16 %v7739_v26  ;;  %v7754_v57 = vpop.permute.xlu1 %7753 }
 0x3a8   : > { %v7755_v55 = vunpack.i.l.bf16 %v7754_v57  ;;  %6545 = vmatpush1.bf16.msk.msra.mxu1 %vm9178_vm0, %v6543_v50  ;;  %v7756_v53 = vunpack.i.h.bf16 %v7754_v57  ;;  %v1806_v50 = vld [vmem:[#allocation8 + $0x20] sm:$0xff] }
 0x3a9   : > { %v2294_v54 = vsel %vm11170_vm7, %v7740_v5, %v7730_v61  ;;  %v2296_v10 = vsel %vm11171_vm4, %v7741_v15, %v7735_v27  ;;  %6548 = vmatprep.subr.msk.bf16.mxu1 %vm9242_vm9, %v6546_v3  ;;  %vm11176_vm7 = vmmov %vm11173_vm1 }
 0x3aa   : > { %v7749_v9 = vpop.permute.xlu0 %7748  ;;  %v6549_v0 = vpack.c.bf16 %v2296_v10, %v2294_v54  ;;  %v2370_v13 = vsel %vm11173_vm1, %v7755_v55, %v7745_v20  ;;  %vm11177_vm4 = vmmov %vm11173_vm1  ;;  %v1805_v20 = vld [vmem:[#allocation8 + $0x18] sm:$0xff] }
 0x3ab   : > { %v7751_v23 = vunpack.i.h.bf16 %v7749_v9  ;;  %v7750_v34 = vunpack.i.l.bf16 %v7749_v9  ;;  %v7764_v40 = vpop.permute.xlu1 %7763  ;;  %v1809_v10 = vld [vmem:[#allocation8 + $0x38] sm:$0xff] }
 0x3ac   : > { %6551 = vmatpush1.bf16.msk.msra.mxu1 %vm9178_vm0, %v6549_v0  ;;  %v7766_v18 = vunpack.i.h.bf16 %v7764_v40  ;;  %v7765_v22 = vunpack.i.l.bf16 %v7764_v40 }
 0x3ad   : > { %v2373_v2 = vsel %vm11174_vm2, %v7750_v34, %v7751_v23  ;;  %v2372_v63 = vsel %vm11175_vm10, %v7756_v53, %v7750_v34  ;;  %vm11179_vm2 = vcmask 908288   ;;  %v1808_v34 = vld [vmem:[#allocation8 + $0x30] sm:$0xff] }
 0x3ae   : > { %v7759_v41 = vpop.permute.xlu0 %7758  ;;  %v6552_v33 = vpack.c.bf16 %v2373_v2, %v2371_v12  ;;  %v6555_v39 = vpack.c.bf16 %v2372_v63, %v2370_v13  ;;  %v2377_v32 = vsel %vm11176_vm7, %v7765_v22, %v7766_v18  ;;  %vm11180_vm10 = vmmov %vm11179_vm2  ;;  %v1812_v13 = vld [vmem:[#allocation8 + $0x50] sm:$0xff]  ;;  %v1811_v18 = vld [vmem:[#allocation8 + $0x48] sm:$0xff] }
 0x3af   : > { %v7761_v11 = vunpack.i.h.bf16 %v7759_v41  ;;  %v7760_v49 = vunpack.i.l.bf16 %v7759_v41  ;;  %v7774_v60 = vpop.permute.xlu1 %7773  ;;  %vm11181_vm7 = vmmov %vm11179_vm2  ;;  %v1807_v63 = vld [vmem:[#allocation8 + $0x28] sm:$0xff]  ;;  %v1810_v41 = vld [vmem:[#allocation8 + $0x40] sm:$0xff] }
 0x3b0   : > { %6554 = vmatprep.subr.msk.bf16.mxu1 %vm9267_vm11, %v6552_v33  ;;  %v7776_v14 = vunpack.i.h.bf16 %v7774_v60  ;;  %v7775_v48 = vunpack.i.l.bf16 %v7774_v60  ;;  %v1813_v33 = vld [vmem:[#allocation8 + $0x58] sm:$0xff] }
 0x3b1   : > { %v2375_v8 = vsel %vm11177_vm4, %v7760_v49, %v7761_v11  ;;  %6556 = vmatpush1.bf16.msra.mxu1 %v6555_v39  ;;  %vm11182_vm4 = vmmov %vm11179_vm2 }
 0x3b2   : > { %v7769_v36 = vpop.permute.xlu0 %7768  ;;  %v6557_v58 = vpack.c.bf16 %v2377_v32, %v2375_v8  ;;  %v2451_v62 = vsel %vm11179_vm2, %v7775_v48, %v7776_v14 }
 0x3b3   : > { %v7771_v38 = vunpack.i.h.bf16 %v7769_v36  ;;  %v7770_v30 = vunpack.i.l.bf16 %v7769_v36  ;;  %v7784_v46 = vpop.permute.xlu1 %7783 }
 0x3b4   : > { %v7785_v59 = vunpack.i.l.bf16 %v7784_v46  ;;  %6559 = vmatprep.subr.msk.bf16.mxu1 %vm9267_vm11, %v6557_v58  ;;  %v7786_v17 = vunpack.i.h.bf16 %v7784_v46 }
 0x3b5   : > { %v2374_v4 = vsel %vm11178_vm15, %v7770_v30, %v7760_v49  ;;  %v2376_v24 = vsel %vm11173_vm1, %v7771_v38, %v7765_v22  ;;  %vm11183_vm15 = vmmov %vm11179_vm2  ;;  %v1804_v22 = vld [vmem:[#allocation8 + $0x10] sm:$0xff] }
 0x3b6   : > { %v7779_v37 = vpop.permute.xlu0 %7778  ;;  %v6560_v27 = vpack.c.bf16 %v2376_v24, %v2374_v4  ;;  %v2450_v61 = vsel %vm11180_vm10, %v7785_v59, %v7775_v48  ;;  %vm11184_vm1 = vmmov %vm11179_vm2 }
 0x3b7   : > { %v7781_v1 = vunpack.i.h.bf16 %v7779_v37  ;;  %v7780_v42 = vunpack.i.l.bf16 %v7779_v37  ;;  %v7794_v45 = vpop.permute.xlu1 %7793  ;;  %vm11185_vm2 = vmmov %vm11184_vm1 }
 0x3b8   : > { %6561 = vmatpush1.bf16.msra.mxu1 %v6560_v27  ;;  %v7796_v43 = vunpack.i.h.bf16 %v7794_v45  ;;  %v7795_v26 = vunpack.i.l.bf16 %v7794_v45  ;;  %vm11186_vm10 = vmmov %vm11184_vm1 }
 0x3b9   : > { %v2452_v47 = vsel %vm11181_vm7, %v7786_v17, %v7780_v42  ;;  %v2453_v19 = vsel %vm11182_vm4, %v7780_v42, %v7781_v1  ;;  %vm11187_vm7 = vcmask 261120  }
 0x3ba   : > { %v6565_v3 = vpack.c.bf16 %v2452_v47, %v2450_v61  ;;  %v7789_v15 = vpop.permute.xlu0 %7788  ;;  %v6562_v5 = vpack.c.bf16 %v2453_v19, %v2451_v62  ;;  %v2457_v55 = vsel %vm11183_vm15, %v7795_v26, %v7796_v43  ;;  %vm11188_vm4 = vmmov %vm11187_vm7 }
 0x3bb   : > { %v7791_v57 = vunpack.i.h.bf16 %v7789_v15  ;;  %v7790_v28 = vunpack.i.l.bf16 %v7789_v15  ;;  %2651 = vmatmul.mubr.f32.vlgmr.msra.gmra.mrb[0].mxu1 %v1802_v21  ;;  %vm11189_vm15 = vmmov %vm11188_vm4 }
 0x3bc   : > { %6564 = vmatprep.subr.msk.bf16.mxu1 %vm9290_vm3, %v6562_v5  ;;  %2656 = vmatprep.mubr.f32.mxu1 %v1806_v50 }
 0x3bd   : > { %v2455_v54 = vsel %vm11184_vm1, %v7790_v28, %v7791_v57  ;;  %6567 = vmatpush1.bf16.msk.msra.mxu1 %vm9223_vm13, %v6565_v3  ;;  %vm11190_vm1 = vmmov %vm11188_vm4 }
 0x3be   : > { %v7799_v9 = vpop.permute.xlu0 %7798  ;;  %v6568_v0 = vpack.c.bf16 %v2457_v55, %v2455_v54 }
 0x3bf   : > { %v7801_v53 = vunpack.i.h.bf16 %v7799_v9  ;;  %v7800_v23 = vunpack.i.l.bf16 %v7799_v9  ;;  %2657 = vmatmul.mubr.f32.gmra.mrb[2].mxu1 %v1805_v20 }
 0x3c0   : > { %6570 = vmatprep.subr.msk.bf16.mxu1 %vm9290_vm3, %v6568_v0  ;;  %2662 = vmatprep.mubr.f32.mxu1 %v1809_v10 }
 0x3c1   : > { %v2454_v40 = vsel %vm11185_vm2, %v7800_v23, %v7790_v28  ;;  %v2456_v12 = vsel %vm11186_vm10, %v7801_v53, %v7795_v26  ;;  %v1814_v23 = vld [vmem:[%s11191_s4] sm:$0xff]  ;;  %vm11192_vm10 = vmmov %vm11185_vm2 }
 0x3c2   : > { %v6571_v2 = vpack.c.bf16 %v2456_v12, %v2454_v40  ;;  %v1816_v40 = vld [vmem:[%s11191_s4 + $0x10] sm:$0xff]  ;;  %v1817_v12 = vld [vmem:[%s11191_s4 + $0x18] sm:$0xff] }
 0x3c3   : > { %2663 = vmatmul.mubr.f32.gmra.mrb[4].mxu1 %v1808_v34  ;;  %v1815_v34 = vld [vmem:[%s11191_s4 + $0x8] sm:$0xff] }
 0x3c4   : > { %6573 = vmatpush1.bf16.msk.msra.mxu1 %vm9223_vm13, %v6571_v2  ;;  %2668 = vmatprep.mubr.f32.mxu1 %v1812_v13  ;;  %v8288_v13 = vld [vmem:[%s8912_s1 + $0x30] sm:$0xff]  ;;  %v8289_v2 = vld [vmem:[%s8912_s1 + $0x38] sm:$0xff]  ;;  %s11275_s1 = sld [smem:[#allocation35_spill]] }
 0x3c7   : > { %2669 = vmatmul.mubr.f32.gmra.mrb[6].mxu1 %v1811_v18  ;;  %v5595_v18 = vadd.f32 %v8289_v2, %v8288_v13 }
 0x3c8   : > { %2739 = vmatprep.mubr.f32.mxu1 %v11128_v29  ;;  %v4453_v39 = vpop.permute.xlu1 %4452 }
 0x3cb   : > { %6036 = vmatmul.mubr.msk.f32.vlgmr.msra.gmra.mrb[0].mxu1 %vm11187_vm7, %v1804_v22  ;;  %vm11193_vm7 = vmmov %vm11185_vm2 }
 0x3cc   : > { %2745 = vmatprep.mubr.f32.mxu1 %v11128_v29  ;;  %v4463_v24 = vpop.permute.xlu1 %4462 }
 0x3cf   : > { %6037 = vmatmul.mubr.msk.f32.gmra.mrb[2].mxu1 %vm11188_vm4, %v1807_v63  ;;  %v4458_v36 = vpop.permute.xlu0 %4457  ;;  %vm11194_vm4 = vmmov %vm11185_vm2 }
 0x3d0   : > { %2751 = vmatprep.mubr.f32.mxu1 %v11128_v29 }
 0x3d3   : > { %6038 = vmatmul.mubr.msk.f32.gmra.mrb[4].mxu1 %vm11189_vm15, %v1810_v41  ;;  %v4468_v21 = vpop.permute.xlu0 %4467  ;;  %vm11195_vm15 = vmmov %vm11185_vm2 }
 0x3d4   : > { %2757 = vmatprep.mubr.f32.mxu1 %v11128_v29 }
 0x3d7   : > { %6039 = vmatmul.mubr.msk.f32.gmra.mrb[6].mxu1 %vm11190_vm1, %v1813_v33  ;;  %vm11196_vm1 = vmmov %vm11185_vm2 }
 0x444   : > { %v4637_v11 = vpop.f32.mrb[16].mxu0 }
 0x445   : > { %v6914_v49 = vadd.f32 %v4637_v11, %v4453_v39  ;;  %v4639_v60 = vpop.f32.mrb[17].mxu0 }
 0x446   : > { %v6915_v32 = vadd.f32 %v4639_v60, %v4453_v39 }
 0x447   : > { %v10049_v8 = vmax.f32 %v6914_v49, 0.0 }
 0x448   : > { %v10051_v58 = vmax.f32 %v6915_v32, 0.0  ;;  %v4643_v38 = vpop.f32.mrb[18].mxu0  ;;  %v10155_v32 = vpop.xlane.xlu0 %5590 }
 0x449   : > { %v6916_v30 = vadd.f32 %v4643_v38, %v4458_v36  ;;  %v4645_v46 = vpop.f32.mrb[19].mxu0 }
 0x44a   : > { %v6917_v14 = vadd.f32 %v4645_v46, %v4458_v36  ;;  %v10055_v48 = vpack.i.bf16 %v11128_v29, %v10051_v58  ;;  %v10059_v59 = vpack.i.bf16 %v10051_v58, %v10049_v8  ;;  %v10157_v36 = vpop.xlane.xlu1 %5587 }
 0x44b   : > { %v10061_v4 = vmax.f32 %v6916_v30, 0.0 }
 0x44c   : > { %v10063_v37 = vmax.f32 %v6917_v14, 0.0  ;;  %v4649_v27 = vpop.f32.mrb[20].mxu0  ;;  %7803 = vrot.lane.b32.xlu1 %v10055_v48, %s11089_s8  ;;  %v10159_v38 = vpop.xlane.xlu0 %5593 }
 0x44d   : > { %v6918_v17 = vadd.f32 %v4649_v27, %v4463_v24  ;;  %v4651_v1 = vpop.f32.mrb[21].mxu0  ;;  %v10069_v42 = vpack.i.bf16 %v10061_v4, %v10049_v8  ;;  %v5601_v0 = vmul.f32 0.00390625, %v10159_v38 }
 0x44e   : > { %v6919_v45 = vadd.f32 %v4651_v1, %v4463_v24  ;;  %v10073_v62 = vpack.i.bf16 %v10063_v37, %v10061_v4  ;;  %v10083_v50 = vpack.i.bf16 %v11128_v29, %v10063_v37 }
 0x44f   : > { %v10075_v61 = vmax.f32 %v6918_v17, 0.0  ;;  %7808 = vrot.lane.b32.xlu0 %v10069_v42, %s11089_s8 }
 0x450   : > { %v10079_v47 = vmax.f32 %v6919_v45, 0.0  ;;  %v4655_v19 = vpop.f32.mrb[22].mxu0 }
 0x451   : > { %v6920_v43 = vadd.f32 %v4655_v19, %v4468_v21  ;;  %v4657_v26 = vpop.f32.mrb[23].mxu0 }
 0x452   : > { %v6921_v5 = vadd.f32 %v4657_v26, %v4468_v21  ;;  %v10091_v57 = vpack.i.bf16 %v10079_v47, %v10075_v61  ;;  %v10101_v55 = vpack.i.bf16 %v11128_v29, %v10079_v47 }
 0x453   : > { %v10093_v28 = vmax.f32 %v6920_v43, 0.0  ;;  %7813 = vrot.lane.b32.xlu0 %v10083_v50, %s11089_s8 }
 0x454   : > { %v10097_v20 = vmax.f32 %v6921_v5, 0.0 }
 0x455   : > { %v10105_v54 = vpack.i.bf16 %v10093_v28, %v10075_v61 }
 0x456   : > { %v10109_v10 = vpack.i.bf16 %v10097_v20, %v10093_v28  ;;  %v10119_v53 = vpack.i.bf16 %v11128_v29, %v10097_v20 }
 0x457   : > { %7818 = vrot.lane.b32.xlu0 %v10101_v55, %s11089_s8 }
 0x45b   : > { %7823 = vrot.lane.b32.xlu0 %v10119_v53, %s11089_s8 }
 0x45f   : > { %7828 = vrot.lane.b32.xlu0 %v10105_v54, %s11089_s8 }
 0x463   : > { %2556 = vperm.xlu0 %7320, %v1814_v23  }
 0x467   : > { %2561 = vperm.xlu0 %7320, %v1815_v34  }
 0x46b   : > { %2566 = vperm.xlu0 %7320, %v1816_v40  }
 0x46f   : > { %2571 = vperm.xlu0 %7320, %v1817_v12  }
 0x470   : > { %5596 = vadd.xlane.f32.xlu1 %v5595_v18 }
 0x49e   : > { %v10139_v22 = vpop.f32.mrb[0].mxu1 }
 0x49f   : > { %v10141_v63 = vpop.f32.mrb[1].mxu1 }
 0x4a2   : > { %v10143_v41 = vpop.f32.mrb[2].mxu1 }
 0x4a3   : > { %v10145_v33 = vpop.f32.mrb[3].mxu1 }
 0x4a6   : > { %v10147_v39 = vpop.f32.mrb[4].mxu1 }
 0x4a7   : > { %v10149_v11 = vpop.f32.mrb[5].mxu1 }
 0x4aa   : > { %v10151_v49 = vpop.f32.mrb[6].mxu1 }
 0x4ab   : > { %v10153_v60 = vpop.f32.mrb[7].mxu1 }
 0x4be   : > { %v7804_v30 = vpop.permute.xlu1 %7803 }
 0x4bf   : > { %v7806_v14 = vunpack.i.h.bf16 %v7804_v30  ;;  %v7805_v24 = vunpack.i.l.bf16 %v7804_v30 }
 0x4c1   : > { %v7809_v46 = vpop.permute.xlu0 %7808  ;;  %v5301_v19 = vsel %vm11185_vm2, %v7805_v24, %v7806_v14  ;;  %vm11197_vm2 = vmmov %vm11196_vm1 }
 0x4c2   : > { %v7810_v27 = vunpack.i.l.bf16 %v7809_v46  ;;  %v7811_v1 = vunpack.i.h.bf16 %v7809_v46 }
 0x4c4   : > { %v5300_v43 = vsel %vm11192_vm10, %v7810_v27, %v7805_v24  ;;  %vm11198_vm10 = vmmov %vm11196_vm1 }
 0x4c5   : > { %v7814_v17 = vpop.permute.xlu0 %7813 }
 0x4c6   : > { %v7816_v45 = vunpack.i.h.bf16 %v7814_v17  ;;  %v7815_v21 = vunpack.i.l.bf16 %v7814_v17 }
 0x4c8   : > { %v5302_v26 = vsel %vm11193_vm7, %v7811_v1, %v7815_v21  ;;  %v5303_v5 = vsel %vm11194_vm4, %v7815_v21, %v7816_v45  ;;  %vm11199_vm7 = vcmask 261120  }
 0x4c9   : > { %v6865_v23 = vpack.c.bf16 %v5302_v26, %v5300_v43  ;;  %v7819_v34 = vpop.permute.xlu0 %7818  ;;  %v6862_v40 = vpack.c.bf16 %v5303_v5, %v5301_v19  ;;  %v5603_v19 = vld [vmem:[%s10963_s11] sm:$0xff]  ;;  %v5604_v43 = vld [vmem:[%s10963_s11 + $0x8] sm:$0xff]  ;;  %vm11200_vm4 = vmmov %vm11199_vm7 }
 0x4ca   : > { %v7821_v12 = vunpack.i.h.bf16 %v7819_v34  ;;  %v7820_v13 = vunpack.i.l.bf16 %v7819_v34  ;;  %v5406_v5 = vld [vmem:[#allocation13 + $0x10] sm:$0xff]  ;;  %v8587_v34 = vmov 0.0|0.0  }
 0x4cb   : > { %6864 = vmatprep.subr.msk.bf16.mxu0 %vm9290_vm3, %v6862_v40  ;;  %v5605_v40 = vld [vmem:[%s10963_s11 + $0x10] sm:$0xff] }
 0x4cc   : > { %6867 = vmatpush1.bf16.msk.msra.mxu0 %vm9223_vm13, %v6865_v23  ;;  %v5305_v46 = vsel %vm11195_vm15, %v7820_v13, %v7821_v12  ;;  %v6875_v23 = vpack.c.bf16 %v5604_v43, %v5603_v19  ;;  %v5606_v12 = vld [vmem:[%s10963_s11 + $0x18] sm:$0xff]  ;;  %vm8588_vm15 = vmmov 0  }
 0x4cd   : > { %v7824_v2 = vpop.permute.xlu0 %7823 }
 0x4ce   : > { %v7826_v18 = vunpack.i.h.bf16 %v7824_v2  ;;  %v7825_v30 = vunpack.i.l.bf16 %v7824_v2  ;;  %v6878_v2 = vpack.c.bf16 %v5606_v12, %v5605_v40  ;;  %v11201_v12 = vlaneseq }
 0x4d0   : > { %v5307_v14 = vsel %vm11196_vm1, %v7825_v30, %v7826_v18  ;;  %vm5621_vm1 = vcmask 130112  }
 0x4d1   : > { %v7829_v24 = vpop.permute.xlu0 %7828  ;;  %v6868_v27 = vpack.c.bf16 %v5307_v14, %v5305_v46 }
 0x4d2   : > { %v7831_v17 = vunpack.i.h.bf16 %v7829_v24  ;;  %v7830_v1 = vunpack.i.l.bf16 %v7829_v24 }
 0x4d3   : > { %6870 = vmatprep.subr.msk.bf16.mxu0 %vm9290_vm3, %v6868_v27 }
 0x4d4   : > { %v5304_v45 = vsel %vm11197_vm2, %v7830_v1, %v7820_v13  ;;  %v5306_v21 = vsel %vm11198_vm10, %v7831_v17, %v7825_v30  ;;  %v5409_v13 = vld [vmem:[#allocation13 + $0x28] sm:$0xff]  ;;  %vm5628_vm2 = vcmask 195712   ;;  %vm5635_vm10 = vcmask 261312  }
 0x4d5   : > { %v6871_v26 = vpack.c.bf16 %v5306_v21, %v5304_v45 }
 0x4d7   : > { %6873 = vmatpush1.bf16.msk.msra.mxu0 %vm9223_vm13, %v6871_v26 }
 0x4d8   : > { %6874 = vmatprep.subr.bf16.mxu0 %v8587_v34 }
 0x4da   : > { %6046 = vmatmul.mubr.msk.f32.vlgmr.msra.gmra.mrb[24].mxu0 %vm11199_vm7, %v5406_v5  ;;  %vm11203_vm7 = vmmov %vm11200_vm4 }
 0x4db   : > { %6876 = vmatpush3.bf16.msra.mxu0 %v6875_v23  ;;  %5575 = vmatprep.mubr.f32.mxu0 %v11128_v29 }
 0x4dc   : > { %6877 = vmatprep.subr.bf16.mxu0 %v8587_v34 }
 0x4de   : > { %6047 = vmatmul.mubr.msk.f32.gmra.mrb[26].mxu0 %vm11200_vm4, %v5409_v13  ;;  %v5613_v13 = vshrl.u32 %v11201_v12, 7  ;;  %vm11205_vm4 = vcmask 138240  }
 0x4df   : > { %6879 = vmatpush3.bf16.msra.mxu0 %v6878_v2  ;;  %6360 = vmatprep.mubr.msk.f32.mxu0 %vm8588_vm15, %v11128_v29  ;;  %v11202_v2 = vld [vmem:[#allocation25_spill] sm:$0xff] }
 0x4e0   : > { %6880 = vmatprep.subr.bf16.mxu0 %v8587_v34  ;;  %v5630_v12 = vadd.s32 4294967272, %v11202_v2 }
 0x4e2   : > { %v2557_v18 = vpop.permute.xlu0 %2556 }
 0x4e3   : > { %v6902_v30 = vadd.f32 %v10139_v22, %v2557_v18  ;;  %v6903_v46 = vadd.f32 %v10141_v63, %v2557_v18  ;;  %v5616_v18 = vadd.s32 4294967288, %v11202_v2 }
 0x4e5   : > { %v10199_v14 = vmax.f32 %v6902_v30, 0.0  ;;  %v10201_v24 = vmax.f32 %v6903_v46, 0.0 }
 0x4e6   : > { %v2562_v27 = vpop.permute.xlu0 %2561 }
 0x4e7   : > { %v6904_v17 = vadd.f32 %v10143_v41, %v2562_v27  ;;  %v6905_v1 = vadd.f32 %v10145_v33, %v2562_v27  ;;  %v10207_v45 = vpack.i.bf16 %v10201_v24, %v10199_v14 }
 0x4e9   : > { %v10209_v21 = vmax.f32 %v6904_v17, 0.0  ;;  %v10211_v19 = vmax.f32 %v6905_v1, 0.0  ;;  %7833 = vrot.lane.b32.xlu1 %v10207_v45, %s11083_s21  ;;  %v5619_v17 = vsub.s32 %v5616_v18, %v5613_v13  ;;  %v5614_v1 = vsub.s32 %v11202_v2, %v5613_v13 }
 0x4ea   : > { %v2567_v22 = vpop.permute.xlu0 %2566 }
 0x4eb   : > { %v6906_v63 = vadd.f32 %v10147_v39, %v2567_v22  ;;  %v6907_v43 = vadd.f32 %v10149_v11, %v2567_v22  ;;  %v7837_v41 = vpack.i.bf16 %v10211_v19, %v10209_v21  ;;  %v10228_v5 = vpack.i.bf16 %v10209_v21, %v10199_v14 }
 0x4ed   : > { %v10219_v33 = vmax.f32 %v6906_v63, 0.0  ;;  %v10221_v26 = vmax.f32 %v6907_v43, 0.0  ;;  %7838 = vrot.lane.b32.xlu0 %v7837_v41, %s11083_s21  ;;  %7858 = vrot.lane.b32.xlu1 %v11128_v29, %s11083_s21  ;;  %v5623_v63 = vadd.s32 4294967280, %v11202_v2  ;;  %v5600_v43 = vmul.f32 0.00390625, %v10155_v32 }
 0x4ee   : > { %v2572_v23 = vpop.permute.xlu0 %2571 }
 0x4ef   : > { %v6908_v39 = vadd.f32 %v10151_v49, %v2572_v23  ;;  %v6909_v11 = vadd.f32 %v10153_v60, %v2572_v23  ;;  %v7847_v40 = vpack.i.bf16 %v10221_v26, %v10219_v33  ;;  %v6620_v49 = vpack.c.bf16 %v10211_v19, %v10201_v24 }
 0x4f0   : > { %v6622_v60 = vpack.c.bf16 %v10209_v21, %v10199_v14  ;;  %v5599_v23 = vmul.f32 0.00390625, %v10157_v36  ;;  %v5626_v18 = vsub.s32 %v5623_v63, %v5613_v13  ;;  %v5620_v9 = vrot.slane %v5600_v43, %v5619_v17 }
 0x4f1   : > { %v10236_v30 = vmax.f32 %v6908_v39, 0.0  ;;  %v10238_v46 = vmax.f32 %v6909_v11, 0.0  ;;  %7843 = vrot.lane.b32.xlu0 %v11128_v29, %s11083_s21  ;;  %7868 = vrot.lane.b32.xlu1 %v7837_v41, %s11084_s20  ;;  %v5633_v36 = vsub.s32 %v5630_v12, %v5613_v13 }
 0x4f2   : > { %v5615_v32 = vrot.slane %v5599_v23, %v5614_v1  ;;  %v5627_v15 = vrot.slane %v5601_v0, %v5626_v18  ;;  %v5713_v1 = vld [vmem:[%s10965_s13 + $0x18] sm:$0xff] }
 0x4f3   : > { %v7852_v27 = vpack.i.bf16 %v10238_v46, %v10236_v30  ;;  %v10252_v22 = vpack.i.bf16 %v10236_v30, %v10219_v33  ;;  %v6624_v39 = vpack.c.bf16 %v10238_v46, %v10221_v26  ;;  %v7972_v0 = vpack.i.bf16 %v11128_v29, %v10238_v46 }
 0x4f4   : > { %v5622_v2 = vsel %vm5621_vm1, %v5620_v9, %v5615_v32  ;;  %v7952_v9 = vpack.i.bf16 %v11128_v29, %v10201_v24  ;;  %vm11207_vm1 = vmmov %vm11205_vm4 }
 0x4f5   : > { %7848 = vrot.lane.b32.xlu0 %v7847_v40, %s11083_s21  ;;  %7878 = vrot.lane.b32.xlu1 %v7847_v40, %s11084_s20  ;;  %v5629_v11 = vsel %vm5628_vm2, %v5627_v15, %v5622_v2  ;;  %v7967_v15 = vpack.i.bf16 %v11128_v29, %v10221_v26  ;;  %vm11208_vm2 = vmmov %vm11207_vm1 }
 0x4f9   : > { %7853 = vrot.lane.b32.xlu0 %v7852_v27, %s11083_s21  ;;  %7888 = vrot.lane.b32.xlu1 %v11128_v29, %s11084_s20 }
 0x4fd   : > { %v5597_v3 = vpop.xlane.xlu1 %5596  ;;  %7863 = vrot.lane.b32.xlu0 %v10207_v45, %s11084_s20  ;;  %7898 = vrot.lane.b32.xlu1 %v7837_v41, %s11085_s16 }
 0x4fe   : > { %v5602_v63 = vmul.f32 0.00390625, %v5597_v3  ;;  %v7957_v3 = vpack.i.bf16 %v11128_v29, %v10211_v19 }
 0x500   : > { %v5634_v38 = vrot.slane %v5602_v63, %v5633_v36 }
 0x501   : > { %7873 = vrot.lane.b32.xlu0 %v11128_v29, %s11084_s20  ;;  %7908 = vrot.lane.b32.xlu1 %v7847_v40, %s11085_s16 }
 0x502   : > { %v5636_v17 = vsel %vm5635_vm10, %v5634_v38, %v5629_v11  ;;  %vm11209_vm10 = vmmov %vm11207_vm1 }
 0x503   : > { %6361 = vmatmul.mubr.msk.f32.vlgmr.msra.gmra.mrb[28].mxu0 %vm11203_vm7, %v5636_v17  ;;  %vm11210_vm7 = vmmov %vm11207_vm1 }
 0x504   : > { %6371 = vmatprep.mubr.msk.f32.mxu0 %vm8588_vm15, %v11128_v29  ;;  %vm11206_vm15 = vmmov %vm11205_vm4 }
 0x505   : > { %7883 = vrot.lane.b32.xlu0 %v7852_v27, %s11084_s20  ;;  %7918 = vrot.lane.b32.xlu1 %v11128_v29, %s11085_s16 }
 0x509   : > { %7893 = vrot.lane.b32.xlu0 %v10207_v45, %s11085_s16  ;;  %7928 = vrot.lane.b32.xlu1 %v7837_v41, %s11204_s12  ;;  %v5710_v41 = vld [vmem:[%s10965_s13] sm:$0xff] }
 0x50d   : > { %7903 = vrot.lane.b32.xlu0 %v11128_v29, %s11085_s16  ;;  %7938 = vrot.lane.b32.xlu1 %v7847_v40, %s11204_s12 }
 0x511   : > { %7913 = vrot.lane.b32.xlu0 %v7852_v27, %s11085_s16  ;;  %7948 = vrot.lane.b32.xlu1 %v11128_v29, %s11204_s12 }
 0x515   : > { %7923 = vrot.lane.b32.xlu0 %v10207_v45, %s11204_s12  ;;  %7958 = vrot.lane.b32.xlu1 %v7957_v3, %s11086_s22  ;;  %v3509_v45 = vld [vmem:[#allocation11 + $0x8] sm:$0xff] }
 0x516   : > { %3596 = vmatprep.mubr.f32.mxu1 %v3509_v45 }
 0x519   : > { %7933 = vrot.lane.b32.xlu0 %v11128_v29, %s11204_s12  ;;  %7968 = vrot.lane.b32.xlu1 %v7967_v15, %s11086_s22 }
 0x51d   : > { %7943 = vrot.lane.b32.xlu0 %v7852_v27, %s11204_s12  ;;  %7978 = vrot.lane.b32.xlu1 %v10252_v22, %s11086_s22  ;;  %v5712_v27 = vld [vmem:[%s10965_s13 + $0x10] sm:$0xff] }
 0x521   : > { %7953 = vrot.lane.b32.xlu0 %v7952_v9, %s11086_s22  ;;  %7988 = vrot.lane.b32.xlu1 %v7957_v3, %s11087_s0 }
 0x525   : > { %7963 = vrot.lane.b32.xlu0 %v10228_v5, %s11086_s22  ;;  %7998 = vrot.lane.b32.xlu1 %v7967_v15, %s11087_s0 }
 0x529   : > { %7973 = vrot.lane.b32.xlu0 %v7972_v0, %s11086_s22  ;;  %8008 = vrot.lane.b32.xlu1 %v10252_v22, %s11087_s0 }
 0x52d   : > { %7983 = vrot.lane.b32.xlu0 %v7952_v9, %s11087_s0  ;;  %8018 = vrot.lane.b32.xlu1 %v7957_v3, %s11088_s18 }
 0x531   : > { %7993 = vrot.lane.b32.xlu0 %v10228_v5, %s11087_s0  ;;  %8028 = vrot.lane.b32.xlu1 %v7967_v15, %s11088_s18 }
 0x535   : > { %8003 = vrot.lane.b32.xlu0 %v7972_v0, %s11087_s0  ;;  %8038 = vrot.lane.b32.xlu1 %v10252_v22, %s11088_s18 }
 0x539   : > { %8013 = vrot.lane.b32.xlu0 %v7952_v9, %s11088_s18  ;;  %8048 = vrot.lane.b32.xlu1 %v7957_v3, %s11089_s8 }
 0x53d   : > { %8023 = vrot.lane.b32.xlu0 %v10228_v5, %s11088_s18  ;;  %8058 = vrot.lane.b32.xlu1 %v7967_v15, %s11089_s8 }
 0x541   : > { %8033 = vrot.lane.b32.xlu0 %v7972_v0, %s11088_s18  ;;  %8068 = vrot.lane.b32.xlu1 %v10252_v22, %s11089_s8  ;;  %v6884_v22 = vpack.c.bf16 %v5713_v1, %v5712_v27 }
 0x545   : > { %8043 = vrot.lane.b32.xlu0 %v7952_v9, %s11089_s8  ;;  %8078 = vrot.lane.b32.xlu1 %v10073_v62, %s11083_s21 }
 0x549   : > { %8053 = vrot.lane.b32.xlu0 %v10228_v5, %s11089_s8  ;;  %8088 = vrot.lane.b32.xlu1 %v10091_v57, %s11083_s21  ;;  %v5711_v5 = vld [vmem:[%s10965_s13 + $0x8] sm:$0xff] }
 0x54a   : > { %v6881_v40 = vpack.c.bf16 %v5711_v5, %v5710_v41 }
 0x54c   : > { %6882 = vmatpush3.bf16.msra.mxu0 %v6881_v40 }
 0x54d   : > { %8063 = vrot.lane.b32.xlu0 %v7972_v0, %s11089_s8  ;;  %8093 = vrot.lane.b32.xlu1 %v11128_v29, %s11083_s21 }
 0x54e   : > { %6883 = vmatprep.subr.bf16.mxu0 %v8587_v34 }
 0x550   : > { %6885 = vmatpush3.bf16.msra.mxu0 %v6884_v22 }
 0x551   : > { %8073 = vrot.lane.b32.xlu0 %v10059_v59, %s11083_s21  ;;  %8103 = vrot.lane.b32.xlu1 %v10073_v62, %s11084_s20 }
 0x555   : > { %8083 = vrot.lane.b32.xlu0 %v11128_v29, %s11083_s21  ;;  %8113 = vrot.lane.b32.xlu1 %v10091_v57, %s11084_s20 }
 0x559   : > { %8098 = vrot.lane.b32.xlu0 %v10059_v59, %s11084_s20  ;;  %8118 = vrot.lane.b32.xlu1 %v11128_v29, %s11084_s20 }
 0x55b   : > { %v7834_v13 = vpop.permute.xlu1 %7833 }
 0x55c   : > { %v7836_v43 = vunpack.i.h.bf16 %v7834_v13  ;;  %v7835_v23 = vunpack.i.l.bf16 %v7834_v13 }
 0x55d   : > { %8108 = vrot.lane.b32.xlu0 %v11128_v29, %s11084_s20  ;;  %8128 = vrot.lane.b32.xlu1 %v10073_v62, %s11085_s16 }
 0x55e   : > { %v2829_v32 = vsel %vm11205_vm4, %v7835_v23, %v7836_v43  ;;  %vm11211_vm4 = vmmov %vm11207_vm1 }
 0x55f   : > { %v7839_v11 = vpop.permute.xlu0 %7838  ;;  %v7859_v34 = vpop.permute.xlu1 %7858 }
 0x560   : > { %v7841_v12 = vunpack.i.h.bf16 %v7839_v11  ;;  %v7840_v18 = vunpack.i.l.bf16 %v7839_v11  ;;  %v7861_v5 = vunpack.i.h.bf16 %v7859_v34  ;;  %v7860_v40 = vunpack.i.l.bf16 %v7859_v34 }
 0x561   : > { %8123 = vrot.lane.b32.xlu0 %v10059_v59, %s11085_s16  ;;  %8138 = vrot.lane.b32.xlu1 %v10091_v57, %s11085_s16 }
 0x562   : > { %v2831_v36 = vsel %vm11206_vm15, %v7840_v18, %v7841_v12  ;;  %vm11212_vm15 = vmmov %vm11207_vm1 }
 0x563   : > { %v6574_v2 = vpack.c.bf16 %v2831_v36, %v2829_v32  ;;  %v7844_v63 = vpop.permute.xlu0 %7843  ;;  %v7869_v38 = vpop.permute.xlu1 %7868 }
 0x564   : > { %v7846_v17 = vunpack.i.h.bf16 %v7844_v63  ;;  %v7845_v3 = vunpack.i.l.bf16 %v7844_v63  ;;  %v7871_v11 = vunpack.i.h.bf16 %v7869_v38  ;;  %v7870_v12 = vunpack.i.l.bf16 %v7869_v38 }
 0x565   : > { %8133 = vrot.lane.b32.xlu0 %v11128_v29, %s11085_s16  ;;  %8143 = vrot.lane.b32.xlu1 %v11128_v29, %s11085_s16 }
 0x566   : > { %v2828_v15 = vsel %vm11207_vm1, %v7845_v3, %v7835_v23  ;;  %v2830_v9 = vsel %vm11208_vm2, %v7846_v17, %v7840_v18  ;;  %6576 = vmatprep.subr.msk.bf16.mxu1 %vm9059_vm5, %v6574_v2  ;;  %vm11213_vm1 = vcmask 130048  }
 0x567   : > { %v6577_v0 = vpack.c.bf16 %v2830_v9, %v2828_v15  ;;  %v7849_v45 = vpop.permute.xlu0 %7848  ;;  %v7879_v41 = vpop.permute.xlu1 %7878  ;;  %vm11214_vm2 = vmmov %vm11213_vm1 }
 0x568   : > { %v7851_v13 = vunpack.i.h.bf16 %v7849_v45  ;;  %v7850_v27 = vunpack.i.l.bf16 %v7849_v45 }
 0x569   : > { %8148 = vrot.lane.b32.xlu0 %v10109_v10, %s11083_s21  ;;  %8158 = vrot.lane.b32.xlu1 %v10073_v62, %s11204_s12  ;;  %s5813_s21 = sshll.u32 %s628_s19, 4  ;;  %s10817_s21 = int_to_ptr.vmem [resolvable:$true] %s5813_s21 }
 0x56a   : > { %6579 = vmatpush1.bf16.msk.msra.mxu1 %vm9066_vm6, %v6577_v0  ;;  %v2832_v62 = vsel %vm11209_vm10, %v7860_v40, %v7850_v27  ;;  %v2833_v34 = vsel %vm11210_vm7, %v7850_v27, %v7851_v13  ;;  %v7881_v40 = vunpack.i.h.bf16 %v7879_v41  ;;  %v7880_v13 = vunpack.i.l.bf16 %v7879_v41  ;;  %vm11215_vm10 = vmmov %vm11213_vm1  ;;  %s8432_s8 = scalar_lea.vmem %s10817_s21, 512  ;;  %p8439_p12 = scmp.lt.s32.totalorder %s10817_s21, %s8437_s6 }
 0x56b   : > { %v7854_v1 = vpop.permute.xlu0 %7853  ;;  %v7889_v22 = vpop.permute.xlu1 %7888  ;;  %vm11216_vm7 = vmmov %vm11213_vm1  ;;  %p8433_p3 = scmp.ne.s32.totalorder %s10817_s21, %s8432_s8 }
 0x56c   : > { %v7856_v43 = vunpack.i.h.bf16 %v7854_v1  ;;  %v7855_v23 = vunpack.i.l.bf16 %v7854_v1  ;;  %v7890_v27 = vunpack.i.l.bf16 %v7889_v22  ;;  %v7891_v1 = vunpack.i.h.bf16 %v7889_v22 }
 0x56d   : > { %8153 = vrot.lane.b32.xlu0 %v10059_v59, %s11204_s12  ;;  %8173 = vrot.lane.b32.xlu1 %v10091_v57, %s11204_s12  ;;  %v2911_v57 = vsel %vm11214_vm2, %v7870_v12, %v7871_v11  ;;  %vm11219_vm2 = vmmov %vm11213_vm1  ;;  %p8434_p5 = pnand %p8433_p3, %p8856_p10 }
 0x56e   : > { %v2834_v18 = vsel %vm11211_vm4, %v7861_v5, %v7855_v23  ;;  %v2835_v32 = vsel %vm11212_vm15, %v7855_v23, %v7856_v43  ;;  %vm11217_vm4 = vmmov %vm11213_vm1 }
 0x56f   : > { %v6580_v36 = vpack.c.bf16 %v2835_v32, %v2833_v34  ;;  %v6583_v2 = vpack.c.bf16 %v2834_v18, %v2832_v62  ;;  %v7864_v63 = vpop.permute.xlu0 %7863  ;;  %v10397_v17 = vpop.permute.xlu1 %7898  ;;  %v2912_v41 = vsel %vm11217_vm4, %v7890_v27, %v7880_v13  ;;  %vm11218_vm15 = vmmov %vm11213_vm1  ;;  %p8435_p7 = pneg %p8434_p5 }
 0x570   : > { %v7866_v38 = vunpack.i.h.bf16 %v7864_v63  ;;  %v7865_v3 = vunpack.i.l.bf16 %v7864_v63  ;;  %v2913_v22 = vsel %vm11218_vm15, %v7880_v13, %v7881_v40 }
 0x571   : > { %8163 = vrot.lane.b32.xlu0 %v10109_v10, %s11084_s20  ;;  %8178 = vrot.lane.b32.xlu1 %v11128_v29, %s11204_s12 }
 0x572   : > { %6582 = vmatprep.subr.msk.bf16.mxu1 %vm9059_vm5, %v6580_v36  ;;  %v2909_v59 = vsel %vm11213_vm1, %v7865_v3, %v7866_v38  ;;  %v7901_v36 = vunpack.i.h.bf16 %v10397_v17 }
 0x573   : > { %6585 = vmatpush1.bf16.msk.msra.mxu1 %vm9066_vm6, %v6583_v2  ;;  %v7874_v15 = vpop.permute.xlu0 %7873  ;;  %v7909_v9 = vpop.permute.xlu1 %7908  ;;  %v6586_v0 = vpack.c.bf16 %v2911_v57, %v2909_v59 }
 0x574   : > { %v7876_v45 = vunpack.i.h.bf16 %v7874_v15  ;;  %v7875_v5 = vunpack.i.l.bf16 %v7874_v15 }
 0x575   : > { %8168 = vrot.lane.b32.xlu0 %v11128_v29, %s11204_s12  ;;  %8193 = vrot.lane.b32.xlu1 %v10083_v50, %s11086_s22 }
 0x576   : > { %v2908_v43 = vsel %vm11215_vm10, %v7875_v5, %v7865_v3  ;;  %v2910_v23 = vsel %vm11216_vm7, %v7876_v45, %v7870_v12  ;;  %6587 = vmatprep.subr.bf16.mxu1 %v6586_v0  ;;  %v7900_v12 = vunpack.i.l.bf16 %v10397_v17  ;;  %vm11220_vm10 = vcmask 121856  }
 0x577   : > { %v6588_v11 = vpack.c.bf16 %v2910_v23, %v2908_v43  ;;  %v7884_v62 = vpop.permute.xlu0 %7883  ;;  %v7919_v34 = vpop.permute.xlu1 %7918  ;;  %vm11221_vm7 = vmmov %vm11220_vm10  ;;  %v7911_v43 = vunpack.i.h.bf16 %v7909_v9  ;;  %v7910_v23 = vunpack.i.l.bf16 %v7909_v9 }
 0x578   : > { %v7886_v18 = vunpack.i.h.bf16 %v7884_v62  ;;  %v7885_v32 = vunpack.i.l.bf16 %v7884_v62  ;;  %v2991_v17 = vsel %vm11220_vm10, %v7900_v12, %v7901_v36  ;;  %v7921_v62 = vunpack.i.h.bf16 %v7919_v34  ;;  %vm11222_vm4 = vmmov %vm11221_vm7 }
 0x579   : > { %8183 = vrot.lane.b32.xlu0 %v10109_v10, %s11085_s16  ;;  %8208 = vrot.lane.b32.xlu1 %v10101_v55, %s11086_s22  ;;  %vm11223_vm15 = vmmov %vm11222_vm4  ;;  %s11015_s16 = sshll.u32 %s8704_s28, 9 }
 0x57a   : > { %v2914_v2 = vsel %vm11213_vm1, %v7891_v1, %v7885_v32  ;;  %6590 = vmatpush1.bf16.msk.msra.mxu1 %vm9088_vm8, %v6588_v11  ;;  %v2915_v63 = vsel %vm11219_vm2, %v7885_v32, %v7886_v18  ;;  %v7920_v11 = vunpack.i.l.bf16 %v7919_v34  ;;  %vm11224_vm1 = vmmov %vm11222_vm4 }
 0x57b   : > { %v6593_v38 = vpack.c.bf16 %v2914_v2, %v2912_v41  ;;  %v7894_v3 = vpop.permute.xlu0 %7893  ;;  %v10427_v59 = vpop.permute.xlu1 %7928  ;;  %v6591_v57 = vpack.c.bf16 %v2915_v63, %v2913_v22  ;;  %v2993_v63 = vsel %vm11224_vm1, %v7910_v23, %v7911_v43  ;;  %vm11225_vm2 = vmmov %vm11224_vm1 }
 0x57c   : > { %v7896_v15 = vunpack.i.h.bf16 %v7894_v3  ;;  %v7895_v0 = vunpack.i.l.bf16 %v7894_v3  ;;  %v7931_v34 = vunpack.i.h.bf16 %v10427_v59  ;;  %vm11226_vm10 = vmmov %vm11224_vm1 }
 0x57d   : > { %8188 = vrot.lane.b32.xlu0 %v10055_v48, %s11086_s22  ;;  %8213 = vrot.lane.b32.xlu1 %v10105_v54, %s11086_s22 }
 0x57e   : > { %v2989_v45 = vsel %vm11221_vm7, %v7895_v0, %v7896_v15  ;;  %6592 = vmatprep.subr.bf16.mxu1 %v6591_v57  ;;  %vm11227_vm7 = vmmov %vm11224_vm1 }
 0x57f   : > { %v6596_v5 = vpack.c.bf16 %v2991_v17, %v2989_v45  ;;  %6595 = vmatpush1.bf16.msk.msra.mxu1 %vm9088_vm8, %v6593_v38  ;;  %v7904_v40 = vpop.permute.xlu0 %7903  ;;  %v7939_v13 = vpop.permute.xlu1 %7938 }
 0x580   : > { %v7906_v27 = vunpack.i.h.bf16 %v7904_v40  ;;  %v7905_v1 = vunpack.i.l.bf16 %v7904_v40 }
 0x581   : > { %8198 = vrot.lane.b32.xlu0 %v10109_v10, %s11204_s12  ;;  %8223 = vrot.lane.b32.xlu1 %v10083_v50, %s11087_s0  ;;  %v2992_v10 = vsel %vm11225_vm2, %v7920_v11, %v7910_v23 }
 0x582   : > { %v2988_v18 = vsel %vm11222_vm4, %v7905_v1, %v7895_v0  ;;  %v2990_v32 = vsel %vm11223_vm15, %v7906_v27, %v7900_v12  ;;  %6598 = vmatprep.subr.msk.bf16.mxu1 %vm9129_vm12, %v6596_v5  ;;  %v7930_v12 = vunpack.i.l.bf16 %v10427_v59  ;;  %vm11228_vm4 = vcmask 7168  }
 0x583   : > { %v6599_v41 = vpack.c.bf16 %v2990_v32, %v2988_v18  ;;  %v7914_v22 = vpop.permute.xlu0 %7913  ;;  %v7949_v36 = vpop.permute.xlu1 %7948  ;;  %vm11229_vm15 = vmmov %vm11228_vm4  ;;  %v7940_v18 = vunpack.i.l.bf16 %v7939_v13 }
 0x584   : > { %v7916_v2 = vunpack.i.h.bf16 %v7914_v22  ;;  %v7915_v9 = vunpack.i.l.bf16 %v7914_v22  ;;  %v3071_v59 = vsel %vm11228_vm4, %v7930_v12, %v7931_v34  ;;  %v7951_v32 = vunpack.i.h.bf16 %v7949_v36  ;;  %vm11230_vm1 = vmmov %vm11228_vm4 }
 0x585   : > { %8203 = vrot.lane.b32.xlu0 %v10069_v42, %s11086_s22  ;;  %8233 = vrot.lane.b32.xlu1 %v10101_v55, %s11087_s0  ;;  %vm11231_vm2 = vmmov %vm11230_vm1 }
 0x586   : > { %v2994_v38 = vsel %vm11226_vm10, %v7921_v62, %v7915_v9  ;;  %v2995_v3 = vsel %vm11227_vm7, %v7915_v9, %v7916_v2  ;;  %6601 = vmatpush1.bf16.msk.msra.mxu1 %vm9141_vm14, %v6599_v41  ;;  %v7941_v62 = vunpack.i.h.bf16 %v7939_v13  ;;  %v7950_v41 = vunpack.i.l.bf16 %v7949_v36  ;;  %vm11232_vm10 = vmmov %vm11230_vm1 }
 0x587   : > { %v6602_v57 = vpack.c.bf16 %v2995_v3, %v2993_v63  ;;  %v6605_v15 = vpack.c.bf16 %v2994_v38, %v2992_v10  ;;  %v7924_v0 = vpop.permute.xlu0 %7923  ;;  %v10457_v17 = vpop.permute.xlu1 %7958  ;;  %vm11233_vm7 = vmmov %vm11230_vm1 }
 0x588   : > { %v7926_v45 = vunpack.i.h.bf16 %v7924_v0  ;;  %v7925_v5 = vunpack.i.l.bf16 %v7924_v0  ;;  %v3072_v36 = vsel %vm11233_vm7, %v7950_v41, %v7940_v18  ;;  %vm11234_vm4 = vmmov %vm11230_vm1 }
 0x589   : > { %8218 = vrot.lane.b32.xlu0 %v10055_v48, %s11087_s0  ;;  %8238 = vrot.lane.b32.xlu1 %v10105_v54, %s11087_s0 }
 0x58a   : > { %v3069_v40 = vsel %vm11229_vm15, %v7925_v5, %v7926_v45  ;;  %6604 = vmatprep.subr.msk.bf16.mxu1 %vm9129_vm12, %v6602_v57  ;;  %vm11235_vm15 = vmmov %vm11230_vm1 }
 0x58b   : > { %v6608_v27 = vpack.c.bf16 %v3071_v59, %v3069_v40  ;;  %6607 = vmatpush1.bf16.msk.msra.mxu1 %vm9141_vm14, %v6605_v15  ;;  %v7934_v1 = vpop.permute.xlu0 %7933  ;;  %v10469_v43 = vpop.permute.xlu1 %7968 }
 0x58c   : > { %v7936_v23 = vunpack.i.h.bf16 %v7934_v1  ;;  %v7935_v11 = vunpack.i.l.bf16 %v7934_v1 }
 0x58d   : > { %8228 = vrot.lane.b32.xlu0 %v10069_v42, %s11087_s0  ;;  %8253 = vrot.lane.b32.xlu1 %v10083_v50, %s11088_s18  ;;  %v3073_v50 = vsel %vm11232_vm10, %v7940_v18, %v7941_v62  ;;  %v7971_v18 = vunpack.i.h.bf16 %v10469_v43 }
 0x58e   : > { %v3068_v22 = vsel %vm11230_vm1, %v7935_v11, %v7925_v5  ;;  %v3070_v2 = vsel %vm11231_vm2, %v7936_v23, %v7930_v12  ;;  %6610 = vmatprep.subr.msk.bf16.mxu1 %vm9059_vm5, %v6608_v27  ;;  %v3515_v23 = vld [vmem:[%s11237_s2 + $0x8] sm:$0xff]  ;;  %vm11238_vm1 = vcmask 1039360  }
 0x58f   : > { %v6611_v9 = vpack.c.bf16 %v3070_v2, %v3068_v22  ;;  %v7944_v63 = vpop.permute.xlu0 %7943  ;;  %v10479_v10 = vpop.permute.xlu1 %7978  ;;  %vm11239_vm2 = vmmov %vm11238_vm1 }
 0x590   : > { %v7946_v13 = vunpack.i.h.bf16 %v7944_v63  ;;  %v7945_v34 = vunpack.i.l.bf16 %v7944_v63  ;;  %vm11240_vm10 = vmmov %vm11238_vm1  ;;  %v7981_v41 = vunpack.i.h.bf16 %v10479_v10  ;;  %v7980_v26 = vunpack.i.l.bf16 %v10479_v10 }
 0x591   : > { %8243 = vrot.lane.b32.xlu0 %v10119_v53, %s11086_s22  ;;  %8268 = vrot.lane.b32.xlu1 %v10101_v55, %s11088_s18  ;;  %s11236_s22 = sld [smem:[#allocation34_spill]]  ;;  %vm11241_vm7 = vmmov %vm11238_vm1 }
 0x592   : > { %v3074_v12 = vsel %vm11234_vm4, %v7951_v32, %v7945_v34  ;;  %v3075_v38 = vsel %vm11235_vm15, %v7945_v34, %v7946_v13  ;;  %6613 = vmatpush1.bf16.msk.msra.mxu1 %vm9178_vm0, %v6611_v9  ;;  %v7970_v32 = vunpack.i.l.bf16 %v10469_v43  ;;  %vm11242_vm4 = vmmov %vm11238_vm1 }
 0x593   : > { %v6614_v3 = vpack.c.bf16 %v3075_v38, %v3073_v50  ;;  %v6617_v57 = vpack.c.bf16 %v3074_v12, %v3072_v36  ;;  %v7954_v15 = vpop.permute.xlu0 %7953  ;;  %v10491_v0 = vpop.permute.xlu1 %7988  ;;  %vm11244_vm15 = vmmov %vm11238_vm1 }
 0x594   : > { %v7956_v45 = vunpack.i.h.bf16 %v7954_v15  ;;  %v7955_v5 = vunpack.i.l.bf16 %v7954_v15  ;;  %v7990_v2 = vunpack.i.l.bf16 %v10491_v0  ;;  %v3169_v10 = vsel %vm11244_vm15, %v7970_v32, %v7971_v18 }
 0x595   : > { %8248 = vrot.lane.b32.xlu0 %v10055_v48, %s11088_s18  ;;  %8278 = vrot.lane.b32.xlu1 %v10105_v54, %s11088_s18  ;;  %v7961_v48 = vunpack.i.h.bf16 %v10457_v17  ;;  %v7960_v54 = vunpack.i.l.bf16 %v10457_v17 }
 0x596   : > { %6616 = vmatprep.subr.msk.bf16.mxu1 %vm9059_vm5, %v6614_v3  ;;  %v3165_v11 = vsel %vm11238_vm1, %v7955_v5, %v7956_v45 }
 0x597   : > { %v5411_v55 = vld [vmem:[%s11236_s22 + $0x8] sm:$0xff]  ;;  %6619 = vmatpush1.bf16.msk.msra.mxu1 %vm9178_vm0, %v6617_v57  ;;  %v7964_v59 = vpop.permute.xlu0 %7963  ;;  %v10504_v40 = vpop.permute.xlu1 %7998  ;;  %v3167_v62 = vsel %vm11239_vm2, %v7960_v54, %v7961_v48  ;;  %v5410_v34 = vld [vmem:[%s11236_s22] sm:$0xff]  ;;  %vm11245_vm2 = vcmask 924672  }
 0x598   : > { %6621 = vmatprep.subr.bf16.mxu1 %v6620_v49  ;;  %v7966_v27 = vunpack.i.h.bf16 %v7964_v59  ;;  %v7965_v1 = vunpack.i.l.bf16 %v7964_v59  ;;  %v6628_v14 = vpack.c.bf16 %v3167_v62, %v3165_v11  ;;  %v8001_v15 = vunpack.i.h.bf16 %v10504_v40  ;;  %vm11249_vm15 = vmmov %vm11245_vm2 }
 0x599   : > { %8258 = vrot.lane.b32.xlu0 %v10119_v53, %s11087_s0  ;;  %5419 = vperm.xlu1 %7321, %v5411_v55   ;;  %s11333_s0 = sld [smem:[#allocation37_spill]] }
 0x59a   : > { %v3164_v21 = vsel %vm11240_vm10, %v7965_v1, %v7955_v5  ;;  %vm11246_vm10 = vmmov %vm11238_vm1 }
 0x59b   : > { %6623 = vmatpush1.bf16.msra.mxu1 %v6622_v60  ;;  %v7974_v24 = vpop.permute.xlu0 %7973  ;;  %v8009_v19 = vpop.permute.xlu1 %8008  ;;  %v3166_v60 = vsel %vm11241_vm7, %v7966_v27, %v7960_v54  ;;  %v3168_v38 = vsel %vm11246_vm10, %v7980_v26, %v7970_v32  ;;  %vm11247_vm7 = vmmov %vm11245_vm2  ;;  %v3514_v54 = vld [vmem:[%s11237_s2] sm:$0xff] }
 0x59c   : > { %v7976_v49 = vunpack.i.h.bf16 %v7974_v24  ;;  %v7975_v17 = vunpack.i.l.bf16 %v7974_v24  ;;  %6625 = vmatprep.subr.bf16.mxu1 %v6624_v39  ;;  %v11243_v39 = vpack.c.bf16 %v10236_v30, %v10219_v33  ;;  %v6631_v13 = vpack.c.bf16 %v3166_v60, %v3164_v21 }
 0x59d   : > { %8263 = vrot.lane.b32.xlu0 %v10069_v42, %s11088_s18  ;;  %3523 = vperm.xlu1 %7321, %v3515_v23   ;;  %v7991_v42 = vunpack.i.h.bf16 %v10491_v0  ;;  %v8000_v0 = vunpack.i.l.bf16 %v10504_v40  ;;  %v8010_v45 = vunpack.i.l.bf16 %v8009_v19  ;;  %v8011_v11 = vunpack.i.h.bf16 %v8009_v19 }
 0x59e   : > { %v3171_v46 = vsel %vm11242_vm4, %v7975_v17, %v7976_v49  ;;  %v3170_v33 = vsel %vm11238_vm1, %v7981_v41, %v7975_v17  ;;  %vm11248_vm4 = vmmov %vm11245_vm2 }
 0x59f   : > { %6627 = vmatpush1.bf16.msra.mxu1 %v11243_v39  ;;  %v7984_v43 = vpop.permute.xlu0 %7983  ;;  %v10536_v22 = vpop.permute.xlu1 %8018  ;;  %v6634_v30 = vpack.c.bf16 %v3171_v46, %v3169_v10  ;;  %v3247_v3 = vsel %vm11247_vm7, %v7990_v2, %v7991_v42  ;;  %v6637_v55 = vpack.c.bf16 %v3170_v33, %v3168_v38  ;;  %vm11250_vm1 = vmmov %vm11245_vm2  ;;  %s10824_s3 = scalar_lea.hbm %s11333_s0, %s11015_s16 }
 0x5a0   : > { %v7986_v9 = vunpack.i.h.bf16 %v7984_v43  ;;  %v7985_v63 = vunpack.i.l.bf16 %v7984_v43  ;;  %6630 = vmatprep.subr.msk.bf16.mxu1 %vm9129_vm12, %v6628_v14  ;;  %v3249_v49 = vsel %vm11250_vm1, %v8000_v0, %v8001_v15  ;;  %v8021_v62 = vunpack.i.h.bf16 %v10536_v22  ;;  %vm11252_vm10 = vmmov %vm11250_vm1 }
 0x5a1   : > { %8273 = vrot.lane.b32.xlu0 %v10119_v53, %s11088_s18  ;;  %v8020_v18 = vunpack.i.l.bf16 %v10536_v22  ;;  %vm11253_vm7 = vmmov %vm11250_vm1  ;;  %s5791_s18 = scalar_lea.sflag [#allocation7], %s8908_s24 }
 0x5a2   : > { %v3245_v50 = vsel %vm11245_vm2, %v7985_v63, %v7986_v9  ;;  %vm11251_vm2 = vmmov %vm11250_vm1 }
 0x5a3   : > { %6633 = vmatpush1.bf16.msk.msra.mxu1 %vm9223_vm13, %v6631_v13  ;;  %v7994_v36 = vpop.permute.xlu0 %7993  ;;  %v10552_v12 = vpop.permute.xlu1 %8028  ;;  %v6640_v5 = vpack.c.bf16 %v3247_v3, %v3245_v50  ;;  %v3248_v17 = vsel %vm11251_vm2, %v8010_v45, %v8000_v0 }
 0x5a4   : > { %v7996_v53 = vunpack.i.h.bf16 %v7994_v36  ;;  %v7995_v57 = vunpack.i.l.bf16 %v7994_v36  ;;  %6636 = vmatprep.subr.msk.bf16.mxu1 %vm9129_vm12, %v6634_v30  ;;  %v8031_v33 = vunpack.i.h.bf16 %v10552_v12  ;;  %v8030_v30 = vunpack.i.l.bf16 %v10552_v12 }
 0x5a5   : > { %5414 = vperm.xlu0 %7320, %v5410_v34  }
 0x5a6   : > { %v3244_v59 = vsel %vm11248_vm4, %v7995_v57, %v7985_v63  ;;  %v3246_v48 = vsel %vm11249_vm15, %v7996_v53, %v7990_v2  ;;  %vm11254_vm4 = vcmask 916480  }
 0x5a7   : > { %v6643_v27 = vpack.c.bf16 %v3246_v48, %v3244_v59  ;;  %6639 = vmatpush1.bf16.msk.msra.mxu1 %vm9223_vm13, %v6637_v55  ;;  %v8004_v1 = vpop.permute.xlu0 %8003  ;;  %v8039_v23 = vpop.permute.xlu1 %8038  ;;  %v3327_v43 = vsel %vm11254_vm4, %v8020_v18, %v8021_v62  ;;  %vm11255_vm15 = vmmov %vm11254_vm4 }
 0x5a8   : > { %v8006_v40 = vunpack.i.h.bf16 %v8004_v1  ;;  %v8005_v24 = vunpack.i.l.bf16 %v8004_v1  ;;  %6642 = vmatprep.subr.msk.bf16.mxu1 %vm9242_vm9, %v6640_v5  ;;  %v8040_v34 = vunpack.i.l.bf16 %v8039_v23  ;;  %vm11256_vm1 = vmmov %vm11254_vm4  ;;  %v8041_v0 = vunpack.i.h.bf16 %v8039_v23 }
 0x5a9   : > { %3518 = vperm.xlu0 %7320, %v3514_v54   ;;  %vm11257_vm2 = vmmov %vm11256_vm1 }
 0x5aa   : > { %v3250_v32 = vsel %vm11252_vm10, %v8011_v11, %v8005_v24  ;;  %v3251_v14 = vsel %vm11253_vm7, %v8005_v24, %v8006_v40  ;;  %vm11258_vm10 = vmmov %vm11256_vm1 }
 0x5ab   : > { %v6646_v21 = vpack.c.bf16 %v3251_v14, %v3249_v49  ;;  %v6649_v19 = vpack.c.bf16 %v3250_v32, %v3248_v17  ;;  %6645 = vmatpush1.bf16.msk.msra.mxu1 %vm9178_vm0, %v6643_v27  ;;  %v8014_v60 = vpop.permute.xlu0 %8013  ;;  %v8049_v41 = vpop.permute.xlu1 %8048  ;;  %v3329_v12 = vsel %vm11258_vm10, %v8030_v30, %v8031_v33  ;;  %vm11259_vm7 = vmmov %vm11256_vm1  ;;  %v3511_v33 = vld [vmem:[#allocation11 + $0x18] sm:$0xff] }
 0x5ac   : > { %v8016_v26 = vunpack.i.h.bf16 %v8014_v60  ;;  %v8015_v46 = vunpack.i.l.bf16 %v8014_v60  ;;  %v3328_v5 = vsel %vm11259_vm7, %v8040_v34, %v8030_v30  ;;  %v8051_v59 = vunpack.i.h.bf16 %v8049_v41  ;;  %vm11260_vm4 = vmmov %vm11256_vm1 }
 0x5ad   : > { %6648 = vmatprep.subr.msk.bf16.mxu1 %vm9242_vm9, %v6646_v21  ;;  %v10579_v39 = vpop.f32.mrb[24].mxu0  ;;  %v8050_v48 = vunpack.i.l.bf16 %v8049_v41 }
 0x5ae   : > { %v3325_v22 = vsel %vm11255_vm15, %v8015_v46, %v8016_v26  ;;  %v10583_v42 = vpop.f32.mrb[25].mxu0  ;;  %vm11261_vm15 = vmmov %vm11256_vm1 }
 0x5af   : > { %v6652_v2 = vpack.c.bf16 %v3327_v43, %v3325_v22  ;;  %6651 = vmatpush1.bf16.msk.msra.mxu1 %vm9178_vm0, %v6649_v19  ;;  %v8024_v9 = vpop.permute.xlu0 %8023  ;;  %v8059_v63 = vpop.permute.xlu1 %8058  ;;  %v3512_v19 = vld [vmem:[#allocation11 + $0x20] sm:$0xff] }
 0x5b0   : > { %v8026_v10 = vunpack.i.h.bf16 %v8024_v9  ;;  %v8025_v13 = vunpack.i.l.bf16 %v8024_v9  ;;  %v8061_v26 = vunpack.i.h.bf16 %v8059_v63 }
 0x5b1   : > { %6654 = vmatprep.subr.msk.bf16.mxu1 %vm9267_vm11, %v6652_v2  ;;  %v10591_v50 = vpop.f32.mrb[26].mxu0 }
 0x5b2   : > { %v3324_v36 = vsel %vm11256_vm1, %v8025_v13, %v8015_v46  ;;  %v3326_v38 = vsel %vm11257_vm2, %v8026_v10, %v8020_v18  ;;  %v10595_v3 = vpop.f32.mrb[27].mxu0  ;;  %vm11262_vm1 = vcmask 908288   ;;  %v3508_v18 = vld [vmem:[#allocation11] sm:$0xff]  ;;  %v8060_v46 = vunpack.i.l.bf16 %v8059_v63 }
 0x5b3   : > { %v6655_v53 = vpack.c.bf16 %v3326_v38, %v3324_v36  ;;  %v8034_v57 = vpop.permute.xlu0 %8033  ;;  %v8069_v15 = vpop.permute.xlu1 %8068  ;;  %v3407_v23 = vsel %vm11262_vm1, %v8050_v48, %v8051_v59  ;;  %vm11263_vm2 = vmmov %vm11262_vm1 }
 0x5b4   : > { %v8036_v55 = vunpack.i.h.bf16 %v8034_v57  ;;  %v8035_v45 = vunpack.i.l.bf16 %v8034_v57  ;;  %v8070_v43 = vunpack.i.l.bf16 %v8069_v15  ;;  %vm11264_vm10 = vmmov %vm11262_vm1  ;;  %v8071_v30 = vunpack.i.h.bf16 %v8069_v15 }
 0x5b5   : > { %6656 = vmatpush1.bf16.msra.mxu1 %v6655_v53  ;;  %vm11265_vm7 = vmmov %vm11262_vm1 }
 0x5b6   : > { %v3330_v54 = vsel %vm11260_vm4, %v8041_v0, %v8035_v45  ;;  %v3331_v27 = vsel %vm11261_vm15, %v8035_v45, %v8036_v55  ;;  %vm11266_vm4 = vmmov %vm11262_vm1 }
 0x5b7   : > { %v6657_v1 = vpack.c.bf16 %v3331_v27, %v3329_v12  ;;  %v6660_v11 = vpack.c.bf16 %v3330_v54, %v3328_v5  ;;  %v8044_v40 = vpop.permute.xlu0 %8043  ;;  %v8079_v24 = vpop.permute.xlu1 %8078  ;;  %v3409_v63 = vsel %vm11266_vm4, %v8060_v46, %v8061_v26  ;;  %vm11267_vm15 = vmmov %vm11262_vm1  ;;  %vm11271_vm4 = vcmask 261120  }
 0x5b8   : > { %v8046_v49 = vunpack.i.h.bf16 %v8044_v40  ;;  %v8045_v17 = vunpack.i.l.bf16 %v8044_v40  ;;  %v3408_v38 = vsel %vm11267_vm15, %v8070_v43, %v8060_v46  ;;  %v8081_v53 = vunpack.i.h.bf16 %v8079_v24 }
 0x5b9   : > { %6659 = vmatprep.subr.msk.bf16.mxu1 %vm9267_vm11, %v6657_v1  ;;  %v8080_v57 = vunpack.i.l.bf16 %v8079_v24  ;;  %v3510_v1 = vld [vmem:[#allocation11 + $0x10] sm:$0xff] }
 0x5ba   : > { %v3405_v62 = vsel %vm11263_vm2, %v8045_v17, %v8046_v49  ;;  %6661 = vmatpush1.bf16.msra.mxu1 %v6660_v11  ;;  %vm11268_vm2 = vmmov %vm11262_vm1 }
 0x5bb   : > { %v6662_v32 = vpack.c.bf16 %v3407_v23, %v3405_v62  ;;  %v8054_v14 = vpop.permute.xlu0 %8053  ;;  %v10605_v21 = vpop.permute.xlu1 %8088  ;;  %v3513_v62 = vld [vmem:[#allocation11 + $0x28] sm:$0xff] }
 0x5bc   : > { %v8056_v60 = vunpack.i.h.bf16 %v8054_v14  ;;  %v8055_v41 = vunpack.i.l.bf16 %v8054_v14 }
 0x5bd   : > { %6664 = vmatprep.subr.msk.bf16.mxu1 %vm9290_vm3, %v6662_v32  ;;  %3597 = vmatmul.mubr.f32.vlgmr.msra.gmra.mrb[8].mxu1 %v3508_v18 }
 0x5be   : > { %v3404_v22 = vsel %vm11264_vm10, %v8055_v41, %v8045_v17  ;;  %v3406_v2 = vsel %vm11265_vm7, %v8056_v60, %v8050_v48  ;;  %3602 = vmatprep.mubr.f32.mxu1 %v3512_v19  ;;  %vm11269_vm10 = vcmask 138240   ;;  %v5405_v19 = vld [vmem:[#allocation13 + $0x8] sm:$0xff] }
 0x5bf   : > { %v6665_v9 = vpack.c.bf16 %v3406_v2, %v3404_v22  ;;  %v8064_v10 = vpop.permute.xlu0 %8063  ;;  %v10611_v13 = vpop.permute.xlu1 %8093  ;;  %v4727_v54 = vsel %vm11269_vm10, %v8080_v57, %v8081_v53  ;;  %vm11270_vm7 = vmmov %vm11269_vm10 }
 0x5c0   : > { %v8066_v34 = vunpack.i.h.bf16 %v8064_v10  ;;  %v8065_v36 = vunpack.i.l.bf16 %v8064_v10  ;;  %v8096_v53 = vunpack.i.h.bf16 %v10611_v13 }
 0x5c1   : > { %6667 = vmatpush1.bf16.msk.msra.mxu1 %vm9223_vm13, %v6665_v9 }
 0x5c2   : > { %v3410_v0 = vsel %vm11262_vm1, %v8071_v30, %v8065_v36  ;;  %v3411_v55 = vsel %vm11268_vm2, %v8065_v36, %v8066_v34  ;;  %3603 = vmatmul.mubr.f32.gmra.mrb[10].mxu1 %v3511_v33  ;;  %vm11274_vm1 = vmmov %vm11271_vm4  ;;  %v8091_v33 = vunpack.i.h.bf16 %v10605_v21  ;;  %v8090_v30 = vunpack.i.l.bf16 %v10605_v21 }
 0x5c3   : > { %v6668_v45 = vpack.c.bf16 %v3411_v55, %v3409_v63  ;;  %v6671_v12 = vpack.c.bf16 %v3410_v0, %v3408_v38  ;;  %v8074_v5 = vpop.permute.xlu0 %8073  ;;  %v10619_v15 = vpop.permute.xlu1 %8103  ;;  %3673 = vmatprep.mubr.f32.mxu1 %v11128_v29  ;;  %v8095_v36 = vunpack.i.l.bf16 %v10611_v13  ;;  %vm11276_vm2 = vmmov %vm11274_vm1 }
 0x5c4   : > { %v8076_v59 = vunpack.i.h.bf16 %v8074_v5  ;;  %v8075_v48 = vunpack.i.l.bf16 %v8074_v5  ;;  %v8105_v0 = vunpack.i.l.bf16 %v10619_v15 }
 0x5c5   : > { %6670 = vmatprep.subr.msk.bf16.mxu1 %vm9290_vm3, %v6668_v45  ;;  %vm11272_vm3 = vmmov %vm11270_vm7 }
 0x5c6   : > { %v4725_v27 = vsel %vm11270_vm7, %v8075_v48, %v8076_v59  ;;  %6673 = vmatpush1.bf16.msk.msra.mxu1 %vm9223_vm13, %v6671_v12  ;;  %vm11273_vm15 = vmmov %vm11272_vm3 }
 0x5c7   : > { %v6774_v11 = vpack.c.bf16 %v4727_v54, %v4725_v27  ;;  %v8084_v40 = vpop.permute.xlu0 %8083  ;;  %v10628_v24 = vpop.permute.xlu1 %8113  ;;  %vm11277_vm10 = vmmov %vm11272_vm3 }
 0x5c8   : > { %v8086_v49 = vunpack.i.h.bf16 %v8084_v40  ;;  %v8085_v17 = vunpack.i.l.bf16 %v8084_v40  ;;  %v4729_v21 = vsel %vm11277_vm10, %v8090_v30, %v8091_v33  ;;  %vm11278_vm7 = vmmov %vm11272_vm3 }
 0x5c9   : > { %6040 = vmatmul.mubr.msk.f32.vlgmr.msra.gmra.mrb[8].mxu1 %vm11271_vm4, %v3510_v1  ;;  %6776 = vmatprep.subr.msk.bf16.mxu1 %vm9059_vm5, %v6774_v11  ;;  %v4728_v54 = vsel %vm11278_vm7, %v8095_v36, %v8090_v30  ;;  %vm11279_vm4 = vmmov %vm11272_vm3 }
 0x5ca   : > { %v4724_v51 = vsel %vm11272_vm3, %v8085_v17, %v8075_v48  ;;  %v4726_v23 = vsel %vm11273_vm15, %v8086_v49, %v8080_v57  ;;  %3679 = vmatprep.mubr.f32.mxu1 %v11128_v29  ;;  %v5607_v29 = vld [vmem:[%s11275_s1] sm:$0x1]  ;;  %v8106_v57 = vunpack.i.h.bf16 %v10619_v15  ;;  %vm11280_vm15 = vcmask 130048   ;;  %s8438_s1 = scalar_lea.vmem %s8437_s6, 1024 }
 0x5cb   : > { %v6777_v18 = vpack.c.bf16 %v4726_v23, %v4724_v51  ;;  %v8099_v32 = vpop.permute.xlu0 %8098  ;;  %v10636_v14 = vpop.permute.xlu1 %8118  ;;  %p8440_p1 = scmp.lt.s32.totalorder %s8438_s1, %s8432_s8 }
 0x5cc   : > { %v8101_v63 = vunpack.i.h.bf16 %v8099_v32  ;;  %v8100_v38 = vunpack.i.l.bf16 %v8099_v32 }
 0x5cd   : > { %6041 = vmatmul.mubr.msk.f32.gmra.mrb[10].mxu1 %vm11274_vm1, %v3513_v62  ;;  %vm11281_vm1 = vmmov %vm11280_vm15  ;;  %v8116_v62 = vunpack.i.h.bf16 %v10628_v24  ;;  %p8441_p2 = por %p8440_p1, %p8439_p12 }
 0x5ce   : > { %6779 = vmatpush1.bf16.msk.msra.mxu1 %vm9066_vm6, %v6777_v18  ;;  %5492 = vmatprep.mubr.f32.mxu1 %v5405_v19  ;;  %v4805_v1 = vsel %vm11280_vm15, %v8100_v38, %v8101_v63  ;;  %vm11283_vm11 = vmmov %vm11281_vm1  ;;  %v8115_v18 = vunpack.i.l.bf16 %v10628_v24  ;;  %v8120_v19 = vunpack.i.l.bf16 %v10636_v14 }
 0x5cf   : > { %v8109_v60 = vpop.permute.xlu0 %8108  ;;  %v10641_v41 = vpop.permute.xlu1 %8128  ;;  %v4807_v23 = vsel %vm11283_vm11, %v8105_v0, %v8106_v57  ;;  %vm11284_vm11 = vmmov %vm11281_vm1  ;;  %p8442_p13 = pnand %p8441_p2, %p8435_p7 }
 0x5d0   : > { %v8111_v45 = vunpack.i.h.bf16 %v8109_v60  ;;  %v8110_v12 = vunpack.i.l.bf16 %v8109_v60  ;;  %v6786_v32 = vpack.c.bf16 %v4807_v23, %v4805_v1  ;;  %v8130_v24 = vunpack.i.l.bf16 %v10641_v41  ;;  %vm11285_vm10 = vmmov %vm11281_vm1 }
 0x5d1   : > { %v4808_v52 = vsel %vm11285_vm10, %v8120_v19, %v8115_v18  ;;  %vm11287_vm7 = vmmov %vm11281_vm1 }
 0x5d2   : > { %v4804_v49 = vsel %vm11281_vm1, %v8110_v12, %v8100_v38 }
 0x5d3   : > { %v10643_v26 = vpop.permute.xlu0 %8123  ;;  %v10645_v46 = vpop.permute.xlu1 %8138 }
 0x5d4   : > { %v8126_v60 = vunpack.i.h.bf16 %v10643_v26 }
 0x5d6   : > { %v5705_v43 = vpop.f32.mrb[28].mxu0 }
 0x5d7   : > { %v5706_v22 = vadd.f32 %v5705_v43, %v5607_v29  ;;  %v6362_v2 = vpop.f32.mrb[29].mxu0  ;;  %v8134_v9 = vpop.permute.xlu0 %8133  ;;  %v8125_v29 = vunpack.i.l.bf16 %v10643_v26  ;;  %v8121_v43 = vunpack.i.h.bf16 %v10636_v14  ;;  %v4809_v26 = vsel %vm11284_vm11, %v8115_v18, %v8116_v62 }
 0x5d8   : > { %v10650_v10 = vpop.permute.xlu1 %8143  ;;  %v8131_v2 = vunpack.i.h.bf16 %v10641_v41  ;;  %v8136_v30 = vunpack.i.h.bf16 %v8134_v9  ;;  %vm11294_vm11 = vcmask 7168  }
 0x5d9   : > { %v5709_v34 = vmax.f32 %v5706_v22, 0.0 }
 0x5db   : > { %6372 = vmatmul.mubr.msk.f32.vlgmr.msra.gmra.mrb[30].mxu0 %vm11276_vm2, %v5709_v34  ;;  %v8149_v55 = vpop.permute.xlu0 %8148  ;;  %vm11282_vm2 = vmmov %vm11281_vm1  ;;  %v8135_v34 = vunpack.i.l.bf16 %v8134_v9 }
 0x5dc   : > { %v8151_v5 = vunpack.i.h.bf16 %v8149_v55  ;;  %v8150_v59 = vunpack.i.l.bf16 %v8149_v55  ;;  %v10659_v48 = vpop.permute.xlu1 %8158  ;;  %v4806_v17 = vsel %vm11282_vm2, %v8111_v45, %v8105_v0 }
 0x5dd   : > { %v6788_v22 = vpack.c.bf16 %v4806_v17, %v4804_v49  ;;  %v8161_v17 = vunpack.i.h.bf16 %v10659_v48 }
 0x5de   : > { %v4730_v27 = vsel %vm11279_vm4, %v8096_v53, %v8150_v59  ;;  %v4731_v13 = vsel %vm11272_vm3, %v8150_v59, %v8151_v5  ;;  %vm11288_vm4 = vmmov %vm11281_vm1 }
 0x5df   : > { %v6780_v15 = vpack.c.bf16 %v4731_v13, %v4729_v21  ;;  %v6783_v11 = vpack.c.bf16 %v4730_v27, %v4728_v54  ;;  %v10666_v40 = vpop.permute.xlu0 %8153  ;;  %v8141_v21 = vunpack.i.h.bf16 %v10645_v46  ;;  %v8140_v54 = vunpack.i.l.bf16 %v10645_v46 }
 0x5e0   : > { %v10670_v51 = vpop.permute.xlu1 %8173  ;;  %v8145_v27 = vunpack.i.l.bf16 %v10650_v10  ;;  %v8156_v13 = vunpack.i.h.bf16 %v10666_v40  ;;  %v8155_v1 = vunpack.i.l.bf16 %v10666_v40  ;;  %v8160_v46 = vunpack.i.l.bf16 %v10659_v48 }
 0x5e1   : > { %6782 = vmatprep.subr.msk.bf16.mxu1 %vm9059_vm5, %v6780_v15 }
 0x5e2   : > { %6785 = vmatpush1.bf16.msk.msra.mxu1 %vm9066_vm6, %v6783_v11  ;;  %vm11286_vm6 = vcmask 121856   ;;  %v8146_v11 = vunpack.i.h.bf16 %v10650_v10  ;;  %v4965_v10 = vsel %vm11294_vm11, %v8155_v1, %v8156_v13  ;;  %v11304_v13 = vpack.c.bf16 %v10063_v37, %v10051_v58 }
 0x5e3   : > { %v8164_v33 = vpop.permute.xlu0 %8163  ;;  %6787 = vmatprep.subr.bf16.mxu1 %v6786_v32  ;;  %v4885_v53 = vsel %vm11286_vm6, %v8125_v29, %v8126_v60  ;;  %vm11289_vm3 = vmmov %vm11286_vm6 }
 0x5e4   : > { %v8166_v36 = vunpack.i.h.bf16 %v8164_v33  ;;  %v8165_v63 = vunpack.i.l.bf16 %v8164_v33  ;;  %v10685_v38 = vpop.permute.xlu1 %8178  ;;  %v4887_v55 = vsel %vm11289_vm3, %v8130_v24, %v8131_v2  ;;  %vm11290_vm15 = vmmov %vm11289_vm3 }
 0x5e5   : > { %v4884_v45 = vsel %vm11290_vm15, %v8135_v34, %v8125_v29  ;;  %vm11291_vm1 = vmmov %vm11289_vm3  ;;  %v6796_v59 = vpack.c.bf16 %v4887_v55, %v4885_v53  ;;  %v8181_v53 = vunpack.i.h.bf16 %v10685_v38 }
 0x5e6   : > { %v4810_v14 = vsel %vm11287_vm7, %v8121_v43, %v8165_v63  ;;  %6790 = vmatpush1.bf16.msk.msra.mxu1 %vm9088_vm8, %v6788_v22  ;;  %v4811_v41 = vsel %vm11288_vm4, %v8165_v63, %v8166_v36  ;;  %v4886_v12 = vsel %vm11291_vm1, %v8136_v30, %v8130_v24  ;;  %vm11292_vm2 = vmmov %vm11291_vm1  ;;  %v8176_v36 = vunpack.i.h.bf16 %v10670_v51 }
 0x5e7   : > { %v6793_v57 = vpack.c.bf16 %v4810_v14, %v4808_v52  ;;  %v8169_v0 = vpop.permute.xlu0 %8168  ;;  %v6791_v9 = vpack.c.bf16 %v4811_v41, %v4809_v26  ;;  %v6799_v15 = vpack.c.bf16 %v4886_v12, %v4884_v45  ;;  %v4889_v40 = vsel %vm11292_vm2, %v8140_v54, %v8141_v21  ;;  %vm11295_vm10 = vmmov %vm11291_vm1 }
 0x5e8   : > { %v10697_v5 = vpop.permute.xlu1 %8193  ;;  %v8171_v32 = vunpack.i.h.bf16 %v8169_v0  ;;  %v8170_v31 = vunpack.i.l.bf16 %v8169_v0  ;;  %vm11296_vm6 = vmmov %vm11291_vm1  ;;  %v8175_v63 = vunpack.i.l.bf16 %v10670_v51  ;;  %v8180_v26 = vunpack.i.l.bf16 %v10685_v38 }
 0x5e9   : > { %6792 = vmatprep.subr.bf16.mxu1 %v6791_v9  ;;  %vm11297_vm7 = vmmov %vm11294_vm11 }
 0x5ea   : > { %6795 = vmatpush1.bf16.msk.msra.mxu1 %vm9088_vm8, %v6793_v57  ;;  %vm11293_vm8 = vmmov %vm11291_vm1  ;;  %v4967_v2 = vsel %vm11297_vm7, %v8160_v46, %v8161_v17 }
 0x5eb   : > { %v8184_v49 = vpop.permute.xlu0 %8183  ;;  %6798 = vmatprep.subr.msk.bf16.mxu1 %vm9129_vm12, %v6796_v59  ;;  %v4888_v19 = vsel %vm11293_vm8, %v8145_v27, %v8140_v54  ;;  %v6808_v33 = vpack.c.bf16 %v4967_v2, %v4965_v10  ;;  %vm11298_vm4 = vmmov %vm11297_vm7  ;;  %v11311_v10 = vpack.c.bf16 %v10093_v28, %v10075_v61 }
 0x5ec   : > { %v8186_v23 = vunpack.i.h.bf16 %v8184_v49  ;;  %v8185_v62 = vunpack.i.l.bf16 %v8184_v49  ;;  %v10711_v18 = vpop.permute.xlu1 %8208  ;;  %v4964_v30 = vsel %vm11298_vm4, %v8170_v31, %v8155_v1  ;;  %vm11299_vm3 = vmmov %vm11298_vm4  ;;  %v8196_v1 = vunpack.i.h.bf16 %v10697_v5 }
 0x5ed   : > { %v4966_v34 = vsel %vm11299_vm3, %v8171_v32, %v8160_v46  ;;  %vm11300_vm15 = vmmov %vm11299_vm3  ;;  %v11306_v46 = vpack.c.bf16 %v10061_v4, %v10049_v8  ;;  %v8211_v37 = vunpack.i.h.bf16 %v10711_v18  ;;  %vm11314_vm4 = vcmask 924672  }
 0x5ee   : > { %v4890_v60 = vsel %vm11295_vm10, %v8146_v11, %v8185_v62  ;;  %v4891_v29 = vsel %vm11296_vm6, %v8185_v62, %v8186_v23  ;;  %6801 = vmatpush1.bf16.msk.msra.mxu1 %vm9141_vm14, %v6799_v15  ;;  %v6811_v14 = vpack.c.bf16 %v4966_v34, %v4964_v30  ;;  %v4969_v9 = vsel %vm11300_vm15, %v8175_v63, %v8176_v36  ;;  %vm11301_vm1 = vmmov %vm11299_vm3 }
 0x5ef   : > { %v6802_v48 = vpack.c.bf16 %v4891_v29, %v4889_v40  ;;  %v6805_v43 = vpack.c.bf16 %v4890_v60, %v4888_v19  ;;  %v8189_v22 = vpop.permute.xlu0 %8188  ;;  %v4968_v55 = vsel %vm11301_vm1, %v8180_v26, %v8175_v63  ;;  %vm11302_vm2 = vmmov %vm11301_vm1  ;;  %v8195_v15 = vunpack.i.l.bf16 %v10697_v5 }
 0x5f0   : > { %v10721_v24 = vpop.permute.xlu1 %8213  ;;  %vm11303_vm8 = vmmov %vm11301_vm1  ;;  %v8191_v38 = vunpack.i.h.bf16 %v8189_v22  ;;  %v8190_v54 = vunpack.i.l.bf16 %v8189_v22  ;;  %v11307_v62 = vpack.c.bf16 %v10097_v20, %v10079_v47  ;;  %v8210_v5 = vunpack.i.l.bf16 %v10711_v18 }
 0x5f1   : > { %6804 = vmatprep.subr.msk.bf16.mxu1 %vm9129_vm12, %v6802_v48  ;;  %v8215_v19 = vunpack.i.l.bf16 %v10721_v24  ;;  %v8216_v47 = vunpack.i.h.bf16 %v10721_v24  ;;  %vm11317_vm1 = vmmov %vm11314_vm4 }
 0x5f2   : > { %6807 = vmatpush1.bf16.msk.msra.mxu1 %vm9141_vm14, %v6805_v43  ;;  %vm11305_vm14 = vcmask 1039360  }
 0x5f3   : > { %v8199_v52 = vpop.permute.xlu0 %8198  ;;  %6810 = vmatprep.subr.msk.bf16.mxu1 %vm9059_vm5, %v6808_v33  ;;  %v5061_v44 = vsel %vm11305_vm14, %v8190_v54, %v8191_v38 }
 0x5f4   : > { %v8201_v41 = vunpack.i.h.bf16 %v8199_v52  ;;  %v8200_v57 = vunpack.i.l.bf16 %v8199_v52  ;;  %v8224_v0 = vpop.permute.xlu1 %8223 }
 0x5f5   : > { %v8226_v20 = vunpack.i.h.bf16 %v8224_v0  ;;  %v8225_v18 = vunpack.i.l.bf16 %v8224_v0 }
 0x5f6   : > { %v4970_v51 = vsel %vm11302_vm2, %v8181_v53, %v8200_v57  ;;  %v4971_v45 = vsel %vm11303_vm8, %v8200_v57, %v8201_v41  ;;  %6813 = vmatpush1.bf16.msk.msra.mxu1 %vm9178_vm0, %v6811_v14  ;;  %vm11318_vm2 = vmmov %vm11317_vm1 }
 0x5f7   : > { %v6814_v16 = vpack.c.bf16 %v4971_v45, %v4969_v9  ;;  %v6817_v12 = vpack.c.bf16 %v4970_v51, %v4968_v55  ;;  %v8204_v59 = vpop.permute.xlu0 %8203  ;;  %v5143_v52 = vsel %vm11317_vm1, %v8225_v18, %v8226_v20  ;;  %vm11319_vm8 = vmmov %vm11317_vm1 }
 0x5f8   : > { %v10741_v21 = vpop.permute.xlu1 %8233  ;;  %v8206_v11 = vunpack.i.h.bf16 %v8204_v59  ;;  %v8205_v49 = vunpack.i.l.bf16 %v8204_v59 }
 0x5f9   : > { %6816 = vmatprep.subr.msk.bf16.mxu1 %vm9059_vm5, %v6814_v16  ;;  %vm11308_vm5 = vmmov %vm11305_vm14  ;;  %v8236_v53 = vunpack.i.h.bf16 %v10741_v21  ;;  %v8235_v14 = vunpack.i.l.bf16 %v10741_v21 }
 0x5fa   : > { %6819 = vmatpush1.bf16.msk.msra.mxu1 %vm9178_vm0, %v6817_v12  ;;  %v5063_v58 = vsel %vm11308_vm5, %v8195_v15, %v8196_v1  ;;  %vm11309_vm11 = vmmov %vm11308_vm5 }
 0x5fb   : > { %v8219_v27 = vpop.permute.xlu0 %8218  ;;  %6821 = vmatprep.subr.bf16.mxu1 %v11304_v13  ;;  %v6828_v40 = vpack.c.bf16 %v5063_v58, %v5061_v44  ;;  %v5060_v32 = vsel %vm11309_vm11, %v8205_v49, %v8190_v54  ;;  %vm11310_vm10 = vmmov %vm11308_vm5 }
 0x5fc   : > { %v8239_v17 = vpop.permute.xlu1 %8238  ;;  %v5062_v31 = vsel %vm11310_vm10, %v8206_v11, %v8195_v15  ;;  %v8221_v8 = vunpack.i.h.bf16 %v8219_v27  ;;  %v8220_v4 = vunpack.i.l.bf16 %v8219_v27  ;;  %vm11312_vm6 = vmmov %vm11308_vm5 }
 0x5fd   : > { %v6831_v48 = vpack.c.bf16 %v5062_v31, %v5060_v32  ;;  %v5065_v2 = vsel %vm11312_vm6, %v8210_v5, %v8211_v37  ;;  %vm11313_vm7 = vmmov %vm11308_vm5  ;;  %v8240_v55 = vunpack.i.l.bf16 %v8239_v17  ;;  %v8241_v16 = vunpack.i.h.bf16 %v8239_v17 }
 0x5fe   : > { %6823 = vmatpush1.bf16.msra.mxu1 %v11306_v46  ;;  %v5064_v34 = vsel %vm11313_vm7, %v8215_v19, %v8210_v5  ;;  %v5141_v61 = vsel %vm11314_vm4, %v8220_v4, %v8221_v8  ;;  %vm11315_vm3 = vmmov %vm11308_vm5  ;;  %vm11328_vm4 = vnez %v11080_v7 }
 0x5ff   : > { %v8229_v23 = vpop.permute.xlu0 %8228  ;;  %6825 = vmatprep.subr.bf16.mxu1 %v11307_v62  ;;  %vm11316_vm15 = vmmov %vm11315_vm3  ;;  %v6840_v41 = vpack.c.bf16 %v5143_v52, %v5141_v61 }
 0x600   : > { %v8254_v60 = vpop.permute.xlu1 %8253  ;;  %v8231_v33 = vunpack.i.h.bf16 %v8229_v23  ;;  %v8230_v30 = vunpack.i.l.bf16 %v8229_v23  ;;  %vm11320_vm14 = vmmov %vm11317_vm1 }
 0x601   : > { %v8256_v12 = vunpack.i.h.bf16 %v8254_v60  ;;  %v8255_v38 = vunpack.i.l.bf16 %v8254_v60  ;;  %v5145_v13 = vsel %vm11320_vm14, %v8235_v14, %v8236_v53  ;;  %vm11321_vm5 = vmmov %vm11317_vm1 }
 0x602   : > { %6827 = vmatpush1.bf16.msra.mxu1 %v11311_v10  ;;  %v5140_v57 = vsel %vm11318_vm2, %v8230_v30, %v8220_v4  ;;  %v5142_v0 = vsel %vm11319_vm8, %v8231_v33, %v8225_v18  ;;  %v5144_v25 = vsel %vm11321_vm5, %v8240_v55, %v8235_v14  ;;  %vm11323_vm11 = vmmov %vm11317_vm1 }
 0x603   : > { %v8244_v29 = vpop.permute.xlu0 %8243  ;;  %6830 = vmatprep.subr.msk.bf16.mxu1 %vm9129_vm12, %v6828_v40  ;;  %v6843_v21 = vpack.c.bf16 %v5142_v0, %v5140_v57  ;;  %vm11324_vm10 = vmmov %vm11317_vm1 }
 0x604   : > { %v8246_v43 = vunpack.i.h.bf16 %v8244_v29  ;;  %v8245_v22 = vunpack.i.l.bf16 %v8244_v29  ;;  %v8269_v9 = vpop.permute.xlu1 %8268 }
 0x605   : > { %v8271_v58 = vunpack.i.h.bf16 %v8269_v9  ;;  %v8270_v5 = vunpack.i.l.bf16 %v8269_v9 }
 0x606   : > { %v5066_v28 = vsel %vm11315_vm3, %v8216_v47, %v8245_v22  ;;  %v5067_v24 = vsel %vm11316_vm15, %v8245_v22, %v8246_v43  ;;  %6833 = vmatpush1.bf16.msk.msra.mxu1 %vm9223_vm13, %v6831_v48  ;;  %v5404_v48 = vld [vmem:[#allocation13] sm:$0xff]  ;;  %v5407_v22 = vld [vmem:[#allocation13 + $0x18] sm:$0xff] }
 0x607   : > { %v6834_v36 = vpack.c.bf16 %v5067_v24, %v5065_v2  ;;  %v6837_v63 = vpack.c.bf16 %v5066_v28, %v5064_v34  ;;  %v8249_v26 = vpop.permute.xlu0 %8248  ;;  %v5408_v43 = vld [vmem:[#allocation13 + $0x20] sm:$0xff] }
 0x608   : > { %v8251_v51 = vunpack.i.h.bf16 %v8249_v26  ;;  %v8250_v45 = vunpack.i.l.bf16 %v8249_v26  ;;  %v8279_v11 = vpop.permute.xlu1 %8278 }
 0x609   : > { %6836 = vmatprep.subr.msk.bf16.mxu1 %vm9129_vm12, %v6834_v36  ;;  %vm11322_vm12 = vcmask 916480   ;;  %v8280_v40 = vunpack.i.l.bf16 %v8279_v11  ;;  %v8281_v4 = vunpack.i.h.bf16 %v8279_v11 }
 0x60a   : > { %6839 = vmatpush1.bf16.msk.msra.mxu1 %vm9223_vm13, %v6837_v63  ;;  %v5221_v1 = vsel %vm11322_vm12, %v8250_v45, %v8251_v51  ;;  %vm11325_vm13 = vmmov %vm11322_vm12 }
 0x60b   : > { %v8259_v59 = vpop.permute.xlu0 %8258  ;;  %6842 = vmatprep.subr.msk.bf16.mxu1 %vm9242_vm9, %v6840_v41  ;;  %v5223_v46 = vsel %vm11325_vm13, %v8255_v38, %v8256_v12  ;;  %vm11326_vm6 = vmmov %vm11322_vm12 }
 0x60c   : > { %v8261_v54 = vunpack.i.h.bf16 %v8259_v59  ;;  %v8260_v27 = vunpack.i.l.bf16 %v8259_v59  ;;  %v6852_v37 = vpack.c.bf16 %v5223_v46, %v5221_v1  ;;  %vm11327_vm7 = vmmov %vm11326_vm6 }
 0x60d   : > { %vm11329_vm3 = vmmov %vm11326_vm6 }
 0x60e   : > { %v5146_v15 = vsel %vm11323_vm11, %v8241_v16, %v8260_v27  ;;  %v5147_v6 = vsel %vm11324_vm10, %v8260_v27, %v8261_v54  ;;  %6845 = vmatpush1.bf16.msk.msra.mxu1 %vm9178_vm0, %v6843_v21  ;;  %v5225_v35 = vsel %vm11329_vm3, %v8270_v5, %v8271_v58  ;;  %vm11331_vm15 = vmmov %vm11329_vm3 }
 0x60f   : > { %v6846_v49 = vpack.c.bf16 %v5147_v6, %v5145_v13  ;;  %v6849_v17 = vpack.c.bf16 %v5146_v15, %v5144_v25  ;;  %v8264_v44 = vpop.permute.xlu0 %8263  ;;  %vm11332_vm1 = vmmov %vm11329_vm3 }
 0x610   : > { %v8266_v23 = vunpack.i.h.bf16 %v8264_v44  ;;  %v8265_v62 = vunpack.i.l.bf16 %v8264_v44 }
 0x611   : > { %6848 = vmatprep.subr.msk.bf16.mxu1 %vm9242_vm9, %v6846_v49  ;;  %vm11330_vm9 = vmmov %vm11329_vm3 }
 0x612   : > { %v5220_v32 = vsel %vm11326_vm6, %v8265_v62, %v8250_v45  ;;  %v5222_v31 = vsel %vm11327_vm7, %v8266_v23, %v8255_v38  ;;  %6851 = vmatpush1.bf16.msk.msra.mxu1 %vm9178_vm0, %v6849_v17  ;;  %v5224_v20 = vsel %vm11330_vm9, %v8280_v40, %v8270_v5 }
 0x613   : > { %v6855_v19 = vpack.c.bf16 %v5222_v31, %v5220_v32  ;;  %v8274_v8 = vpop.permute.xlu0 %8273  ;;  %6854 = vmatprep.subr.msk.bf16.mxu1 %vm11328_vm4, %v6852_v37 }
 0x614   : > { %v8276_v10 = vunpack.i.h.bf16 %v8274_v8  ;;  %v8275_v47 = vunpack.i.l.bf16 %v8274_v8 }
 0x616   : > { %v5226_v60 = vsel %vm11331_vm15, %v8281_v4, %v8275_v47  ;;  %v5227_v29 = vsel %vm11332_vm1, %v8275_v47, %v8276_v10  ;;  %6856 = vmatpush1.bf16.msra.mxu1 %v6855_v19 }
 0x617   : > { %v6857_v56 = vpack.c.bf16 %v5227_v29, %v5225_v35  ;;  %v6860_v18 = vpack.c.bf16 %v5226_v60, %v5224_v20 }
 0x618   : > { %v10812_v33 = vpop.permute.xlu1 %5419 }
 0x619   : > { %6859 = vmatprep.subr.msk.bf16.mxu1 %vm11328_vm4, %v6857_v56 }
 0x61a   : > { %6861 = vmatpush1.bf16.msra.mxu1 %v6860_v18 }
 0x61c   : > { %v3524_v24 = vpop.permute.xlu1 %3523 }
 0x61d   : > { %5493 = vmatmul.mubr.f32.vlgmr.msra.gmra.mrb[12].mxu1 %v5404_v48 }
 0x61e   : > { %5498 = vmatprep.mubr.f32.mxu1 %v5408_v43 }
 0x621   : > { %5499 = vmatmul.mubr.f32.gmra.mrb[14].mxu1 %v5407_v22 }
 0x624   : > { %v5415_v2 = vpop.permute.xlu0 %5414 }
 0x628   : > { %v3519_v30 = vpop.permute.xlu0 %3518 }
 0x69c   : > { %v3675_v34 = vpop.f32.mrb[8].mxu1 }
 0x69d   : > { %v6910_v61 = vadd.f32 %v3675_v34, %v3519_v30  ;;  %v3677_v28 = vpop.f32.mrb[9].mxu1 }
 0x69e   : > { %v6911_v7 = vadd.f32 %v3677_v28, %v3519_v30 }
 0x69f   : > { %3686 = vst [vmem:[%s628_s19] sm:$0xff] %v6910_v61 }
 0x6a0   : > { %3687 = vst [vmem:[%s628_s19 + $0x8] sm:$0xff] %v6911_v7  ;;  %v3681_v36 = vpop.f32.mrb[10].mxu1 }
 0x6a1   : > { %v6912_v63 = vadd.f32 %v3681_v36, %v3524_v24  ;;  %v3683_v26 = vpop.f32.mrb[11].mxu1 }
 0x6a2   : > { %v6913_v52 = vadd.f32 %v3683_v26, %v3524_v24 }
 0x6a3   : > { %3688 = vst [vmem:[%s628_s19 + $0x10] sm:$0xff] %v6912_v63 }
 0x6a4   : > { %3689 = vst [vmem:[%s628_s19 + $0x18] sm:$0xff] %v6913_v52 }
 0x6a5   : > { %8445 = shalt.err (!%p8442_p13)
}
 0x6a6   : > { %s8446_s19 = scalar_lea.hbm %s10824_s3, 512  ;;  %s8450_s5 = scalar_lea.hbm %s11333_s0, 1024 }
 0x6a7   : > { %p8447_p9 = scmp.ne.s32.totalorder %s10824_s3, %s8446_s19  ;;  %p8451_p4 = scmp.lt.u32.totalorder %s10824_s3, %s11333_s0 }
 0x6a8   : > { %p8452_p8 = scmp.lt.u32.totalorder %s8450_s5, %s8446_s19  ;;  %p8454_p3 = scmp.lt.u32.totalorder %s8446_s19, %s10824_s3 }
 0x6a9   : > { %p8448_p0 = pnand %p8447_p9, %p8856_p10 }
 0x6aa   : > { %p8453_p6 = por %p8452_p8, %p8451_p4 }
 0x6ab   : > { %p8449_p11 = pneg %p8448_p0 }
 0x6ac   : > { %p8455_p5 = por %p8454_p3, %p8453_p6 }
 0x6ae   : > { %p8456_p7 = pnand %p8455_p5, %p8449_p11 }
 0x6b0   : > { %8459 = shalt.err (!%p8456_p7)
}
 0x6b1   : > { %s11016_s8 = smov 256   ;;  %s11334_s10 = sld [smem:[#allocation36_spill]]  ;;  %v5784_v14 = vpop.f32.mrb[30].mxu0  ;;  %vm5788_vm0 = vcmask 24576  }
 0x6b2   : > { %6984 = dma.vmem_to_hbm [thread:$0]  (%p8856_p10), %s10817_s21, 512, %s10824_s3, %s5791_s18, %s11016_s8, %s11016_s8, %s11084_s20   ;;  %v6373_v57 = vpop.f32.mrb[31].mxu0 }
 0x6b3   : > { %s641_s19 = scalar_lea.vmem [#allocation17], %s8908_s24  ;;  %s635_s21 = scalar_lea.vmem [#allocation15], %s6026_s29 }
 0x6b4   : > { %s5829_s3 = sshll.u32 %s635_s21, 4  ;;  %s5795_s18 = sand.u32 1, %s8704_s28   ;;  %s10865_s3 = int_to_ptr.vmem [resolvable:$true] %s5829_s3 }
 0x6b5   : > { %s6056_s12 = sshll.u32 %s8704_s28, 4  ;;  %s5845_s5 = sshll.u32 %s641_s19, 4  ;;  %s10881_s5 = int_to_ptr.vmem [resolvable:$true] %s5845_s5 }
 0x6b6   : > { %s11335_s24 = sshll.u32 %s8704_s28, 9  ;;  %s11336_s16 = sld [smem:[#allocation38_spill]] }
 0x6b7   : > { %v5714_v53 = vld [vmem:[%s11334_s10] sm:$0x1]  ;;  %s11337_s0 = sld [smem:[#allocation39_spill]]  ;;  %s10883_s2 = scalar_lea.sflag [#allocation16], %s5795_s18 }
 0x6b8   : > { %v5785_v41 = vadd.f32 %v5784_v14, %v5714_v53  ;;  %s8460_s4 = scalar_lea.vmem %s10865_s3, 512  ;;  %s8591_s28 = smov [#allocation15]  }
 0x6b9   : > { %p8461_p12 = scmp.ne.s32.totalorder %s10865_s3, %s8460_s4  ;;  %s8464_s29 = sshll.u32 %s8591_s28, 4  ;;  %s8465_s29 = int_to_ptr.vmem [resolvable:$false] %s8464_s29 }
 0x6ba   : > { %5789 = vst.msk [vmem:[%s641_s19] sm:$0x1] %vm5788_vm0, %v5785_v41  ;;  %p8467_p13 = scmp.lt.s32.totalorder %s10865_s3, %s8465_s29 }
 0x6bb   : > { %p8462_p1 = pnand %p8461_p12, %p8856_p10 }
 0x6bc   : > { %s10874_s1 = scalar_lea.hbm %s11336_s16, %s11335_s24  ;;  %s8466_s24 = scalar_lea.vmem %s8465_s29, 1024 }
 0x6bd   : > { %s10879_s19 = scalar_lea.hbm %s11337_s0, %s6056_s12  ;;  %p8463_p2 = pneg %p8462_p1 }
 0x6be   : > { %p8468_p9 = scmp.lt.s32.totalorder %s8466_s24, %s8460_s4 }
 0x6c0   : > { %p8469_p0 = por %p8468_p9, %p8467_p13 }
 0x6c2   : > { %p8470_p11 = pnand %p8469_p0, %p8463_p2 }
 0x6f0   : > { %v5494_v0 = vpop.f32.mrb[12].mxu1 }
 0x6f1   : > { %v5495_v9 = vadd.f32 %v5494_v0, %v5415_v2  ;;  %v5496_v55 = vpop.f32.mrb[13].mxu1 }
 0x6f2   : > { %v5497_v51 = vadd.f32 %v5496_v55, %v5415_v2 }
 0x6f3   : > { %v5572_v45 = vadd.f32 %v10579_v39, %v5495_v9 }
 0x6f4   : > { %v5574_v16 = vadd.f32 %v10583_v42, %v5497_v51  ;;  %v5500_v12 = vpop.f32.mrb[14].mxu1 }
 0x6f5   : > { %5582 = vst [vmem:[%s635_s21] sm:$0xff] %v5572_v45  ;;  %v5501_v59 = vadd.f32 %v5500_v12, %v10812_v33  ;;  %v5502_v21 = vpop.f32.mrb[15].mxu1 }
 0x6f6   : > { %5583 = vst [vmem:[%s635_s21 + $0x8] sm:$0xff] %v5574_v16  ;;  %v5503_v38 = vadd.f32 %v5502_v21, %v10812_v33 }
 0x6f7   : > { %v5578_v39 = vadd.f32 %v10591_v50, %v5501_v59 }
 0x6f8   : > { %v5580_v42 = vadd.f32 %v10595_v3, %v5503_v38 }
 0x6f9   : > { %5584 = vst [vmem:[%s635_s21 + $0x10] sm:$0xff] %v5578_v39 }
 0x6fa   : > { %5585 = vst [vmem:[%s635_s21 + $0x18] sm:$0xff] %v5580_v42 }
 0x6fb   : > { %8473 = shalt.err (!%p8470_p11)
}
 0x6fc   : > { %s8474_s8 = scalar_lea.hbm %s10874_s1, 512  ;;  %s8478_s12 = scalar_lea.hbm %s11336_s16, 1024 }
 0x6fd   : > { %p8475_p4 = scmp.ne.s32.totalorder %s10874_s1, %s8474_s8  ;;  %p8479_p3 = scmp.lt.u32.totalorder %s10874_s1, %s11336_s16 }
 0x6fe   : > { %p8480_p5 = scmp.lt.u32.totalorder %s8478_s12, %s8474_s8  ;;  %p8482_p12 = scmp.lt.u32.totalorder %s8474_s8, %s10874_s1 }
 0x6ff   : > { %p8476_p8 = pnand %p8475_p4, %p8856_p10 }
 0x700   : > { %p8481_p7 = por %p8480_p5, %p8479_p3 }
 0x701   : > { %p8477_p6 = pneg %p8476_p8 }
 0x702   : > { %p8483_p1 = por %p8482_p12, %p8481_p7 }
 0x704   : > { %p8484_p2 = pnand %p8483_p1, %p8477_p6 }
 0x706   : > { %8487 = shalt.err (!%p8484_p2)
}
 0x707   : > { %s11338_s4 = smov 256   ;;  %s8488_s28 = scalar_lea.vmem %s10881_s5, 16 }
 0x708   : > { %6985 = dma.vmem_to_hbm [thread:$0]  (%p8856_p10), %s10865_s3, 512, %s10874_s1, %s10883_s2, %s11338_s4, %s11338_s4, %s11084_s20  }
 0x709   : > { %p8489_p13 = scmp.ne.s32.totalorder %s10881_s5, %s8488_s28  ;;  %s8592_s29 = smov [#allocation17]  }
 0x70a   : > { %s8492_s24 = sshll.u32 %s8592_s29, 4  ;;  %s8493_s24 = int_to_ptr.vmem [resolvable:$false] %s8492_s24 }
 0x70b   : > { %p8490_p9 = pnand %p8489_p13, %p8856_p10  ;;  %s8494_s8 = scalar_lea.vmem %s8493_s24, 32 }
 0x70c   : > { %p8495_p11 = scmp.lt.s32.totalorder %s10881_s5, %s8493_s24  ;;  %p8496_p4 = scmp.lt.s32.totalorder %s8494_s8, %s8488_s28 }
 0x70d   : > { %p8491_p0 = pneg %p8490_p9 }
 0x70e   : > { %p8497_p8 = por %p8496_p4, %p8495_p11 }
 0x710   : > { %p8498_p6 = pnand %p8497_p8, %p8491_p0 }
 0x712   : > { %8501 = shalt.err (!%p8498_p6)
}
 0x713   : > { %s8502_s20 = scalar_lea.hbm %s10879_s19, 16  ;;  %s8506_s21 = scalar_lea.hbm %s11337_s0, 32 }
 0x714   : > { %p8503_p3 = scmp.ne.s32.totalorder %s10879_s19, %s8502_s20  ;;  %p8507_p12 = scmp.lt.u32.totalorder %s10879_s19, %s11337_s0 }
 0x715   : > { %p8508_p1 = scmp.lt.u32.totalorder %s8506_s21, %s8502_s20  ;;  %p8510_p13 = scmp.lt.u32.totalorder %s8502_s20, %s10879_s19 }
 0x716   : > { %p8504_p5 = pnand %p8503_p3, %p8856_p10 }
 0x717   : > { %p8509_p2 = por %p8508_p1, %p8507_p12 }
 0x718   : > { %p8505_p7 = pneg %p8504_p5 }
 0x719   : > { %p8511_p9 = por %p8510_p13, %p8509_p2 }
 0x71b   : > { %p8512_p0 = pnand %p8511_p9, %p8505_p7 }
 0x71d   : > { %8515 = shalt.err (!%p8512_p0)
}
 0x71e   : > { %6986 = dma.vmem_to_hbm [thread:$0]  (%p8856_p10), %s10881_s5, 16, %s10879_s19, %s10883_s2  }
 0x71f PF: > { %s11339_s6 = sld [smem:[#allocation23_spill]]  ;;  %s11340_s10 = sld [smem:[#allocation24_spill]] }
 0x720   : > { %p11342_p4 = scmp.ge.s32.totalorder %s8566_s27, 2 }
 0x725   : > { %s5857_s4 = sand.u32 1, %s11339_s6   ;;  %p11341_p11 = scmp.ne.s32.totalorder %s11340_s10, 0 }
 0x726   : > { %s5858_s28 = scalar_lea.sflag [#allocation7], %s5857_s4 }
 0x727   : > { %p7008_p8 = pnand %p11342_p4, %p11341_p11 }
 0x729   : > { %8545 = dma.done.wait (!%p7008_p8), %s5858_s28, 512  }
 0x72a   : > { %8547 = vsyncadd (!%p7008_p8), %s5858_s28, 4294966784  ;;  %s11343_s29 = sadd.s32 4294967294, %s8566_s27  }
 0x72b   : > { %s5866_s24 = sand.u32 1, %s11343_s29  }
 0x72c   : > { %s5867_s8 = scalar_lea.sflag [#allocation16], %s5866_s24 }
 0x72d   : > { %8549 = dma.done.wait (!%p7008_p8), %s5867_s8, 528  }
 0x72e   : > { %8551 = vsyncadd (!%p7008_p8), %s5867_s8, 4294966768  ;;  %p36_p10 = scmp.ge.s32.totalorder %s8846_s14, 4   ;;  %s11344_s24 = smov %s8558_s25 }
 0x72f   : > { %s11345_s25 = smov %s8562_s26  ;;  %s11346_s26 = smov %s8862_s30 }
 0x730   : > { %s11347_s27 = smov %s8846_s14  ;;  %38 = sbr.rel (!%p36_p10) target bundleno = 24 (0x18), region = 173 }
 0x737   :  { %5880 = vsyncpa [#allocation6], 1 }
 0x738   :  { %5882 = vsyncpa [#allocation6 + $0x1], 1 }
 0x739   :  { %5883 = vsyncpa [#allocation9], 1 }
 0x73a   :  { %5884 = vsyncpa [#allocation12], 1 }
 0x73b   :  { %5885 = vsyncpa [#allocation7], 1 }
 0x73c   :  { %5887 = vsyncpa [#allocation7 + $0x1], 1 }
 0x73d   :  { %5888 = vsyncpa [#allocation16], 1 }
 0x73e   :  { %5890 = vsyncpa [#allocation16 + $0x1], 1 }

</bundles_post_ra>
